<compile_context>
chip_gen: v7x
topology: tpu7x:2x2x1
jax: 0.10.0
libtpu: 0.0.40
codegen_flags: <defaults>
</compile_context>

<pallas_src>
import math
import functools

import numpy as np
import jax
import jax.numpy as jnp
from jax.experimental import pallas as pl
from jax.experimental.pallas import tpu as pltpu

EMBED_SIZE = 32
HEADS = 4
HEAD_DIM = EMBED_SIZE // HEADS
FORWARD_EXPANSION = 4
FF_DIM = FORWARD_EXPANSION * EMBED_SIZE          # 128
NUM_LAYERS = 2
MAX_LENGTH = 64
VOCAB = 50
PAD_IDX = 1
LN_EPS = 1e-5                                    # PyTorch nn.LayerNorm default
NEG_INF = -1e20


# ----------------------------- Pallas kernel ------------------------------- #

def _layernorm(x, w, b):
    mu = jnp.mean(x, axis=-1, keepdims=True)
    var = jnp.mean((x - mu) ** 2, axis=-1, keepdims=True)
    return (x - mu) * jax.lax.rsqrt(var + LN_EPS) * w + b


def encoder_stack_kernel(x_ref, bias_ref,
                         wq_ref, wk_ref, wv_ref, wo_ref, w1_ref, w2_ref,
                         vec_ref, out_ref,
                         *, num_layers, heads, head_dim, embed_size, ff_dim,
                         tb, seq_len):
    TB, L, E, F, D = tb, seq_len, embed_size, ff_dim, head_dim
    R = TB * L

    x2 = x_ref[...].astype(jnp.float32).reshape(R, E)            # (rows, E)

    # additive padding mask, broadcast ONCE (hoisted out of head/layer loops)
    bias = jnp.broadcast_to(bias_ref[...], (TB, L, L))            # (TB, L, L)

    for l in range(num_layers):                                   # static unroll
        vec = vec_ref[l]                                          # (8, 128) packed 1-D params
        bo, ln1w, ln1b = vec[0:1, :E], vec[1:2, :E], vec[2:3, :E]
        b1 = vec[3:4, :F]
        b2, ln2w, ln2b = vec[4:5, :E], vec[5:6, :E], vec[6:7, :E]

        # Multi-head attention.  Per-head Q/K/V come straight out of the MXU
        # (zero-padded per-head weights do the "column slice"), and the head
        # merge is the accumulated ctx_h @ Wo_h -- no lane slices, no concat.
        attn = jnp.zeros((R, E), jnp.float32)
        for h in range(heads):                                    # static, H = 4
            q = jnp.dot(x2, wq_ref[l, h],                          # Q pre-scaled by 1/sqrt(E)
                        preferred_element_type=jnp.float32).reshape(TB, L, D)
            k = jnp.dot(x2, wk_ref[l, h],
                        preferred_element_type=jnp.float32).reshape(TB, L, D)
            v = jnp.dot(x2, wv_ref[l, h],
                        preferred_element_type=jnp.float32).reshape(TB, L, D)

            e = jnp.einsum('bqd,bkd->bqk', q, k,
                           preferred_element_type=jnp.float32) + bias  # (TB, L, L)
            m = jnp.max(e, axis=-1, keepdims=True)
            p = jnp.exp(e - m)
            a = p * pl.reciprocal(jnp.sum(p, axis=-1, keepdims=True),
                                  approx=False)                   # exact, EUP slot
            c = jnp.einsum('bqk,bkd->bqd', a, v,
                           preferred_element_type=jnp.float32).reshape(R, D)
            attn = attn + jnp.dot(c, wo_ref[l, h],
                                  preferred_element_type=jnp.float32)

        # dropout is identity (eval); residual + LayerNorm 1
        x1 = _layernorm(attn + bo + x2, ln1w, ln1b)

        # feed-forward: Linear -> ReLU -> Linear
        f = jnp.maximum(jnp.dot(x1, w1_ref[l],
                                preferred_element_type=jnp.float32) + b1, 0.0)
        f = jnp.dot(f, w2_ref[l], preferred_element_type=jnp.float32) + b2

        # residual + LayerNorm 2
        x2 = _layernorm(f + x1, ln2w, ln2b)

    out_ref[...] = x2.reshape(TB, L, E).astype(out_ref.dtype)


# ------------------------- wrapper / weight packing ------------------------ #

def _block_rows(wT, h):
    """Zero-pad a transposed per-head (D, D) weight into (E, D): only rows
    h*D:(h+1)*D are nonzero, so x2 @ result == x2[:, h*D:(h+1)*D] @ wT with
    no in-kernel lane slicing."""
    E, D = EMBED_SIZE, HEAD_DIM
    z = jnp.zeros((E, D), jnp.float32)
    return z.at[h * D:(h + 1) * D, :].set(wT.astype(jnp.float32))


def _pack_vecs(lp):
    """Pack the seven 1-D params of a layer into one lane-dense (8, 128) slab."""
    width = max(FF_DIM, 128)

    def pad(v):
        v = v.astype(jnp.float32)
        return jnp.pad(v, (0, width - v.shape[0]))

    rows = [pad(lp['bo']), pad(lp['ln1w']), pad(lp['ln1b']), pad(lp['b1']),
            pad(lp['b2']), pad(lp['ln2w']), pad(lp['ln2b']),
            jnp.zeros((width,), jnp.float32)]
    return jnp.stack(rows, axis=0)                            # (8, 128)


def _pack_layer_weights(layers):
    E, D, H = EMBED_SIZE, HEAD_DIM, HEADS
    scale = 1.0 / math.sqrt(float(E))                         # fold softmax scale into Q
    wq, wk, wv, wo, w1, w2, vec = [], [], [], [], [], [], []
    for lp in layers:
        woT = lp['wo'].T.astype(jnp.float32)                  # (E, E)
        wq.append(jnp.stack([_block_rows(lp['wq'].T, h) * scale for h in range(H)]))
        wk.append(jnp.stack([_block_rows(lp['wk'].T, h) for h in range(H)]))
        wv.append(jnp.stack([_block_rows(lp['wv'].T, h) for h in range(H)]))
        wo.append(jnp.stack([woT[h * D:(h + 1) * D, :] for h in range(H)]))  # (H, D, E)
        w1.append(lp['w1'].T.astype(jnp.float32))             # (E, F)
        w2.append(lp['w2'].T.astype(jnp.float32))             # (F, E)
        vec.append(_pack_vecs(lp))
    return (jnp.stack(wq), jnp.stack(wk), jnp.stack(wv), jnp.stack(wo),
            jnp.stack(w1), jnp.stack(w2), jnp.stack(vec))


def _num_tensorcores():
    """Best-effort TensorCores-per-chip (2 on v7x-class parts, else 1)."""
    try:
        d = jax.devices()[0]
        for attr in ("num_cores", "core_count"):
            v = getattr(d, attr, None)
            if isinstance(v, int) and v > 0:
                return max(1, min(int(v), 8))
    except Exception:
        pass
    return 1


def _pick_tb(batch, seq_len, n_cores, max_rows=4096, min_rows_per_core=512):
    """Sequences per grid step.

    * As large as VMEM comfortably allows (max_rows keeps the f32 working set
      well under the scoped-VMEM default on v5e/v6e AND v7x's smaller 64 MiB,
      so vmem_limit_bytes never needs raising).
    * Only split into >=n_cores parallel blocks (v7x megacore) when each block
      still has >= min_rows_per_core rows; on single-TC v5e/v6e, or for small
      batches, everything runs in one grid step (no per-step overhead)."""
    def largest_divisor_leq(n, ub):
        best = 1
        for d in range(1, min(n, ub) + 1):
            if n % d == 0:
                best = d
        return best

    cap = max(1, max_rows // seq_len)
    tb = largest_divisor_leq(batch, cap)
    if n_cores > 1 and tb == batch and batch >= n_cores:
        split = largest_divisor_leq(batch, max(1, batch // n_cores))
        if split * seq_len >= min_rows_per_core:
            tb = split
    return tb


def _full_spec(arr):
    nd = arr.ndim
    return pl.BlockSpec(arr.shape, lambda *_: (0,) * nd)      # grid-invariant block


def encoder_stack_pallas(x, bias, layers):
    """x: (B, L, E) float32; bias: (B, 1, L) additive mask (0 keep / -1e20 mask)."""
    B, L, E = x.shape
    (wq_all, wk_all, wv_all, wo_all,
     w1_all, w2_all, vec_all) = _pack_layer_weights(layers)

    TB = _pick_tb(B, L, _num_tensorcores())
    grid = (B // TB,)

    kernel = functools.partial(
        encoder_stack_kernel, num_layers=len(layers), heads=HEADS,
        head_dim=HEAD_DIM, embed_size=E, ff_dim=FF_DIM, tb=TB, seq_len=L)

    in_specs = [
        pl.BlockSpec((TB, L, E), lambda b: (b, 0, 0)),        # activations, per batch tile
        pl.BlockSpec((TB, 1, L), lambda b: (b, 0, 0)),        # additive mask bias
        _full_spec(wq_all), _full_spec(wk_all), _full_spec(wv_all),
        _full_spec(wo_all), _full_spec(w1_all), _full_spec(w2_all),
        _full_spec(vec_all),
    ]

    return pl.pallas_call(
        kernel,
        out_shape=jax.ShapeDtypeStruct((B, L, E), jnp.float32),
        grid=grid,
        in_specs=in_specs,
        out_specs=pl.BlockSpec((TB, L, E), lambda b: (b, 0, 0)),
        compiler_params=pltpu.CompilerParams(dimension_semantics=("parallel",)),
    )(x, bias, wq_all, wk_all, wv_all, wo_all, w1_all, w2_all, vec_all)


# --------------------------- glue (plain JAX) ------------------------------ #

def positional_encoding(embed_size, max_len):
    pe = np.zeros((max_len, embed_size), dtype=np.float32)
    position = np.arange(max_len, dtype=np.float32)[:, None]
    div_term = np.exp(np.arange(0, embed_size, 2, dtype=np.float32)
                      * (-math.log(10000.0) / embed_size))
    pe[:, 0::2] = np.sin(position * div_term)
    pe[:, 1::2] = np.cos(position * div_term)
    return jnp.asarray(pe)


def init_params(key):
    ks = jax.random.split(key, 2 + NUM_LAYERS)
    E, D, F = EMBED_SIZE, HEAD_DIM, FF_DIM
    embedding = jax.random.normal(ks[0], (VOCAB, E), jnp.float32) * 0.1
    cls_token = jax.random.normal(ks[1], (1, 1, E), jnp.float32) * 0.02
    layers = []
    for i in range(NUM_LAYERS):
        lk = jax.random.split(ks[2 + i], 9)
        layers.append(dict(
            wq=jax.random.normal(lk[0], (D, D)) / math.sqrt(D),
            wk=jax.random.normal(lk[1], (D, D)) / math.sqrt(D),
            wv=jax.random.normal(lk[2], (D, D)) / math.sqrt(D),
            wo=jax.random.normal(lk[3], (E, E)) / math.sqrt(E),
            bo=jax.random.normal(lk[4], (E,)) * 0.01,
            ln1w=jnp.ones((E,), jnp.float32), ln1b=jnp.zeros((E,), jnp.float32),
            w1=jax.random.normal(lk[5], (F, E)) / math.sqrt(E),
            b1=jax.random.normal(lk[6], (F,)) * 0.01,
            w2=jax.random.normal(lk[7], (E, F)) / math.sqrt(F),
            b2=jax.random.normal(lk[8], (E,)) * 0.01,
            ln2w=jnp.ones((E,), jnp.float32), ln2b=jnp.zeros((E,), jnp.float32),
        ))
    return dict(embedding=embedding, cls_token=cls_token,
                pe=positional_encoding(E, MAX_LENGTH), layers=layers)


def _embed_and_mask(tokens, params):
    # TODO(synk): embedding gather / CLS concat / positional add stay in plain JAX
    # (data-dependent gather; not worth a custom DMA-gather at this size).
    B, S = tokens.shape
    emb = jnp.take(params['embedding'], tokens, axis=0)
    cls = jnp.broadcast_to(params['cls_token'], (B, 1, EMBED_SIZE))
    out = jnp.concatenate([cls, emb], axis=1)                        # (B, S+1, E)
    out = out + params['pe'][None, :S + 1, :]
    mask_bool = jnp.concatenate([jnp.ones((B, 1), dtype=bool),
                                 tokens != PAD_IDX], axis=1)         # (B, S+1)
    return out, mask_bool


def encoder_forward(tokens, params):
    out, mask_bool = _embed_and_mask(tokens, params)
    bias = jnp.where(mask_bool, 0.0, NEG_INF).astype(jnp.float32)[:, None, :]
    return encoder_stack_pallas(out, bias, params['layers'])


# -------------------------- pure-JAX reference ----------------------------- #

def _ref_block(x, mask_bool, p):
    B, L, E = x.shape
    H, D = HEADS, HEAD_DIM
    xh = x.reshape(B, L, H, D)
    v = xh @ p['wv'].T
    k = xh @ p['wk'].T
    q = xh @ p['wq'].T
    qh = q.transpose(0, 2, 1, 3)
    kh = k.transpose(0, 2, 1, 3)
    energy = qh @ kh.transpose(0, 1, 3, 2)                           # (B,H,L,L)
    energy = jnp.where(mask_bool[:, None, None, :], energy, NEG_INF)
    attn = jax.nn.softmax(energy / math.sqrt(float(E)), axis=3)
    out = jnp.einsum('nhql,nlhd->nqhd', attn, v).reshape(B, L, E)
    out = out @ p['wo'].T + p['bo']
    x1 = _layernorm(out + x, p['ln1w'], p['ln1b'])
    f = jax.nn.relu(x1 @ p['w1'].T + p['b1']) @ p['w2'].T + p['b2']
    return _layernorm(f + x1, p['ln2w'], p['ln2b'])


def ref_encoder_forward(tokens, params):
    out, mask_bool = _embed_and_mask(tokens, params)
    for lp in params['layers']:
        out = _ref_block(out, mask_bool, lp)
    return out


# ---------------------------------- main ----------------------------------- #

if __name__ == "__main__":
    key = jax.random.PRNGKey(0)
    pkey, tkey = jax.random.split(key)
    params = init_params(pkey)

    B, S = 2, 7                              # L = S + 1 (CLS) = 8
    tokens = jax.random.randint(tkey, (B, S), 0, VOCAB)
    tokens = tokens.at[0, -2:].set(PAD_IDX)  # exercise the padding mask

    out = jax.block_until_ready(encoder_forward(tokens, params))
    ref = ref_encoder_forward(tokens, params)
    assert out.shape == (B, S + 1, EMBED_SIZE)
    assert jnp.allclose(out, ref, atol=1e-4, rtol=1e-4), \
        float(jnp.max(jnp.abs(out - ref)))
    print("KERNEL_OK")
</pallas_src>

<mosaic_0001>
module attributes {stable_mosaic.version = 11 : i64} {
  func.func @encoder_stack_kernel(%arg0: i32, %arg1: memref<2x8x32xf32, #tpu.memory_space<vmem>>, %arg2: memref<2x1x8xf32, #tpu.memory_space<vmem>>, %arg3: memref<2x4x32x8xf32, #tpu.memory_space<vmem>>, %arg4: memref<2x4x32x8xf32, #tpu.memory_space<vmem>>, %arg5: memref<2x4x32x8xf32, #tpu.memory_space<vmem>>, %arg6: memref<2x4x8x32xf32, #tpu.memory_space<vmem>>, %arg7: memref<2x32x128xf32, #tpu.memory_space<vmem>>, %arg8: memref<2x128x32xf32, #tpu.memory_space<vmem>>, %arg9: memref<2x8x128xf32, #tpu.memory_space<vmem>>, %arg10: memref<2x8x32xf32, #tpu.memory_space<vmem>>) attributes {dimension_semantics = [#tpu.dimension_semantics<parallel>], iteration_bounds = array<i64: 1>, scalar_prefetch = 0 : i64, scratch_operands = 0 : i64, tpu.core_type = #tpu.core_type<tc>, window_params = [{transform_indices = @transform_0, window_bounds = array<i64: 2, 8, 32>}, {transform_indices = @transform_1, window_bounds = array<i64: 2, 1, 8>}, {pipeline_mode = #tpu.pipeline_mode<synchronous>, transform_indices = @transform_2, window_bounds = array<i64: 2, 4, 32, 8>}, {pipeline_mode = #tpu.pipeline_mode<synchronous>, transform_indices = @transform_3, window_bounds = array<i64: 2, 4, 32, 8>}, {pipeline_mode = #tpu.pipeline_mode<synchronous>, transform_indices = @transform_4, window_bounds = array<i64: 2, 4, 32, 8>}, {pipeline_mode = #tpu.pipeline_mode<synchronous>, transform_indices = @transform_5, window_bounds = array<i64: 2, 4, 8, 32>}, {pipeline_mode = #tpu.pipeline_mode<synchronous>, transform_indices = @transform_6, window_bounds = array<i64: 2, 32, 128>}, {pipeline_mode = #tpu.pipeline_mode<synchronous>, transform_indices = @transform_7, window_bounds = array<i64: 2, 128, 32>}, {pipeline_mode = #tpu.pipeline_mode<synchronous>, transform_indices = @transform_8, window_bounds = array<i64: 2, 8, 128>}, {transform_indices = @transform_9, window_bounds = array<i64: 2, 8, 32>}]} {
    %c0 = arith.constant 0 : index
    %c0_0 = arith.constant 0 : index
    %c0_1 = arith.constant 0 : index
    %0 = vector.load %arg1[%c0, %c0_0, %c0_1] : memref<2x8x32xf32, #tpu.memory_space<vmem>>, vector<2x8x32xf32>
    %1 = vector.shape_cast %0 : vector<2x8x32xf32> to vector<16x32xf32>
    %c0_2 = arith.constant 0 : index
    %c0_3 = arith.constant 0 : index
    %c0_4 = arith.constant 0 : index
    %2 = vector.load %arg2[%c0_2, %c0_3, %c0_4] : memref<2x1x8xf32, #tpu.memory_space<vmem>>, vector<2x1x8xf32>
    %3 = vector.shape_cast %2 : vector<2x1x8xf32> to vector<2x1x8xf32>
    %4 = vector.broadcast %3 : vector<2x1x8xf32> to vector<2x8x8xf32>
    %c0_5 = arith.constant 0 : index
    %c0_6 = arith.constant 0 : index
    %c0_7 = arith.constant 0 : index
    %5 = vector.load %arg9[%c0_5, %c0_6, %c0_7] : memref<2x8x128xf32, #tpu.memory_space<vmem>>, vector<1x8x128xf32>
    %6 = vector.shape_cast %5 : vector<1x8x128xf32> to vector<8x128xf32>
    %7 = vector.extract_strided_slice %6 {offsets = [0, 0], sizes = [1, 32], strides = [1, 1]} : vector<8x128xf32> to vector<1x32xf32>
    %8 = vector.extract_strided_slice %6 {offsets = [1, 0], sizes = [1, 32], strides = [1, 1]} : vector<8x128xf32> to vector<1x32xf32>
    %9 = vector.extract_strided_slice %6 {offsets = [2, 0], sizes = [1, 32], strides = [1, 1]} : vector<8x128xf32> to vector<1x32xf32>
    %10 = vector.extract_strided_slice %6 {offsets = [3, 0], sizes = [1, 128], strides = [1, 1]} : vector<8x128xf32> to vector<1x128xf32>
    %11 = vector.extract_strided_slice %6 {offsets = [4, 0], sizes = [1, 32], strides = [1, 1]} : vector<8x128xf32> to vector<1x32xf32>
    %12 = vector.extract_strided_slice %6 {offsets = [5, 0], sizes = [1, 32], strides = [1, 1]} : vector<8x128xf32> to vector<1x32xf32>
    %13 = vector.extract_strided_slice %6 {offsets = [6, 0], sizes = [1, 32], strides = [1, 1]} : vector<8x128xf32> to vector<1x32xf32>
    %cst = arith.constant 0.000000e+00 : f32
    %14 = vector.broadcast %cst : f32 to vector<16x32xf32>
    %c0_8 = arith.constant 0 : index
    %c0_9 = arith.constant 0 : index
    %c0_10 = arith.constant 0 : index
    %c0_11 = arith.constant 0 : index
    %15 = vector.load %arg3[%c0_8, %c0_9, %c0_10, %c0_11] : memref<2x4x32x8xf32, #tpu.memory_space<vmem>>, vector<1x1x32x8xf32>
    %16 = vector.shape_cast %15 : vector<1x1x32x8xf32> to vector<32x8xf32>
    %cst_12 = arith.constant dense<0.000000e+00> : vector<16x8xf32>
    %17 = tpu.matmul %1, %16, %cst_12 {dimension_numbers = #tpu.dot_dimension_numbers<[1], [0], [0], [1], [0, 0, 1, 1], [], []>} : vector<16x32xf32>, vector<32x8xf32>, vector<16x8xf32> -> vector<16x8xf32>
    %18 = vector.shape_cast %17 : vector<16x8xf32> to vector<2x8x8xf32>
    %c0_13 = arith.constant 0 : index
    %c0_14 = arith.constant 0 : index
    %c0_15 = arith.constant 0 : index
    %c0_16 = arith.constant 0 : index
    %19 = vector.load %arg4[%c0_13, %c0_14, %c0_15, %c0_16] : memref<2x4x32x8xf32, #tpu.memory_space<vmem>>, vector<1x1x32x8xf32>
    %20 = vector.shape_cast %19 : vector<1x1x32x8xf32> to vector<32x8xf32>
    %cst_17 = arith.constant dense<0.000000e+00> : vector<16x8xf32>
    %21 = tpu.matmul %1, %20, %cst_17 {dimension_numbers = #tpu.dot_dimension_numbers<[1], [0], [0], [1], [0, 0, 1, 1], [], []>} : vector<16x32xf32>, vector<32x8xf32>, vector<16x8xf32> -> vector<16x8xf32>
    %22 = vector.shape_cast %21 : vector<16x8xf32> to vector<2x8x8xf32>
    %c0_18 = arith.constant 0 : index
    %c0_19 = arith.constant 0 : index
    %c0_20 = arith.constant 0 : index
    %c0_21 = arith.constant 0 : index
    %23 = vector.load %arg5[%c0_18, %c0_19, %c0_20, %c0_21] : memref<2x4x32x8xf32, #tpu.memory_space<vmem>>, vector<1x1x32x8xf32>
    %24 = vector.shape_cast %23 : vector<1x1x32x8xf32> to vector<32x8xf32>
    %cst_22 = arith.constant dense<0.000000e+00> : vector<16x8xf32>
    %25 = tpu.matmul %1, %24, %cst_22 {dimension_numbers = #tpu.dot_dimension_numbers<[1], [0], [0], [1], [0, 0, 1, 1], [], []>} : vector<16x32xf32>, vector<32x8xf32>, vector<16x8xf32> -> vector<16x8xf32>
    %26 = vector.shape_cast %25 : vector<16x8xf32> to vector<2x8x8xf32>
    "tpu.trace_start"() <{level = 10 : i32, message = "bqd,bkd->bqk"}> : () -> ()
    %cst_23 = arith.constant dense<0.000000e+00> : vector<2x8x8xf32>
    %27 = tpu.matmul %18, %22, %cst_23 {dimension_numbers = #tpu.dot_dimension_numbers<[2], [2], [1], [1], [0, 0, 0, 1, 1, 1], [0], [0]>} : vector<2x8x8xf32>, vector<2x8x8xf32>, vector<2x8x8xf32> -> vector<2x8x8xf32>
    "tpu.trace_stop"() : () -> ()
    %28 = arith.addf %27, %4 : vector<2x8x8xf32>
    %cst_24 = arith.constant dense<0xFF800000> : vector<2x8xf32>
    %29 = vector.multi_reduction <maximumf>, %28, %cst_24 [2] : vector<2x8x8xf32> to vector<2x8xf32>
    %30 = vector.shape_cast %29 : vector<2x8xf32> to vector<2x8x1xf32>
    %31 = vector.broadcast %30 : vector<2x8x1xf32> to vector<2x8x8xf32>
    %32 = arith.subf %28, %31 : vector<2x8x8xf32>
    %33 = math.exp %32 : vector<2x8x8xf32>
    %cst_25 = arith.constant dense<0.000000e+00> : vector<2x8xf32>
    %34 = vector.multi_reduction <add>, %33, %cst_25 [2] : vector<2x8x8xf32> to vector<2x8xf32>
    %35 = vector.shape_cast %34 : vector<2x8xf32> to vector<2x8x1xf32>
    %36 = tpu.reciprocal %35 : vector<2x8x1xf32> -> vector<2x8x1xf32>
    %37 = vector.broadcast %36 : vector<2x8x1xf32> to vector<2x8x8xf32>
    %38 = arith.mulf %33, %37 : vector<2x8x8xf32>
    "tpu.trace_start"() <{level = 10 : i32, message = "bqk,bkd->bqd"}> : () -> ()
    %cst_26 = arith.constant dense<0.000000e+00> : vector<2x8x8xf32>
    %39 = tpu.matmul %38, %26, %cst_26 {dimension_numbers = #tpu.dot_dimension_numbers<[2], [1], [1], [2], [0, 0, 0, 1, 1, 2], [0], [0]>} : vector<2x8x8xf32>, vector<2x8x8xf32>, vector<2x8x8xf32> -> vector<2x8x8xf32>
    "tpu.trace_stop"() : () -> ()
    %40 = vector.shape_cast %39 : vector<2x8x8xf32> to vector<16x8xf32>
    %c0_27 = arith.constant 0 : index
    %c0_28 = arith.constant 0 : index
    %c0_29 = arith.constant 0 : index
    %c0_30 = arith.constant 0 : index
    %41 = vector.load %arg6[%c0_27, %c0_28, %c0_29, %c0_30] : memref<2x4x8x32xf32, #tpu.memory_space<vmem>>, vector<1x1x8x32xf32>
    %42 = vector.shape_cast %41 : vector<1x1x8x32xf32> to vector<8x32xf32>
    %cst_31 = arith.constant dense<0.000000e+00> : vector<16x32xf32>
    %43 = tpu.matmul %40, %42, %cst_31 {dimension_numbers = #tpu.dot_dimension_numbers<[1], [0], [0], [1], [0, 0, 1, 1], [], []>} : vector<16x8xf32>, vector<8x32xf32>, vector<16x32xf32> -> vector<16x32xf32>
    %44 = arith.addf %14, %43 : vector<16x32xf32>
    %c0_32 = arith.constant 0 : index
    %c1 = arith.constant 1 : index
    %c0_33 = arith.constant 0 : index
    %c0_34 = arith.constant 0 : index
    %45 = vector.load %arg3[%c0_32, %c1, %c0_33, %c0_34] : memref<2x4x32x8xf32, #tpu.memory_space<vmem>>, vector<1x1x32x8xf32>
    %46 = vector.shape_cast %45 : vector<1x1x32x8xf32> to vector<32x8xf32>
    %cst_35 = arith.constant dense<0.000000e+00> : vector<16x8xf32>
    %47 = tpu.matmul %1, %46, %cst_35 {dimension_numbers = #tpu.dot_dimension_numbers<[1], [0], [0], [1], [0, 0, 1, 1], [], []>} : vector<16x32xf32>, vector<32x8xf32>, vector<16x8xf32> -> vector<16x8xf32>
    %48 = vector.shape_cast %47 : vector<16x8xf32> to vector<2x8x8xf32>
    %c0_36 = arith.constant 0 : index
    %c1_37 = arith.constant 1 : index
    %c0_38 = arith.constant 0 : index
    %c0_39 = arith.constant 0 : index
    %49 = vector.load %arg4[%c0_36, %c1_37, %c0_38, %c0_39] : memref<2x4x32x8xf32, #tpu.memory_space<vmem>>, vector<1x1x32x8xf32>
    %50 = vector.shape_cast %49 : vector<1x1x32x8xf32> to vector<32x8xf32>
    %cst_40 = arith.constant dense<0.000000e+00> : vector<16x8xf32>
    %51 = tpu.matmul %1, %50, %cst_40 {dimension_numbers = #tpu.dot_dimension_numbers<[1], [0], [0], [1], [0, 0, 1, 1], [], []>} : vector<16x32xf32>, vector<32x8xf32>, vector<16x8xf32> -> vector<16x8xf32>
    %52 = vector.shape_cast %51 : vector<16x8xf32> to vector<2x8x8xf32>
    %c0_41 = arith.constant 0 : index
    %c1_42 = arith.constant 1 : index
    %c0_43 = arith.constant 0 : index
    %c0_44 = arith.constant 0 : index
    %53 = vector.load %arg5[%c0_41, %c1_42, %c0_43, %c0_44] : memref<2x4x32x8xf32, #tpu.memory_space<vmem>>, vector<1x1x32x8xf32>
    %54 = vector.shape_cast %53 : vector<1x1x32x8xf32> to vector<32x8xf32>
    %cst_45 = arith.constant dense<0.000000e+00> : vector<16x8xf32>
    %55 = tpu.matmul %1, %54, %cst_45 {dimension_numbers = #tpu.dot_dimension_numbers<[1], [0], [0], [1], [0, 0, 1, 1], [], []>} : vector<16x32xf32>, vector<32x8xf32>, vector<16x8xf32> -> vector<16x8xf32>
    %56 = vector.shape_cast %55 : vector<16x8xf32> to vector<2x8x8xf32>
    "tpu.trace_start"() <{level = 10 : i32, message = "bqd,bkd->bqk"}> : () -> ()
    %cst_46 = arith.constant dense<0.000000e+00> : vector<2x8x8xf32>
    %57 = tpu.matmul %48, %52, %cst_46 {dimension_numbers = #tpu.dot_dimension_numbers<[2], [2], [1], [1], [0, 0, 0, 1, 1, 1], [0], [0]>} : vector<2x8x8xf32>, vector<2x8x8xf32>, vector<2x8x8xf32> -> vector<2x8x8xf32>
    "tpu.trace_stop"() : () -> ()
    %58 = arith.addf %57, %4 : vector<2x8x8xf32>
    %cst_47 = arith.constant dense<0xFF800000> : vector<2x8xf32>
    %59 = vector.multi_reduction <maximumf>, %58, %cst_47 [2] : vector<2x8x8xf32> to vector<2x8xf32>
    %60 = vector.shape_cast %59 : vector<2x8xf32> to vector<2x8x1xf32>
    %61 = vector.broadcast %60 : vector<2x8x1xf32> to vector<2x8x8xf32>
    %62 = arith.subf %58, %61 : vector<2x8x8xf32>
    %63 = math.exp %62 : vector<2x8x8xf32>
    %cst_48 = arith.constant dense<0.000000e+00> : vector<2x8xf32>
    %64 = vector.multi_reduction <add>, %63, %cst_48 [2] : vector<2x8x8xf32> to vector<2x8xf32>
    %65 = vector.shape_cast %64 : vector<2x8xf32> to vector<2x8x1xf32>
    %66 = tpu.reciprocal %65 : vector<2x8x1xf32> -> vector<2x8x1xf32>
    %67 = vector.broadcast %66 : vector<2x8x1xf32> to vector<2x8x8xf32>
    %68 = arith.mulf %63, %67 : vector<2x8x8xf32>
    "tpu.trace_start"() <{level = 10 : i32, message = "bqk,bkd->bqd"}> : () -> ()
    %cst_49 = arith.constant dense<0.000000e+00> : vector<2x8x8xf32>
    %69 = tpu.matmul %68, %56, %cst_49 {dimension_numbers = #tpu.dot_dimension_numbers<[2], [1], [1], [2], [0, 0, 0, 1, 1, 2], [0], [0]>} : vector<2x8x8xf32>, vector<2x8x8xf32>, vector<2x8x8xf32> -> vector<2x8x8xf32>
    "tpu.trace_stop"() : () -> ()
    %70 = vector.shape_cast %69 : vector<2x8x8xf32> to vector<16x8xf32>
    %c0_50 = arith.constant 0 : index
    %c1_51 = arith.constant 1 : index
    %c0_52 = arith.constant 0 : index
    %c0_53 = arith.constant 0 : index
    %71 = vector.load %arg6[%c0_50, %c1_51, %c0_52, %c0_53] : memref<2x4x8x32xf32, #tpu.memory_space<vmem>>, vector<1x1x8x32xf32>
    %72 = vector.shape_cast %71 : vector<1x1x8x32xf32> to vector<8x32xf32>
    %cst_54 = arith.constant dense<0.000000e+00> : vector<16x32xf32>
    %73 = tpu.matmul %70, %72, %cst_54 {dimension_numbers = #tpu.dot_dimension_numbers<[1], [0], [0], [1], [0, 0, 1, 1], [], []>} : vector<16x8xf32>, vector<8x32xf32>, vector<16x32xf32> -> vector<16x32xf32>
    %74 = arith.addf %44, %73 : vector<16x32xf32>
    %c0_55 = arith.constant 0 : index
    %c2 = arith.constant 2 : index
    %c0_56 = arith.constant 0 : index
    %c0_57 = arith.constant 0 : index
    %75 = vector.load %arg3[%c0_55, %c2, %c0_56, %c0_57] : memref<2x4x32x8xf32, #tpu.memory_space<vmem>>, vector<1x1x32x8xf32>
    %76 = vector.shape_cast %75 : vector<1x1x32x8xf32> to vector<32x8xf32>
    %cst_58 = arith.constant dense<0.000000e+00> : vector<16x8xf32>
    %77 = tpu.matmul %1, %76, %cst_58 {dimension_numbers = #tpu.dot_dimension_numbers<[1], [0], [0], [1], [0, 0, 1, 1], [], []>} : vector<16x32xf32>, vector<32x8xf32>, vector<16x8xf32> -> vector<16x8xf32>
    %78 = vector.shape_cast %77 : vector<16x8xf32> to vector<2x8x8xf32>
    %c0_59 = arith.constant 0 : index
    %c2_60 = arith.constant 2 : index
    %c0_61 = arith.constant 0 : index
    %c0_62 = arith.constant 0 : index
    %79 = vector.load %arg4[%c0_59, %c2_60, %c0_61, %c0_62] : memref<2x4x32x8xf32, #tpu.memory_space<vmem>>, vector<1x1x32x8xf32>
    %80 = vector.shape_cast %79 : vector<1x1x32x8xf32> to vector<32x8xf32>
    %cst_63 = arith.constant dense<0.000000e+00> : vector<16x8xf32>
    %81 = tpu.matmul %1, %80, %cst_63 {dimension_numbers = #tpu.dot_dimension_numbers<[1], [0], [0], [1], [0, 0, 1, 1], [], []>} : vector<16x32xf32>, vector<32x8xf32>, vector<16x8xf32> -> vector<16x8xf32>
    %82 = vector.shape_cast %81 : vector<16x8xf32> to vector<2x8x8xf32>
    %c0_64 = arith.constant 0 : index
    %c2_65 = arith.constant 2 : index
    %c0_66 = arith.constant 0 : index
    %c0_67 = arith.constant 0 : index
    %83 = vector.load %arg5[%c0_64, %c2_65, %c0_66, %c0_67] : memref<2x4x32x8xf32, #tpu.memory_space<vmem>>, vector<1x1x32x8xf32>
    %84 = vector.shape_cast %83 : vector<1x1x32x8xf32> to vector<32x8xf32>
    %cst_68 = arith.constant dense<0.000000e+00> : vector<16x8xf32>
    %85 = tpu.matmul %1, %84, %cst_68 {dimension_numbers = #tpu.dot_dimension_numbers<[1], [0], [0], [1], [0, 0, 1, 1], [], []>} : vector<16x32xf32>, vector<32x8xf32>, vector<16x8xf32> -> vector<16x8xf32>
    %86 = vector.shape_cast %85 : vector<16x8xf32> to vector<2x8x8xf32>
    "tpu.trace_start"() <{level = 10 : i32, message = "bqd,bkd->bqk"}> : () -> ()
    %cst_69 = arith.constant dense<0.000000e+00> : vector<2x8x8xf32>
    %87 = tpu.matmul %78, %82, %cst_69 {dimension_numbers = #tpu.dot_dimension_numbers<[2], [2], [1], [1], [0, 0, 0, 1, 1, 1], [0], [0]>} : vector<2x8x8xf32>, vector<2x8x8xf32>, vector<2x8x8xf32> -> vector<2x8x8xf32>
    "tpu.trace_stop"() : () -> ()
    %88 = arith.addf %87, %4 : vector<2x8x8xf32>
    %cst_70 = arith.constant dense<0xFF800000> : vector<2x8xf32>
    %89 = vector.multi_reduction <maximumf>, %88, %cst_70 [2] : vector<2x8x8xf32> to vector<2x8xf32>
    %90 = vector.shape_cast %89 : vector<2x8xf32> to vector<2x8x1xf32>
    %91 = vector.broadcast %90 : vector<2x8x1xf32> to vector<2x8x8xf32>
    %92 = arith.subf %88, %91 : vector<2x8x8xf32>
    %93 = math.exp %92 : vector<2x8x8xf32>
    %cst_71 = arith.constant dense<0.000000e+00> : vector<2x8xf32>
    %94 = vector.multi_reduction <add>, %93, %cst_71 [2] : vector<2x8x8xf32> to vector<2x8xf32>
    %95 = vector.shape_cast %94 : vector<2x8xf32> to vector<2x8x1xf32>
    %96 = tpu.reciprocal %95 : vector<2x8x1xf32> -> vector<2x8x1xf32>
    %97 = vector.broadcast %96 : vector<2x8x1xf32> to vector<2x8x8xf32>
    %98 = arith.mulf %93, %97 : vector<2x8x8xf32>
    "tpu.trace_start"() <{level = 10 : i32, message = "bqk,bkd->bqd"}> : () -> ()
    %cst_72 = arith.constant dense<0.000000e+00> : vector<2x8x8xf32>
    %99 = tpu.matmul %98, %86, %cst_72 {dimension_numbers = #tpu.dot_dimension_numbers<[2], [1], [1], [2], [0, 0, 0, 1, 1, 2], [0], [0]>} : vector<2x8x8xf32>, vector<2x8x8xf32>, vector<2x8x8xf32> -> vector<2x8x8xf32>
    "tpu.trace_stop"() : () -> ()
    %100 = vector.shape_cast %99 : vector<2x8x8xf32> to vector<16x8xf32>
    %c0_73 = arith.constant 0 : index
    %c2_74 = arith.constant 2 : index
    %c0_75 = arith.constant 0 : index
    %c0_76 = arith.constant 0 : index
    %101 = vector.load %arg6[%c0_73, %c2_74, %c0_75, %c0_76] : memref<2x4x8x32xf32, #tpu.memory_space<vmem>>, vector<1x1x8x32xf32>
    %102 = vector.shape_cast %101 : vector<1x1x8x32xf32> to vector<8x32xf32>
    %cst_77 = arith.constant dense<0.000000e+00> : vector<16x32xf32>
    %103 = tpu.matmul %100, %102, %cst_77 {dimension_numbers = #tpu.dot_dimension_numbers<[1], [0], [0], [1], [0, 0, 1, 1], [], []>} : vector<16x8xf32>, vector<8x32xf32>, vector<16x32xf32> -> vector<16x32xf32>
    %104 = arith.addf %74, %103 : vector<16x32xf32>
    %c0_78 = arith.constant 0 : index
    %c3 = arith.constant 3 : index
    %c0_79 = arith.constant 0 : index
    %c0_80 = arith.constant 0 : index
    %105 = vector.load %arg3[%c0_78, %c3, %c0_79, %c0_80] : memref<2x4x32x8xf32, #tpu.memory_space<vmem>>, vector<1x1x32x8xf32>
    %106 = vector.shape_cast %105 : vector<1x1x32x8xf32> to vector<32x8xf32>
    %cst_81 = arith.constant dense<0.000000e+00> : vector<16x8xf32>
    %107 = tpu.matmul %1, %106, %cst_81 {dimension_numbers = #tpu.dot_dimension_numbers<[1], [0], [0], [1], [0, 0, 1, 1], [], []>} : vector<16x32xf32>, vector<32x8xf32>, vector<16x8xf32> -> vector<16x8xf32>
    %108 = vector.shape_cast %107 : vector<16x8xf32> to vector<2x8x8xf32>
    %c0_82 = arith.constant 0 : index
    %c3_83 = arith.constant 3 : index
    %c0_84 = arith.constant 0 : index
    %c0_85 = arith.constant 0 : index
    %109 = vector.load %arg4[%c0_82, %c3_83, %c0_84, %c0_85] : memref<2x4x32x8xf32, #tpu.memory_space<vmem>>, vector<1x1x32x8xf32>
    %110 = vector.shape_cast %109 : vector<1x1x32x8xf32> to vector<32x8xf32>
    %cst_86 = arith.constant dense<0.000000e+00> : vector<16x8xf32>
    %111 = tpu.matmul %1, %110, %cst_86 {dimension_numbers = #tpu.dot_dimension_numbers<[1], [0], [0], [1], [0, 0, 1, 1], [], []>} : vector<16x32xf32>, vector<32x8xf32>, vector<16x8xf32> -> vector<16x8xf32>
    %112 = vector.shape_cast %111 : vector<16x8xf32> to vector<2x8x8xf32>
    %c0_87 = arith.constant 0 : index
    %c3_88 = arith.constant 3 : index
    %c0_89 = arith.constant 0 : index
    %c0_90 = arith.constant 0 : index
    %113 = vector.load %arg5[%c0_87, %c3_88, %c0_89, %c0_90] : memref<2x4x32x8xf32, #tpu.memory_space<vmem>>, vector<1x1x32x8xf32>
    %114 = vector.shape_cast %113 : vector<1x1x32x8xf32> to vector<32x8xf32>
    %cst_91 = arith.constant dense<0.000000e+00> : vector<16x8xf32>
    %115 = tpu.matmul %1, %114, %cst_91 {dimension_numbers = #tpu.dot_dimension_numbers<[1], [0], [0], [1], [0, 0, 1, 1], [], []>} : vector<16x32xf32>, vector<32x8xf32>, vector<16x8xf32> -> vector<16x8xf32>
    %116 = vector.shape_cast %115 : vector<16x8xf32> to vector<2x8x8xf32>
    "tpu.trace_start"() <{level = 10 : i32, message = "bqd,bkd->bqk"}> : () -> ()
    %cst_92 = arith.constant dense<0.000000e+00> : vector<2x8x8xf32>
    %117 = tpu.matmul %108, %112, %cst_92 {dimension_numbers = #tpu.dot_dimension_numbers<[2], [2], [1], [1], [0, 0, 0, 1, 1, 1], [0], [0]>} : vector<2x8x8xf32>, vector<2x8x8xf32>, vector<2x8x8xf32> -> vector<2x8x8xf32>
    "tpu.trace_stop"() : () -> ()
    %118 = arith.addf %117, %4 : vector<2x8x8xf32>
    %cst_93 = arith.constant dense<0xFF800000> : vector<2x8xf32>
    %119 = vector.multi_reduction <maximumf>, %118, %cst_93 [2] : vector<2x8x8xf32> to vector<2x8xf32>
    %120 = vector.shape_cast %119 : vector<2x8xf32> to vector<2x8x1xf32>
    %121 = vector.broadcast %120 : vector<2x8x1xf32> to vector<2x8x8xf32>
    %122 = arith.subf %118, %121 : vector<2x8x8xf32>
    %123 = math.exp %122 : vector<2x8x8xf32>
    %cst_94 = arith.constant dense<0.000000e+00> : vector<2x8xf32>
    %124 = vector.multi_reduction <add>, %123, %cst_94 [2] : vector<2x8x8xf32> to vector<2x8xf32>
    %125 = vector.shape_cast %124 : vector<2x8xf32> to vector<2x8x1xf32>
    %126 = tpu.reciprocal %125 : vector<2x8x1xf32> -> vector<2x8x1xf32>
    %127 = vector.broadcast %126 : vector<2x8x1xf32> to vector<2x8x8xf32>
    %128 = arith.mulf %123, %127 : vector<2x8x8xf32>
    "tpu.trace_start"() <{level = 10 : i32, message = "bqk,bkd->bqd"}> : () -> ()
    %cst_95 = arith.constant dense<0.000000e+00> : vector<2x8x8xf32>
    %129 = tpu.matmul %128, %116, %cst_95 {dimension_numbers = #tpu.dot_dimension_numbers<[2], [1], [1], [2], [0, 0, 0, 1, 1, 2], [0], [0]>} : vector<2x8x8xf32>, vector<2x8x8xf32>, vector<2x8x8xf32> -> vector<2x8x8xf32>
    "tpu.trace_stop"() : () -> ()
    %130 = vector.shape_cast %129 : vector<2x8x8xf32> to vector<16x8xf32>
    %c0_96 = arith.constant 0 : index
    %c3_97 = arith.constant 3 : index
    %c0_98 = arith.constant 0 : index
    %c0_99 = arith.constant 0 : index
    %131 = vector.load %arg6[%c0_96, %c3_97, %c0_98, %c0_99] : memref<2x4x8x32xf32, #tpu.memory_space<vmem>>, vector<1x1x8x32xf32>
    %132 = vector.shape_cast %131 : vector<1x1x8x32xf32> to vector<8x32xf32>
    %cst_100 = arith.constant dense<0.000000e+00> : vector<16x32xf32>
    %133 = tpu.matmul %130, %132, %cst_100 {dimension_numbers = #tpu.dot_dimension_numbers<[1], [0], [0], [1], [0, 0, 1, 1], [], []>} : vector<16x8xf32>, vector<8x32xf32>, vector<16x32xf32> -> vector<16x32xf32>
    %134 = arith.addf %104, %133 : vector<16x32xf32>
    %135 = vector.broadcast %7 : vector<1x32xf32> to vector<16x32xf32>
    %136 = arith.addf %134, %135 : vector<16x32xf32>
    %137 = arith.addf %136, %1 : vector<16x32xf32>
    %cst_101 = arith.constant dense<0.000000e+00> : vector<16xf32>
    %138 = vector.multi_reduction <add>, %137, %cst_101 [1] : vector<16x32xf32> to vector<16xf32>
    %139 = vector.shape_cast %138 : vector<16xf32> to vector<16x1xf32>
    %cst_102 = arith.constant 3.200000e+01 : f32
    %140 = vector.broadcast %cst_102 : f32 to vector<16x1xf32>
    %141 = arith.divf %139, %140 : vector<16x1xf32>
    %142 = vector.broadcast %141 : vector<16x1xf32> to vector<16x32xf32>
    %143 = arith.subf %137, %142 : vector<16x32xf32>
    %144 = arith.mulf %143, %143 : vector<16x32xf32>
    %cst_103 = arith.constant dense<0.000000e+00> : vector<16xf32>
    %145 = vector.multi_reduction <add>, %144, %cst_103 [1] : vector<16x32xf32> to vector<16xf32>
    %146 = vector.shape_cast %145 : vector<16xf32> to vector<16x1xf32>
    %cst_104 = arith.constant 3.200000e+01 : f32
    %147 = vector.broadcast %cst_104 : f32 to vector<16x1xf32>
    %148 = arith.divf %146, %147 : vector<16x1xf32>
    %149 = vector.broadcast %141 : vector<16x1xf32> to vector<16x32xf32>
    %150 = arith.subf %137, %149 : vector<16x32xf32>
    %cst_105 = arith.constant 9.99999974E-6 : f32
    %151 = vector.broadcast %cst_105 : f32 to vector<16x1xf32>
    %152 = arith.addf %148, %151 : vector<16x1xf32>
    %153 = math.rsqrt %152 : vector<16x1xf32>
    %154 = vector.broadcast %153 : vector<16x1xf32> to vector<16x32xf32>
    %155 = arith.mulf %150, %154 : vector<16x32xf32>
    %156 = vector.broadcast %8 : vector<1x32xf32> to vector<16x32xf32>
    %157 = arith.mulf %155, %156 : vector<16x32xf32>
    %158 = vector.broadcast %9 : vector<1x32xf32> to vector<16x32xf32>
    %159 = arith.addf %157, %158 : vector<16x32xf32>
    %c0_106 = arith.constant 0 : index
    %c0_107 = arith.constant 0 : index
    %c0_108 = arith.constant 0 : index
    %160 = vector.load %arg7[%c0_106, %c0_107, %c0_108] : memref<2x32x128xf32, #tpu.memory_space<vmem>>, vector<1x32x128xf32>
    %161 = vector.shape_cast %160 : vector<1x32x128xf32> to vector<32x128xf32>
    %cst_109 = arith.constant dense<0.000000e+00> : vector<16x128xf32>
    %162 = tpu.matmul %159, %161, %cst_109 {dimension_numbers = #tpu.dot_dimension_numbers<[1], [0], [0], [1], [0, 0, 1, 1], [], []>} : vector<16x32xf32>, vector<32x128xf32>, vector<16x128xf32> -> vector<16x128xf32>
    %163 = vector.broadcast %10 : vector<1x128xf32> to vector<16x128xf32>
    %164 = arith.addf %162, %163 : vector<16x128xf32>
    %cst_110 = arith.constant 0.000000e+00 : f32
    %165 = vector.broadcast %cst_110 : f32 to vector<16x128xf32>
    %166 = arith.maximumf %164, %165 : vector<16x128xf32>
    %c0_111 = arith.constant 0 : index
    %c0_112 = arith.constant 0 : index
    %c0_113 = arith.constant 0 : index
    %167 = vector.load %arg8[%c0_111, %c0_112, %c0_113] : memref<2x128x32xf32, #tpu.memory_space<vmem>>, vector<1x128x32xf32>
    %168 = vector.shape_cast %167 : vector<1x128x32xf32> to vector<128x32xf32>
    %cst_114 = arith.constant dense<0.000000e+00> : vector<16x32xf32>
    %169 = tpu.matmul %166, %168, %cst_114 {dimension_numbers = #tpu.dot_dimension_numbers<[1], [0], [0], [1], [0, 0, 1, 1], [], []>} : vector<16x128xf32>, vector<128x32xf32>, vector<16x32xf32> -> vector<16x32xf32>
    %170 = vector.broadcast %11 : vector<1x32xf32> to vector<16x32xf32>
    %171 = arith.addf %169, %170 : vector<16x32xf32>
    %172 = arith.addf %171, %159 : vector<16x32xf32>
    %cst_115 = arith.constant dense<0.000000e+00> : vector<16xf32>
    %173 = vector.multi_reduction <add>, %172, %cst_115 [1] : vector<16x32xf32> to vector<16xf32>
    %174 = vector.shape_cast %173 : vector<16xf32> to vector<16x1xf32>
    %cst_116 = arith.constant 3.200000e+01 : f32
    %175 = vector.broadcast %cst_116 : f32 to vector<16x1xf32>
    %176 = arith.divf %174, %175 : vector<16x1xf32>
    %177 = vector.broadcast %176 : vector<16x1xf32> to vector<16x32xf32>
    %178 = arith.subf %172, %177 : vector<16x32xf32>
    %179 = arith.mulf %178, %178 : vector<16x32xf32>
    %cst_117 = arith.constant dense<0.000000e+00> : vector<16xf32>
    %180 = vector.multi_reduction <add>, %179, %cst_117 [1] : vector<16x32xf32> to vector<16xf32>
    %181 = vector.shape_cast %180 : vector<16xf32> to vector<16x1xf32>
    %cst_118 = arith.constant 3.200000e+01 : f32
    %182 = vector.broadcast %cst_118 : f32 to vector<16x1xf32>
    %183 = arith.divf %181, %182 : vector<16x1xf32>
    %184 = vector.broadcast %176 : vector<16x1xf32> to vector<16x32xf32>
    %185 = arith.subf %172, %184 : vector<16x32xf32>
    %cst_119 = arith.constant 9.99999974E-6 : f32
    %186 = vector.broadcast %cst_119 : f32 to vector<16x1xf32>
    %187 = arith.addf %183, %186 : vector<16x1xf32>
    %188 = math.rsqrt %187 : vector<16x1xf32>
    %189 = vector.broadcast %188 : vector<16x1xf32> to vector<16x32xf32>
    %190 = arith.mulf %185, %189 : vector<16x32xf32>
    %191 = vector.broadcast %12 : vector<1x32xf32> to vector<16x32xf32>
    %192 = arith.mulf %190, %191 : vector<16x32xf32>
    %193 = vector.broadcast %13 : vector<1x32xf32> to vector<16x32xf32>
    %194 = arith.addf %192, %193 : vector<16x32xf32>
    %c1_120 = arith.constant 1 : index
    %c0_121 = arith.constant 0 : index
    %c0_122 = arith.constant 0 : index
    %195 = vector.load %arg9[%c1_120, %c0_121, %c0_122] : memref<2x8x128xf32, #tpu.memory_space<vmem>>, vector<1x8x128xf32>
    %196 = vector.shape_cast %195 : vector<1x8x128xf32> to vector<8x128xf32>
    %197 = vector.extract_strided_slice %196 {offsets = [0, 0], sizes = [1, 32], strides = [1, 1]} : vector<8x128xf32> to vector<1x32xf32>
    %198 = vector.extract_strided_slice %196 {offsets = [1, 0], sizes = [1, 32], strides = [1, 1]} : vector<8x128xf32> to vector<1x32xf32>
    %199 = vector.extract_strided_slice %196 {offsets = [2, 0], sizes = [1, 32], strides = [1, 1]} : vector<8x128xf32> to vector<1x32xf32>
    %200 = vector.extract_strided_slice %196 {offsets = [3, 0], sizes = [1, 128], strides = [1, 1]} : vector<8x128xf32> to vector<1x128xf32>
    %201 = vector.extract_strided_slice %196 {offsets = [4, 0], sizes = [1, 32], strides = [1, 1]} : vector<8x128xf32> to vector<1x32xf32>
    %202 = vector.extract_strided_slice %196 {offsets = [5, 0], sizes = [1, 32], strides = [1, 1]} : vector<8x128xf32> to vector<1x32xf32>
    %203 = vector.extract_strided_slice %196 {offsets = [6, 0], sizes = [1, 32], strides = [1, 1]} : vector<8x128xf32> to vector<1x32xf32>
    %cst_123 = arith.constant 0.000000e+00 : f32
    %204 = vector.broadcast %cst_123 : f32 to vector<16x32xf32>
    %c1_124 = arith.constant 1 : index
    %c0_125 = arith.constant 0 : index
    %c0_126 = arith.constant 0 : index
    %c0_127 = arith.constant 0 : index
    %205 = vector.load %arg3[%c1_124, %c0_125, %c0_126, %c0_127] : memref<2x4x32x8xf32, #tpu.memory_space<vmem>>, vector<1x1x32x8xf32>
    %206 = vector.shape_cast %205 : vector<1x1x32x8xf32> to vector<32x8xf32>
    %cst_128 = arith.constant dense<0.000000e+00> : vector<16x8xf32>
    %207 = tpu.matmul %194, %206, %cst_128 {dimension_numbers = #tpu.dot_dimension_numbers<[1], [0], [0], [1], [0, 0, 1, 1], [], []>} : vector<16x32xf32>, vector<32x8xf32>, vector<16x8xf32> -> vector<16x8xf32>
    %208 = vector.shape_cast %207 : vector<16x8xf32> to vector<2x8x8xf32>
    %c1_129 = arith.constant 1 : index
    %c0_130 = arith.constant 0 : index
    %c0_131 = arith.constant 0 : index
    %c0_132 = arith.constant 0 : index
    %209 = vector.load %arg4[%c1_129, %c0_130, %c0_131, %c0_132] : memref<2x4x32x8xf32, #tpu.memory_space<vmem>>, vector<1x1x32x8xf32>
    %210 = vector.shape_cast %209 : vector<1x1x32x8xf32> to vector<32x8xf32>
    %cst_133 = arith.constant dense<0.000000e+00> : vector<16x8xf32>
    %211 = tpu.matmul %194, %210, %cst_133 {dimension_numbers = #tpu.dot_dimension_numbers<[1], [0], [0], [1], [0, 0, 1, 1], [], []>} : vector<16x32xf32>, vector<32x8xf32>, vector<16x8xf32> -> vector<16x8xf32>
    %212 = vector.shape_cast %211 : vector<16x8xf32> to vector<2x8x8xf32>
    %c1_134 = arith.constant 1 : index
    %c0_135 = arith.constant 0 : index
    %c0_136 = arith.constant 0 : index
    %c0_137 = arith.constant 0 : index
    %213 = vector.load %arg5[%c1_134, %c0_135, %c0_136, %c0_137] : memref<2x4x32x8xf32, #tpu.memory_space<vmem>>, vector<1x1x32x8xf32>
    %214 = vector.shape_cast %213 : vector<1x1x32x8xf32> to vector<32x8xf32>
    %cst_138 = arith.constant dense<0.000000e+00> : vector<16x8xf32>
    %215 = tpu.matmul %194, %214, %cst_138 {dimension_numbers = #tpu.dot_dimension_numbers<[1], [0], [0], [1], [0, 0, 1, 1], [], []>} : vector<16x32xf32>, vector<32x8xf32>, vector<16x8xf32> -> vector<16x8xf32>
    %216 = vector.shape_cast %215 : vector<16x8xf32> to vector<2x8x8xf32>
    "tpu.trace_start"() <{level = 10 : i32, message = "bqd,bkd->bqk"}> : () -> ()
    %cst_139 = arith.constant dense<0.000000e+00> : vector<2x8x8xf32>
    %217 = tpu.matmul %208, %212, %cst_139 {dimension_numbers = #tpu.dot_dimension_numbers<[2], [2], [1], [1], [0, 0, 0, 1, 1, 1], [0], [0]>} : vector<2x8x8xf32>, vector<2x8x8xf32>, vector<2x8x8xf32> -> vector<2x8x8xf32>
    "tpu.trace_stop"() : () -> ()
    %218 = arith.addf %217, %4 : vector<2x8x8xf32>
    %cst_140 = arith.constant dense<0xFF800000> : vector<2x8xf32>
    %219 = vector.multi_reduction <maximumf>, %218, %cst_140 [2] : vector<2x8x8xf32> to vector<2x8xf32>
    %220 = vector.shape_cast %219 : vector<2x8xf32> to vector<2x8x1xf32>
    %221 = vector.broadcast %220 : vector<2x8x1xf32> to vector<2x8x8xf32>
    %222 = arith.subf %218, %221 : vector<2x8x8xf32>
    %223 = math.exp %222 : vector<2x8x8xf32>
    %cst_141 = arith.constant dense<0.000000e+00> : vector<2x8xf32>
    %224 = vector.multi_reduction <add>, %223, %cst_141 [2] : vector<2x8x8xf32> to vector<2x8xf32>
    %225 = vector.shape_cast %224 : vector<2x8xf32> to vector<2x8x1xf32>
    %226 = tpu.reciprocal %225 : vector<2x8x1xf32> -> vector<2x8x1xf32>
    %227 = vector.broadcast %226 : vector<2x8x1xf32> to vector<2x8x8xf32>
    %228 = arith.mulf %223, %227 : vector<2x8x8xf32>
    "tpu.trace_start"() <{level = 10 : i32, message = "bqk,bkd->bqd"}> : () -> ()
    %cst_142 = arith.constant dense<0.000000e+00> : vector<2x8x8xf32>
    %229 = tpu.matmul %228, %216, %cst_142 {dimension_numbers = #tpu.dot_dimension_numbers<[2], [1], [1], [2], [0, 0, 0, 1, 1, 2], [0], [0]>} : vector<2x8x8xf32>, vector<2x8x8xf32>, vector<2x8x8xf32> -> vector<2x8x8xf32>
    "tpu.trace_stop"() : () -> ()
    %230 = vector.shape_cast %229 : vector<2x8x8xf32> to vector<16x8xf32>
    %c1_143 = arith.constant 1 : index
    %c0_144 = arith.constant 0 : index
    %c0_145 = arith.constant 0 : index
    %c0_146 = arith.constant 0 : index
    %231 = vector.load %arg6[%c1_143, %c0_144, %c0_145, %c0_146] : memref<2x4x8x32xf32, #tpu.memory_space<vmem>>, vector<1x1x8x32xf32>
    %232 = vector.shape_cast %231 : vector<1x1x8x32xf32> to vector<8x32xf32>
    %cst_147 = arith.constant dense<0.000000e+00> : vector<16x32xf32>
    %233 = tpu.matmul %230, %232, %cst_147 {dimension_numbers = #tpu.dot_dimension_numbers<[1], [0], [0], [1], [0, 0, 1, 1], [], []>} : vector<16x8xf32>, vector<8x32xf32>, vector<16x32xf32> -> vector<16x32xf32>
    %234 = arith.addf %204, %233 : vector<16x32xf32>
    %c1_148 = arith.constant 1 : index
    %c1_149 = arith.constant 1 : index
    %c0_150 = arith.constant 0 : index
    %c0_151 = arith.constant 0 : index
    %235 = vector.load %arg3[%c1_148, %c1_149, %c0_150, %c0_151] : memref<2x4x32x8xf32, #tpu.memory_space<vmem>>, vector<1x1x32x8xf32>
    %236 = vector.shape_cast %235 : vector<1x1x32x8xf32> to vector<32x8xf32>
    %cst_152 = arith.constant dense<0.000000e+00> : vector<16x8xf32>
    %237 = tpu.matmul %194, %236, %cst_152 {dimension_numbers = #tpu.dot_dimension_numbers<[1], [0], [0], [1], [0, 0, 1, 1], [], []>} : vector<16x32xf32>, vector<32x8xf32>, vector<16x8xf32> -> vector<16x8xf32>
    %238 = vector.shape_cast %237 : vector<16x8xf32> to vector<2x8x8xf32>
    %c1_153 = arith.constant 1 : index
    %c1_154 = arith.constant 1 : index
    %c0_155 = arith.constant 0 : index
    %c0_156 = arith.constant 0 : index
    %239 = vector.load %arg4[%c1_153, %c1_154, %c0_155, %c0_156] : memref<2x4x32x8xf32, #tpu.memory_space<vmem>>, vector<1x1x32x8xf32>
    %240 = vector.shape_cast %239 : vector<1x1x32x8xf32> to vector<32x8xf32>
    %cst_157 = arith.constant dense<0.000000e+00> : vector<16x8xf32>
    %241 = tpu.matmul %194, %240, %cst_157 {dimension_numbers = #tpu.dot_dimension_numbers<[1], [0], [0], [1], [0, 0, 1, 1], [], []>} : vector<16x32xf32>, vector<32x8xf32>, vector<16x8xf32> -> vector<16x8xf32>
    %242 = vector.shape_cast %241 : vector<16x8xf32> to vector<2x8x8xf32>
    %c1_158 = arith.constant 1 : index
    %c1_159 = arith.constant 1 : index
    %c0_160 = arith.constant 0 : index
    %c0_161 = arith.constant 0 : index
    %243 = vector.load %arg5[%c1_158, %c1_159, %c0_160, %c0_161] : memref<2x4x32x8xf32, #tpu.memory_space<vmem>>, vector<1x1x32x8xf32>
    %244 = vector.shape_cast %243 : vector<1x1x32x8xf32> to vector<32x8xf32>
    %cst_162 = arith.constant dense<0.000000e+00> : vector<16x8xf32>
    %245 = tpu.matmul %194, %244, %cst_162 {dimension_numbers = #tpu.dot_dimension_numbers<[1], [0], [0], [1], [0, 0, 1, 1], [], []>} : vector<16x32xf32>, vector<32x8xf32>, vector<16x8xf32> -> vector<16x8xf32>
    %246 = vector.shape_cast %245 : vector<16x8xf32> to vector<2x8x8xf32>
    "tpu.trace_start"() <{level = 10 : i32, message = "bqd,bkd->bqk"}> : () -> ()
    %cst_163 = arith.constant dense<0.000000e+00> : vector<2x8x8xf32>
    %247 = tpu.matmul %238, %242, %cst_163 {dimension_numbers = #tpu.dot_dimension_numbers<[2], [2], [1], [1], [0, 0, 0, 1, 1, 1], [0], [0]>} : vector<2x8x8xf32>, vector<2x8x8xf32>, vector<2x8x8xf32> -> vector<2x8x8xf32>
    "tpu.trace_stop"() : () -> ()
    %248 = arith.addf %247, %4 : vector<2x8x8xf32>
    %cst_164 = arith.constant dense<0xFF800000> : vector<2x8xf32>
    %249 = vector.multi_reduction <maximumf>, %248, %cst_164 [2] : vector<2x8x8xf32> to vector<2x8xf32>
    %250 = vector.shape_cast %249 : vector<2x8xf32> to vector<2x8x1xf32>
    %251 = vector.broadcast %250 : vector<2x8x1xf32> to vector<2x8x8xf32>
    %252 = arith.subf %248, %251 : vector<2x8x8xf32>
    %253 = math.exp %252 : vector<2x8x8xf32>
    %cst_165 = arith.constant dense<0.000000e+00> : vector<2x8xf32>
    %254 = vector.multi_reduction <add>, %253, %cst_165 [2] : vector<2x8x8xf32> to vector<2x8xf32>
    %255 = vector.shape_cast %254 : vector<2x8xf32> to vector<2x8x1xf32>
    %256 = tpu.reciprocal %255 : vector<2x8x1xf32> -> vector<2x8x1xf32>
    %257 = vector.broadcast %256 : vector<2x8x1xf32> to vector<2x8x8xf32>
    %258 = arith.mulf %253, %257 : vector<2x8x8xf32>
    "tpu.trace_start"() <{level = 10 : i32, message = "bqk,bkd->bqd"}> : () -> ()
    %cst_166 = arith.constant dense<0.000000e+00> : vector<2x8x8xf32>
    %259 = tpu.matmul %258, %246, %cst_166 {dimension_numbers = #tpu.dot_dimension_numbers<[2], [1], [1], [2], [0, 0, 0, 1, 1, 2], [0], [0]>} : vector<2x8x8xf32>, vector<2x8x8xf32>, vector<2x8x8xf32> -> vector<2x8x8xf32>
    "tpu.trace_stop"() : () -> ()
    %260 = vector.shape_cast %259 : vector<2x8x8xf32> to vector<16x8xf32>
    %c1_167 = arith.constant 1 : index
    %c1_168 = arith.constant 1 : index
    %c0_169 = arith.constant 0 : index
    %c0_170 = arith.constant 0 : index
    %261 = vector.load %arg6[%c1_167, %c1_168, %c0_169, %c0_170] : memref<2x4x8x32xf32, #tpu.memory_space<vmem>>, vector<1x1x8x32xf32>
    %262 = vector.shape_cast %261 : vector<1x1x8x32xf32> to vector<8x32xf32>
    %cst_171 = arith.constant dense<0.000000e+00> : vector<16x32xf32>
    %263 = tpu.matmul %260, %262, %cst_171 {dimension_numbers = #tpu.dot_dimension_numbers<[1], [0], [0], [1], [0, 0, 1, 1], [], []>} : vector<16x8xf32>, vector<8x32xf32>, vector<16x32xf32> -> vector<16x32xf32>
    %264 = arith.addf %234, %263 : vector<16x32xf32>
    %c1_172 = arith.constant 1 : index
    %c2_173 = arith.constant 2 : index
    %c0_174 = arith.constant 0 : index
    %c0_175 = arith.constant 0 : index
    %265 = vector.load %arg3[%c1_172, %c2_173, %c0_174, %c0_175] : memref<2x4x32x8xf32, #tpu.memory_space<vmem>>, vector<1x1x32x8xf32>
    %266 = vector.shape_cast %265 : vector<1x1x32x8xf32> to vector<32x8xf32>
    %cst_176 = arith.constant dense<0.000000e+00> : vector<16x8xf32>
    %267 = tpu.matmul %194, %266, %cst_176 {dimension_numbers = #tpu.dot_dimension_numbers<[1], [0], [0], [1], [0, 0, 1, 1], [], []>} : vector<16x32xf32>, vector<32x8xf32>, vector<16x8xf32> -> vector<16x8xf32>
    %268 = vector.shape_cast %267 : vector<16x8xf32> to vector<2x8x8xf32>
    %c1_177 = arith.constant 1 : index
    %c2_178 = arith.constant 2 : index
    %c0_179 = arith.constant 0 : index
    %c0_180 = arith.constant 0 : index
    %269 = vector.load %arg4[%c1_177, %c2_178, %c0_179, %c0_180] : memref<2x4x32x8xf32, #tpu.memory_space<vmem>>, vector<1x1x32x8xf32>
    %270 = vector.shape_cast %269 : vector<1x1x32x8xf32> to vector<32x8xf32>
    %cst_181 = arith.constant dense<0.000000e+00> : vector<16x8xf32>
    %271 = tpu.matmul %194, %270, %cst_181 {dimension_numbers = #tpu.dot_dimension_numbers<[1], [0], [0], [1], [0, 0, 1, 1], [], []>} : vector<16x32xf32>, vector<32x8xf32>, vector<16x8xf32> -> vector<16x8xf32>
    %272 = vector.shape_cast %271 : vector<16x8xf32> to vector<2x8x8xf32>
    %c1_182 = arith.constant 1 : index
    %c2_183 = arith.constant 2 : index
    %c0_184 = arith.constant 0 : index
    %c0_185 = arith.constant 0 : index
    %273 = vector.load %arg5[%c1_182, %c2_183, %c0_184, %c0_185] : memref<2x4x32x8xf32, #tpu.memory_space<vmem>>, vector<1x1x32x8xf32>
    %274 = vector.shape_cast %273 : vector<1x1x32x8xf32> to vector<32x8xf32>
    %cst_186 = arith.constant dense<0.000000e+00> : vector<16x8xf32>
    %275 = tpu.matmul %194, %274, %cst_186 {dimension_numbers = #tpu.dot_dimension_numbers<[1], [0], [0], [1], [0, 0, 1, 1], [], []>} : vector<16x32xf32>, vector<32x8xf32>, vector<16x8xf32> -> vector<16x8xf32>
    %276 = vector.shape_cast %275 : vector<16x8xf32> to vector<2x8x8xf32>
    "tpu.trace_start"() <{level = 10 : i32, message = "bqd,bkd->bqk"}> : () -> ()
    %cst_187 = arith.constant dense<0.000000e+00> : vector<2x8x8xf32>
    %277 = tpu.matmul %268, %272, %cst_187 {dimension_numbers = #tpu.dot_dimension_numbers<[2], [2], [1], [1], [0, 0, 0, 1, 1, 1], [0], [0]>} : vector<2x8x8xf32>, vector<2x8x8xf32>, vector<2x8x8xf32> -> vector<2x8x8xf32>
    "tpu.trace_stop"() : () -> ()
    %278 = arith.addf %277, %4 : vector<2x8x8xf32>
    %cst_188 = arith.constant dense<0xFF800000> : vector<2x8xf32>
    %279 = vector.multi_reduction <maximumf>, %278, %cst_188 [2] : vector<2x8x8xf32> to vector<2x8xf32>
    %280 = vector.shape_cast %279 : vector<2x8xf32> to vector<2x8x1xf32>
    %281 = vector.broadcast %280 : vector<2x8x1xf32> to vector<2x8x8xf32>
    %282 = arith.subf %278, %281 : vector<2x8x8xf32>
    %283 = math.exp %282 : vector<2x8x8xf32>
    %cst_189 = arith.constant dense<0.000000e+00> : vector<2x8xf32>
    %284 = vector.multi_reduction <add>, %283, %cst_189 [2] : vector<2x8x8xf32> to vector<2x8xf32>
    %285 = vector.shape_cast %284 : vector<2x8xf32> to vector<2x8x1xf32>
    %286 = tpu.reciprocal %285 : vector<2x8x1xf32> -> vector<2x8x1xf32>
    %287 = vector.broadcast %286 : vector<2x8x1xf32> to vector<2x8x8xf32>
    %288 = arith.mulf %283, %287 : vector<2x8x8xf32>
    "tpu.trace_start"() <{level = 10 : i32, message = "bqk,bkd->bqd"}> : () -> ()
    %cst_190 = arith.constant dense<0.000000e+00> : vector<2x8x8xf32>
    %289 = tpu.matmul %288, %276, %cst_190 {dimension_numbers = #tpu.dot_dimension_numbers<[2], [1], [1], [2], [0, 0, 0, 1, 1, 2], [0], [0]>} : vector<2x8x8xf32>, vector<2x8x8xf32>, vector<2x8x8xf32> -> vector<2x8x8xf32>
    "tpu.trace_stop"() : () -> ()
    %290 = vector.shape_cast %289 : vector<2x8x8xf32> to vector<16x8xf32>
    %c1_191 = arith.constant 1 : index
    %c2_192 = arith.constant 2 : index
    %c0_193 = arith.constant 0 : index
    %c0_194 = arith.constant 0 : index
    %291 = vector.load %arg6[%c1_191, %c2_192, %c0_193, %c0_194] : memref<2x4x8x32xf32, #tpu.memory_space<vmem>>, vector<1x1x8x32xf32>
    %292 = vector.shape_cast %291 : vector<1x1x8x32xf32> to vector<8x32xf32>
    %cst_195 = arith.constant dense<0.000000e+00> : vector<16x32xf32>
    %293 = tpu.matmul %290, %292, %cst_195 {dimension_numbers = #tpu.dot_dimension_numbers<[1], [0], [0], [1], [0, 0, 1, 1], [], []>} : vector<16x8xf32>, vector<8x32xf32>, vector<16x32xf32> -> vector<16x32xf32>
    %294 = arith.addf %264, %293 : vector<16x32xf32>
    %c1_196 = arith.constant 1 : index
    %c3_197 = arith.constant 3 : index
    %c0_198 = arith.constant 0 : index
    %c0_199 = arith.constant 0 : index
    %295 = vector.load %arg3[%c1_196, %c3_197, %c0_198, %c0_199] : memref<2x4x32x8xf32, #tpu.memory_space<vmem>>, vector<1x1x32x8xf32>
    %296 = vector.shape_cast %295 : vector<1x1x32x8xf32> to vector<32x8xf32>
    %cst_200 = arith.constant dense<0.000000e+00> : vector<16x8xf32>
    %297 = tpu.matmul %194, %296, %cst_200 {dimension_numbers = #tpu.dot_dimension_numbers<[1], [0], [0], [1], [0, 0, 1, 1], [], []>} : vector<16x32xf32>, vector<32x8xf32>, vector<16x8xf32> -> vector<16x8xf32>
    %298 = vector.shape_cast %297 : vector<16x8xf32> to vector<2x8x8xf32>
    %c1_201 = arith.constant 1 : index
    %c3_202 = arith.constant 3 : index
    %c0_203 = arith.constant 0 : index
    %c0_204 = arith.constant 0 : index
    %299 = vector.load %arg4[%c1_201, %c3_202, %c0_203, %c0_204] : memref<2x4x32x8xf32, #tpu.memory_space<vmem>>, vector<1x1x32x8xf32>
    %300 = vector.shape_cast %299 : vector<1x1x32x8xf32> to vector<32x8xf32>
    %cst_205 = arith.constant dense<0.000000e+00> : vector<16x8xf32>
    %301 = tpu.matmul %194, %300, %cst_205 {dimension_numbers = #tpu.dot_dimension_numbers<[1], [0], [0], [1], [0, 0, 1, 1], [], []>} : vector<16x32xf32>, vector<32x8xf32>, vector<16x8xf32> -> vector<16x8xf32>
    %302 = vector.shape_cast %301 : vector<16x8xf32> to vector<2x8x8xf32>
    %c1_206 = arith.constant 1 : index
    %c3_207 = arith.constant 3 : index
    %c0_208 = arith.constant 0 : index
    %c0_209 = arith.constant 0 : index
    %303 = vector.load %arg5[%c1_206, %c3_207, %c0_208, %c0_209] : memref<2x4x32x8xf32, #tpu.memory_space<vmem>>, vector<1x1x32x8xf32>
    %304 = vector.shape_cast %303 : vector<1x1x32x8xf32> to vector<32x8xf32>
    %cst_210 = arith.constant dense<0.000000e+00> : vector<16x8xf32>
    %305 = tpu.matmul %194, %304, %cst_210 {dimension_numbers = #tpu.dot_dimension_numbers<[1], [0], [0], [1], [0, 0, 1, 1], [], []>} : vector<16x32xf32>, vector<32x8xf32>, vector<16x8xf32> -> vector<16x8xf32>
    %306 = vector.shape_cast %305 : vector<16x8xf32> to vector<2x8x8xf32>
    "tpu.trace_start"() <{level = 10 : i32, message = "bqd,bkd->bqk"}> : () -> ()
    %cst_211 = arith.constant dense<0.000000e+00> : vector<2x8x8xf32>
    %307 = tpu.matmul %298, %302, %cst_211 {dimension_numbers = #tpu.dot_dimension_numbers<[2], [2], [1], [1], [0, 0, 0, 1, 1, 1], [0], [0]>} : vector<2x8x8xf32>, vector<2x8x8xf32>, vector<2x8x8xf32> -> vector<2x8x8xf32>
    "tpu.trace_stop"() : () -> ()
    %308 = arith.addf %307, %4 : vector<2x8x8xf32>
    %cst_212 = arith.constant dense<0xFF800000> : vector<2x8xf32>
    %309 = vector.multi_reduction <maximumf>, %308, %cst_212 [2] : vector<2x8x8xf32> to vector<2x8xf32>
    %310 = vector.shape_cast %309 : vector<2x8xf32> to vector<2x8x1xf32>
    %311 = vector.broadcast %310 : vector<2x8x1xf32> to vector<2x8x8xf32>
    %312 = arith.subf %308, %311 : vector<2x8x8xf32>
    %313 = math.exp %312 : vector<2x8x8xf32>
    %cst_213 = arith.constant dense<0.000000e+00> : vector<2x8xf32>
    %314 = vector.multi_reduction <add>, %313, %cst_213 [2] : vector<2x8x8xf32> to vector<2x8xf32>
    %315 = vector.shape_cast %314 : vector<2x8xf32> to vector<2x8x1xf32>
    %316 = tpu.reciprocal %315 : vector<2x8x1xf32> -> vector<2x8x1xf32>
    %317 = vector.broadcast %316 : vector<2x8x1xf32> to vector<2x8x8xf32>
    %318 = arith.mulf %313, %317 : vector<2x8x8xf32>
    "tpu.trace_start"() <{level = 10 : i32, message = "bqk,bkd->bqd"}> : () -> ()
    %cst_214 = arith.constant dense<0.000000e+00> : vector<2x8x8xf32>
    %319 = tpu.matmul %318, %306, %cst_214 {dimension_numbers = #tpu.dot_dimension_numbers<[2], [1], [1], [2], [0, 0, 0, 1, 1, 2], [0], [0]>} : vector<2x8x8xf32>, vector<2x8x8xf32>, vector<2x8x8xf32> -> vector<2x8x8xf32>
    "tpu.trace_stop"() : () -> ()
    %320 = vector.shape_cast %319 : vector<2x8x8xf32> to vector<16x8xf32>
    %c1_215 = arith.constant 1 : index
    %c3_216 = arith.constant 3 : index
    %c0_217 = arith.constant 0 : index
    %c0_218 = arith.constant 0 : index
    %321 = vector.load %arg6[%c1_215, %c3_216, %c0_217, %c0_218] : memref<2x4x8x32xf32, #tpu.memory_space<vmem>>, vector<1x1x8x32xf32>
    %322 = vector.shape_cast %321 : vector<1x1x8x32xf32> to vector<8x32xf32>
    %cst_219 = arith.constant dense<0.000000e+00> : vector<16x32xf32>
    %323 = tpu.matmul %320, %322, %cst_219 {dimension_numbers = #tpu.dot_dimension_numbers<[1], [0], [0], [1], [0, 0, 1, 1], [], []>} : vector<16x8xf32>, vector<8x32xf32>, vector<16x32xf32> -> vector<16x32xf32>
    %324 = arith.addf %294, %323 : vector<16x32xf32>
    %325 = vector.broadcast %197 : vector<1x32xf32> to vector<16x32xf32>
    %326 = arith.addf %324, %325 : vector<16x32xf32>
    %327 = arith.addf %326, %194 : vector<16x32xf32>
    %cst_220 = arith.constant dense<0.000000e+00> : vector<16xf32>
    %328 = vector.multi_reduction <add>, %327, %cst_220 [1] : vector<16x32xf32> to vector<16xf32>
    %329 = vector.shape_cast %328 : vector<16xf32> to vector<16x1xf32>
    %cst_221 = arith.constant 3.200000e+01 : f32
    %330 = vector.broadcast %cst_221 : f32 to vector<16x1xf32>
    %331 = arith.divf %329, %330 : vector<16x1xf32>
    %332 = vector.broadcast %331 : vector<16x1xf32> to vector<16x32xf32>
    %333 = arith.subf %327, %332 : vector<16x32xf32>
    %334 = arith.mulf %333, %333 : vector<16x32xf32>
    %cst_222 = arith.constant dense<0.000000e+00> : vector<16xf32>
    %335 = vector.multi_reduction <add>, %334, %cst_222 [1] : vector<16x32xf32> to vector<16xf32>
    %336 = vector.shape_cast %335 : vector<16xf32> to vector<16x1xf32>
    %cst_223 = arith.constant 3.200000e+01 : f32
    %337 = vector.broadcast %cst_223 : f32 to vector<16x1xf32>
    %338 = arith.divf %336, %337 : vector<16x1xf32>
    %339 = vector.broadcast %331 : vector<16x1xf32> to vector<16x32xf32>
    %340 = arith.subf %327, %339 : vector<16x32xf32>
    %cst_224 = arith.constant 9.99999974E-6 : f32
    %341 = vector.broadcast %cst_224 : f32 to vector<16x1xf32>
    %342 = arith.addf %338, %341 : vector<16x1xf32>
    %343 = math.rsqrt %342 : vector<16x1xf32>
    %344 = vector.broadcast %343 : vector<16x1xf32> to vector<16x32xf32>
    %345 = arith.mulf %340, %344 : vector<16x32xf32>
    %346 = vector.broadcast %198 : vector<1x32xf32> to vector<16x32xf32>
    %347 = arith.mulf %345, %346 : vector<16x32xf32>
    %348 = vector.broadcast %199 : vector<1x32xf32> to vector<16x32xf32>
    %349 = arith.addf %347, %348 : vector<16x32xf32>
    %c1_225 = arith.constant 1 : index
    %c0_226 = arith.constant 0 : index
    %c0_227 = arith.constant 0 : index
    %350 = vector.load %arg7[%c1_225, %c0_226, %c0_227] : memref<2x32x128xf32, #tpu.memory_space<vmem>>, vector<1x32x128xf32>
    %351 = vector.shape_cast %350 : vector<1x32x128xf32> to vector<32x128xf32>
    %cst_228 = arith.constant dense<0.000000e+00> : vector<16x128xf32>
    %352 = tpu.matmul %349, %351, %cst_228 {dimension_numbers = #tpu.dot_dimension_numbers<[1], [0], [0], [1], [0, 0, 1, 1], [], []>} : vector<16x32xf32>, vector<32x128xf32>, vector<16x128xf32> -> vector<16x128xf32>
    %353 = vector.broadcast %200 : vector<1x128xf32> to vector<16x128xf32>
    %354 = arith.addf %352, %353 : vector<16x128xf32>
    %cst_229 = arith.constant 0.000000e+00 : f32
    %355 = vector.broadcast %cst_229 : f32 to vector<16x128xf32>
    %356 = arith.maximumf %354, %355 : vector<16x128xf32>
    %c1_230 = arith.constant 1 : index
    %c0_231 = arith.constant 0 : index
    %c0_232 = arith.constant 0 : index
    %357 = vector.load %arg8[%c1_230, %c0_231, %c0_232] : memref<2x128x32xf32, #tpu.memory_space<vmem>>, vector<1x128x32xf32>
    %358 = vector.shape_cast %357 : vector<1x128x32xf32> to vector<128x32xf32>
    %cst_233 = arith.constant dense<0.000000e+00> : vector<16x32xf32>
    %359 = tpu.matmul %356, %358, %cst_233 {dimension_numbers = #tpu.dot_dimension_numbers<[1], [0], [0], [1], [0, 0, 1, 1], [], []>} : vector<16x128xf32>, vector<128x32xf32>, vector<16x32xf32> -> vector<16x32xf32>
    %360 = vector.broadcast %201 : vector<1x32xf32> to vector<16x32xf32>
    %361 = arith.addf %359, %360 : vector<16x32xf32>
    %362 = arith.addf %361, %349 : vector<16x32xf32>
    %cst_234 = arith.constant dense<0.000000e+00> : vector<16xf32>
    %363 = vector.multi_reduction <add>, %362, %cst_234 [1] : vector<16x32xf32> to vector<16xf32>
    %364 = vector.shape_cast %363 : vector<16xf32> to vector<16x1xf32>
    %cst_235 = arith.constant 3.200000e+01 : f32
    %365 = vector.broadcast %cst_235 : f32 to vector<16x1xf32>
    %366 = arith.divf %364, %365 : vector<16x1xf32>
    %367 = vector.broadcast %366 : vector<16x1xf32> to vector<16x32xf32>
    %368 = arith.subf %362, %367 : vector<16x32xf32>
    %369 = arith.mulf %368, %368 : vector<16x32xf32>
    %cst_236 = arith.constant dense<0.000000e+00> : vector<16xf32>
    %370 = vector.multi_reduction <add>, %369, %cst_236 [1] : vector<16x32xf32> to vector<16xf32>
    %371 = vector.shape_cast %370 : vector<16xf32> to vector<16x1xf32>
    %cst_237 = arith.constant 3.200000e+01 : f32
    %372 = vector.broadcast %cst_237 : f32 to vector<16x1xf32>
    %373 = arith.divf %371, %372 : vector<16x1xf32>
    %374 = vector.broadcast %366 : vector<16x1xf32> to vector<16x32xf32>
    %375 = arith.subf %362, %374 : vector<16x32xf32>
    %cst_238 = arith.constant 9.99999974E-6 : f32
    %376 = vector.broadcast %cst_238 : f32 to vector<16x1xf32>
    %377 = arith.addf %373, %376 : vector<16x1xf32>
    %378 = math.rsqrt %377 : vector<16x1xf32>
    %379 = vector.broadcast %378 : vector<16x1xf32> to vector<16x32xf32>
    %380 = arith.mulf %375, %379 : vector<16x32xf32>
    %381 = vector.broadcast %202 : vector<1x32xf32> to vector<16x32xf32>
    %382 = arith.mulf %380, %381 : vector<16x32xf32>
    %383 = vector.broadcast %203 : vector<1x32xf32> to vector<16x32xf32>
    %384 = arith.addf %382, %383 : vector<16x32xf32>
    %385 = vector.shape_cast %384 : vector<16x32xf32> to vector<2x8x32xf32>
    %c0_239 = arith.constant 0 : index
    %c0_240 = arith.constant 0 : index
    %c0_241 = arith.constant 0 : index
    %386 = vector.load %arg10[%c0_239, %c0_240, %c0_241] : memref<2x8x32xf32, #tpu.memory_space<vmem>>, vector<2x8x32xf32>
    tpu.vector_store %arg10[%c0_239, %c0_240, %c0_241], %385 {strides = array<i32>} : memref<2x8x32xf32, #tpu.memory_space<vmem>>, vector<2x8x32xf32>,
    return
  }
  func.func @transform_0(%arg0: i32) -> (i32, i32, i32) {
    %c0_i32 = arith.constant 0 : i32
    %c0_i32_0 = arith.constant 0 : i32
    %c0_i32_1 = arith.constant 0 : i32
    return %arg0, %c0_i32, %c0_i32_0 : i32, i32, i32
  }
  func.func @transform_1(%arg0: i32) -> (i32, i32, i32) {
    %c0_i32 = arith.constant 0 : i32
    %c0_i32_0 = arith.constant 0 : i32
    %c0_i32_1 = arith.constant 0 : i32
    return %arg0, %c0_i32, %c0_i32_0 : i32, i32, i32
  }
  func.func @transform_2(%arg0: i32) -> (i32, i32, i32, i32) {
    %c0_i32 = arith.constant 0 : i32
    %c0_i32_0 = arith.constant 0 : i32
    %c0_i32_1 = arith.constant 0 : i32
    %c0_i32_2 = arith.constant 0 : i32
    %c0_i32_3 = arith.constant 0 : i32
    return %c0_i32, %c0_i32_0, %c0_i32_1, %c0_i32_2 : i32, i32, i32, i32
  }
  func.func @transform_3(%arg0: i32) -> (i32, i32, i32, i32) {
    %c0_i32 = arith.constant 0 : i32
    %c0_i32_0 = arith.constant 0 : i32
    %c0_i32_1 = arith.constant 0 : i32
    %c0_i32_2 = arith.constant 0 : i32
    %c0_i32_3 = arith.constant 0 : i32
    return %c0_i32, %c0_i32_0, %c0_i32_1, %c0_i32_2 : i32, i32, i32, i32
  }
  func.func @transform_4(%arg0: i32) -> (i32, i32, i32, i32) {
    %c0_i32 = arith.constant 0 : i32
    %c0_i32_0 = arith.constant 0 : i32
    %c0_i32_1 = arith.constant 0 : i32
    %c0_i32_2 = arith.constant 0 : i32
    %c0_i32_3 = arith.constant 0 : i32
    return %c0_i32, %c0_i32_0, %c0_i32_1, %c0_i32_2 : i32, i32, i32, i32
  }
  func.func @transform_5(%arg0: i32) -> (i32, i32, i32, i32) {
    %c0_i32 = arith.constant 0 : i32
    %c0_i32_0 = arith.constant 0 : i32
    %c0_i32_1 = arith.constant 0 : i32
    %c0_i32_2 = arith.constant 0 : i32
    %c0_i32_3 = arith.constant 0 : i32
    return %c0_i32, %c0_i32_0, %c0_i32_1, %c0_i32_2 : i32, i32, i32, i32
  }
  func.func @transform_6(%arg0: i32) -> (i32, i32, i32) {
    %c0_i32 = arith.constant 0 : i32
    %c0_i32_0 = arith.constant 0 : i32
    %c0_i32_1 = arith.constant 0 : i32
    %c0_i32_2 = arith.constant 0 : i32
    return %c0_i32, %c0_i32_0, %c0_i32_1 : i32, i32, i32
  }
  func.func @transform_7(%arg0: i32) -> (i32, i32, i32) {
    %c0_i32 = arith.constant 0 : i32
    %c0_i32_0 = arith.constant 0 : i32
    %c0_i32_1 = arith.constant 0 : i32
    %c0_i32_2 = arith.constant 0 : i32
    return %c0_i32, %c0_i32_0, %c0_i32_1 : i32, i32, i32
  }
  func.func @transform_8(%arg0: i32) -> (i32, i32, i32) {
    %c0_i32 = arith.constant 0 : i32
    %c0_i32_0 = arith.constant 0 : i32
    %c0_i32_1 = arith.constant 0 : i32
    %c0_i32_2 = arith.constant 0 : i32
    return %c0_i32, %c0_i32_0, %c0_i32_1 : i32, i32, i32
  }
  func.func @transform_9(%arg0: i32) -> (i32, i32, i32) {
    %c0_i32 = arith.constant 0 : i32
    %c0_i32_0 = arith.constant 0 : i32
    %c0_i32_1 = arith.constant 0 : i32
    return %arg0, %c0_i32, %c0_i32_0 : i32, i32, i32
  }
}

</mosaic_0001>

<bundles_post_ra>
// kernel: tpu_custom_call.1
= control target key start
LH: loop header
LB: loop body
LE: loop exit
PB: predicated region body
PF: predicated region fallthrough
CT: control target
= control target key end

     0   :  { %vm54_vm0 = vcmask 261120   ;;  %s8196_s0 = inlined_call_operand.vmem [shape: f32[2,8,32], index: 0, kind: input, shape index: {}]   ;;  %s8197_s1 = inlined_call_operand.vmem [shape: f32[2,1,8], index: 1, kind: input, shape index: {}]   ;;  %s8198_s2 = inlined_call_operand.vmem [shape: f32[2,4,32,8], index: 2, kind: input, shape index: {}]   ;;  %s8199_s3 = inlined_call_operand.vmem [shape: f32[2,4,32,8], index: 3, kind: input, shape index: {}]   ;;  %s8200_s4 = inlined_call_operand.vmem [shape: f32[2,4,32,8], index: 4, kind: input, shape index: {}]   ;;  %s8201_s5 = inlined_call_operand.vmem [shape: f32[2,4,8,32], index: 5, kind: input, shape index: {}]   ;;  %s8202_s6 = inlined_call_operand.vmem [shape: f32[2,32,128], index: 6, kind: input, shape index: {}]   ;;  %s8203_s7 = inlined_call_operand.vmem [shape: f32[2,128,32], index: 7, kind: input, shape index: {}]   ;;  %s8204_s8 = inlined_call_operand.vmem [shape: f32[2,8,128], index: 8, kind: input, shape index: {}]   ;;  %s8205_s9 = inlined_call_operand.hbm [shape: f32[2,8,32], index: 9, kind: output, shape index: {}]  }
   0x1   :  { %v50_v0 = vld [vmem:[%s8198_s2] sm:$0xff]  ;;  %v51_v1 = vld [vmem:[%s8198_s2 + $0x8] sm:$0xff]  ;;  %v52_v2 = vld [vmem:[%s8198_s2 + $0x10] sm:$0xff] }
   0x2   :  { %v6845_v3 = vpack.c.bf16 %v51_v1, %v50_v0  ;;  %v53_v4 = vld [vmem:[%s8198_s2 + $0x18] sm:$0xff]  ;;  %v7310_v5 = vld [vmem:[%s8196_s0] sm:$0xff]  ;;  %v137_v8 = vld [vmem:[%s8199_s3 + $0x8] sm:$0xff] }
   0x3   :  { %v6849_v6 = vpack.c.bf16 %v53_v4, %v52_v2  ;;  %6297 = vmatprep.mubr.msk.f32.mxu1 %vm54_vm0, %v7310_v5  ;;  %v136_v7 = vld [vmem:[%s8199_s3] sm:$0xff] }
   0x4   :  { %6846 = vmatprep.subr.bf16.mxu1 %v6845_v3 }
   0x5   :  { %6848 = vmatpush3.bf16.msra.mxu1 %v6845_v3 }
   0x6   :  { %14 = vsyncpa [#allocation3], 0  ;;  %6850 = vmatprep.subr.bf16.mxu1 %v6849_v6  ;;  %v6853_v9 = vpack.c.bf16 %v137_v8, %v136_v7  ;;  %v138_v10 = vld [vmem:[%s8199_s3 + $0x10] sm:$0xff]  ;;  %v139_v11 = vld [vmem:[%s8199_s3 + $0x18] sm:$0xff]  ;;  %v7240_v20 = vmov 0.0   ;;  %vm7241_vm1 = vmmov 0  }
   0x7   :  { %v7329_v12 = vld [vmem:[%s8196_s0 + $0x8] sm:$0xff]  ;;  %v6857_v13 = vpack.c.bf16 %v139_v11, %v138_v10  ;;  %v215_v14 = vld [vmem:[%s8200_s4] sm:$0xff]  ;;  %v217_v17 = vld [vmem:[%s8200_s4 + $0x10] sm:$0xff]  ;;  %6332 = vmatprep.subr.mxu0 %v7240_v20  ;;  %6334 = vmatprep.mubr.msk.f32.mxu0 %vm7241_vm1, %v7240_v20  ;;  %vm294_vm2 = vcmask 64512  }
   0x8   :  { %v216_v15 = vld [vmem:[%s8200_s4 + $0x8] sm:$0xff]  ;;  %v218_v18 = vld [vmem:[%s8200_s4 + $0x18] sm:$0xff]  ;;  %v7372_v29 = vld [vmem:[%s8197_s1 + $0x1] ss:$0 sm:$0xff] }
   0x9   :  { %6852 = vmatpush3.bf16.msra.mxu1 %v6849_v6  ;;  %v6861_v16 = vpack.c.bf16 %v216_v15, %v215_v14  ;;  %v6865_v19 = vpack.c.bf16 %v218_v18, %v217_v17  ;;  %v7377_v30 = vld [vmem:[%s8197_s1] ss:$0 sm:$0xff]  ;;  %v5800_v48 = vld [vmem:[%s8199_s3 + $0x28] sm:$0xff]  ;;  %v5801_v55 = vld [vmem:[%s8199_s3 + $0x30] sm:$0xff] }
   0xa   :  { %6854 = vmatprep.subr.bf16.mxu1 %v6853_v9  ;;  %v5799_v47 = vld [vmem:[%s8199_s3 + $0x20] sm:$0xff]  ;;  %v5794_v51 = vld [vmem:[%s8198_s2 + $0x28] sm:$0xff]  ;;  %v5802_v56 = vld [vmem:[%s8199_s3 + $0x38] sm:$0xff] }
   0xb   :  { %v6877_v49 = vpack.c.bf16 %v5800_v48, %v5799_v47  ;;  %v5793_v50 = vld [vmem:[%s8198_s2 + $0x20] sm:$0xff]  ;;  %v6881_v59 = vpack.c.bf16 %v5802_v56, %v5801_v55  ;;  %v5795_v60 = vld [vmem:[%s8198_s2 + $0x30] sm:$0xff]  ;;  %v5796_v61 = vld [vmem:[%s8198_s2 + $0x38] sm:$0xff] }
   0xc   :  { %6298 = vmatmul.mubr.msk.f32.vlgmr.msra.gmra.mrb[0].mxu1 %vm54_vm0, %v7329_v12  ;;  %v6869_v52 = vpack.c.bf16 %v5794_v51, %v5793_v50  ;;  %v6873_v0 = vpack.c.bf16 %v5796_v61, %v5795_v60  ;;  %v5805_v10 = vld [vmem:[%s8200_s4 + $0x20] sm:$0xff]  ;;  %v5806_v11 = vld [vmem:[%s8200_s4 + $0x28] sm:$0xff]  ;;  %v5808_v15 = vld [vmem:[%s8200_s4 + $0x38] sm:$0xff] }
   0xd   :  { %6856 = vmatpush3.bf16.msra.mxu1 %v6853_v9  ;;  %6308 = vmatprep.mubr.msk.f32.mxu1 %vm54_vm0, %v7310_v5  ;;  %v6885_v14 = vpack.c.bf16 %v5806_v11, %v5805_v10  ;;  %v615_v47 = vld [vmem:[%s8201_s5] sm:$0xff]  ;;  %v5824_v51 = vld [vmem:[%s8198_s2 + $0x50] sm:$0xff]  ;;  %v5835_v55 = vld [vmem:[%s8200_s4 + $0x48] sm:$0xff] }
   0xe   :  { %6858 = vmatprep.subr.bf16.mxu1 %v6857_v13  ;;  %v5822_v48 = vld [vmem:[%s8198_s2 + $0x40] sm:$0xff]  ;;  %v5836_v56 = vld [vmem:[%s8200_s4 + $0x50] sm:$0xff] }
   0xf   :  { %v5828_v61 = vld [vmem:[%s8199_s3 + $0x40] sm:$0xff] }
  0x11   :  { %6860 = vmatpush3.bf16.msra.mxu1 %v6857_v13  ;;  %v5807_v13 = vld [vmem:[%s8200_s4 + $0x30] sm:$0xff] }
  0x12   :  { %6862 = vmatprep.subr.bf16.mxu1 %v6861_v16 }
  0x14   :  { %6309 = vmatmul.mubr.msk.f32.vlgmr.msra.gmra.mrb[2].mxu1 %vm54_vm0, %v7329_v12 }
  0x15   :  { %6864 = vmatpush3.bf16.msra.mxu1 %v6861_v16  ;;  %6319 = vmatprep.mubr.msk.f32.mxu1 %vm54_vm0, %v7310_v5  ;;  %v6889_v16 = vpack.c.bf16 %v5808_v15, %v5807_v13 }
  0x16   :  { %6866 = vmatprep.subr.bf16.mxu1 %v6865_v19 }
  0x19   :  { %6868 = vmatpush3.bf16.msra.mxu1 %v6865_v19 }
  0x1a   :  { %6322 = vmatprep.subr.mxu1 %v7240_v20 }
  0x1c   :  { %6320 = vmatmul.mubr.msk.f32.vlgmr.msra.gmra.mrb[4].mxu1 %vm54_vm0, %v7329_v12 }
  0x1d   :  { %6324 = vmatprep.mubr.msk.f32.mxu1 %vm7241_vm1, %v7240_v20 }
  0xdf   :  { %v6299_v21 = vpop.f32.mrb[0].mxu1 }
  0xe0   :  { %v127_v22 = vpop.f32.mrb[1].mxu1 }
  0xe7   :  { %v6310_v23 = vpop.f32.mrb[2].mxu1 }
  0xe8   :  { %v206_v24 = vpop.f32.mrb[3].mxu1 }
  0xe9   :  { %6323 = vmatpush3.xpose.msk.msra.mxu1 %vm294_vm2, %v206_v24 }
  0xea   :  { %6327 = vmatprep.subr.mxu1 %v7240_v20 }
  0xec   :  { %6325 = vmatmul.mubr.msk.f32.vlgmr.msra.gmra.mrb[6].mxu1 %vm294_vm2, %v127_v22 }
  0xed   :  { %6328 = vmatpush3.xpose.msk.msra.mxu1 %vm294_vm2, %v6310_v23  ;;  %6329 = vmatprep.mubr.msk.f32.mxu1 %vm7241_vm1, %v7240_v20 }
  0xee   :  { %6337 = vmatprep.subr.mxu1 %v7240_v20 }
  0xef   :  { %v6321_v25 = vpop.f32.mrb[4].mxu1 }
  0xf0   :  { %6330 = vmatmul.mubr.msk.f32.vlgmr.msra.gmra.mrb[8].mxu1 %vm294_vm2, %v6299_v21  ;;  %v285_v26 = vpop.f32.mrb[5].mxu1 }
  0xf1   :  { %6339 = vmatprep.mubr.msk.f32.mxu1 %vm7241_vm1, %v7240_v20  ;;  %6338 = vmatpush3.msra.mxu1 %v6321_v25 }
  0xf2   :  { %6333 = vmatpush3.msra.mxu0 %v285_v26  ;;  %6878 = vmatprep.subr.bf16.mxu1 %v6877_v49 }
  0xf3   :  { %6870 = vmatprep.subr.bf16.mxu0 %v6869_v52 }
 0x1bf   :  { %v367_v27 = vpop.f32.mrb[6].mxu1 }
 0x1c0   :  { %v6326_v28 = vpop.f32.mrb[7].mxu1  ;;  %v368_v34 = vadd.f32 %v7377_v30, %v367_v27 }
 0x1c2   :  { %v447_v36 = vsel %vm294_vm2, %v368_v34, -inf }
 0x1c3   :  { %v443_v31 = vpop.f32.mrb[8].mxu1 }
 0x1c4   :  { %v444_v32 = vadd.f32 %v7372_v29, %v443_v31  ;;  %v6331_v33 = vpop.f32.mrb[9].mxu1 }
 0x1c6   :  { %v450_v35 = vsel %vm294_vm2, %v444_v32, -inf }
 0x1c7   :  { %451 = vmax.xlane.f32.xlu0 %v450_v35 }
 0x1cb   :  { %448 = vmax.xlane.f32.xlu0 %v447_v36 }
 0x254   :  { %v452_v37 = vpop.xlane.xlu0 %451 }
 0x255   :  { %v454_v38 = vsub.f32 %v444_v32, %v452_v37 }
 0x257   :  { %v457_v39 = vmul.f32 1.442695, %v454_v38 }
 0x258   :  { %v449_v40 = vpop.xlane.xlu0 %448 }
 0x259   :  { %7134 = vpow2.f32 %v457_v39  ;;  %v453_v41 = vsub.f32 %v368_v34, %v449_v40 }
 0x25b   :  { %v455_v42 = vmul.f32 1.442695, %v453_v41 }
 0x25d   :  { %7136 = vpow2.f32 %v455_v42 }
 0x263   :  { %v7135_v43 = vpop.eup %7134 }
 0x264   :  { %v462_v44 = vsel %vm294_vm2, %v7135_v43, 0.0 }
 0x265   :  { %463 = vadd.xlane.f32.xlu1 %v462_v44 }
 0x267   :  { %v7137_v45 = vpop.eup %7136 }
 0x268   :  { %v459_v46 = vsel %vm294_vm2, %v7137_v45, 0.0 }
 0x269   :  { %460 = vadd.xlane.f32.xlu1 %v459_v46  ;;  %v5817_v46 = vld [vmem:[%s8201_s5 + $0x8] sm:$0xff] }
 0x2f2   :  { %v464_v53 = vpop.xlane.xlu1 %463 }
 0x2f3   :  { %7138 = vrcp.f32 %v464_v53 }
 0x2f6   :  { %v461_v54 = vpop.xlane.xlu1 %460 }
 0x2f7   :  { %7140 = vrcp.f32 %v461_v54  ;;  %v5834_v54 = vld [vmem:[%s8200_s4 + $0x40] sm:$0xff] }
 0x2fd   :  { %v7139_v57 = vpop.eup %7138 }
 0x2fe   :  { %v468_v58 = vmul.f32 %v7139_v57, %v7135_v43  ;;  %v6909_v57 = vpack.c.bf16 %v5835_v55, %v5834_v54 }
 0x300   :  { %6340 = vmatmul.mubr.msk.f32.vlgmr.msra.gmra.mrb[10].mxu1 %vm294_vm2, %v468_v58  ;;  %v5837_v58 = vld [vmem:[%s8200_s4 + $0x58] sm:$0xff] }
 0x301   :  { %v7141_v62 = vpop.eup %7140  ;;  %6880 = vmatpush3.bf16.msra.mxu1 %v6877_v49  ;;  %6361 = vmatprep.mubr.msk.f32.mxu1 %vm54_vm0, %v7310_v5  ;;  %v5823_v49 = vld [vmem:[%s8198_s2 + $0x48] sm:$0xff] }
 0x302   :  { %6882 = vmatprep.subr.bf16.mxu1 %v6881_v59  ;;  %v467_v63 = vmul.f32 %v7141_v62, %v7137_v45  ;;  %v6893_v50 = vpack.c.bf16 %v5823_v49, %v5822_v48  ;;  %v5829_v62 = vld [vmem:[%s8199_s3 + $0x48] sm:$0xff]  ;;  %v5851_v48 = vld [vmem:[%s8198_s2 + $0x70] sm:$0xff]  ;;  %v5852_v49 = vld [vmem:[%s8198_s2 + $0x78] sm:$0xff] }
 0x304   :  { %6335 = vmatmul.mubr.msk.f32.vlgmr.msra.gmra.mrb[0].mxu0 %vm294_vm2, %v467_v63 }
 0x305   :  { %6872 = vmatpush3.bf16.msra.mxu0 %v6869_v52  ;;  %6884 = vmatpush3.bf16.msra.mxu1 %v6881_v59  ;;  %v5825_v52 = vld [vmem:[%s8198_s2 + $0x58] sm:$0xff]  ;;  %v6913_v59 = vpack.c.bf16 %v5837_v58, %v5836_v56 }
 0x306   :  { %6874 = vmatprep.subr.bf16.mxu0 %v6873_v0  ;;  %6350 = vmatprep.mubr.msk.f32.mxu0 %vm54_vm0, %v7310_v5  ;;  %v6897_v53 = vpack.c.bf16 %v5825_v52, %v5824_v51  ;;  %v5857_v51 = vld [vmem:[%s8199_s3 + $0x70] sm:$0xff]  ;;  %v5858_v52 = vld [vmem:[%s8199_s3 + $0x78] sm:$0xff] }
 0x307   :  { %6375 = vmatprep.subr.mxu1 %v7240_v20  ;;  %v6929_v56 = vpack.c.bf16 %v5858_v52, %v5857_v51 }
 0x308   :  { %6362 = vmatmul.mubr.msk.f32.vlgmr.msra.gmra.mrb[12].mxu1 %vm54_vm0, %v7329_v12 }
 0x309   :  { %6876 = vmatpush3.bf16.msra.mxu0 %v6873_v0  ;;  %6377 = vmatprep.mubr.msk.f32.mxu1 %vm7241_vm1, %v7240_v20  ;;  %v6901_v0 = vpack.c.bf16 %v5829_v62, %v5828_v61  ;;  %v5861_v62 = vld [vmem:[%s8200_s4 + $0x60] sm:$0xff] }
 0x30a   :  { %6886 = vmatprep.subr.bf16.mxu0 %v6885_v14 }
 0x30c   :  { %6351 = vmatmul.mubr.msk.f32.vlgmr.msra.gmra.mrb[2].mxu0 %vm54_vm0, %v7329_v12 }
 0x30d   :  { %6372 = vmatprep.mubr.msk.f32.mxu0 %vm54_vm0, %v7310_v5  ;;  %6888 = vmatpush3.bf16.msra.mxu0 %v6885_v14 }
 0x30e   :  { %6890 = vmatprep.subr.bf16.mxu0 %v6889_v16 }
 0x311   :  { %6892 = vmatpush3.bf16.msra.mxu0 %v6889_v16 }
 0x312   :  { %6385 = vmatprep.subr.mxu0 %v7240_v20 }
 0x314   :  { %6373 = vmatmul.mubr.msk.f32.vlgmr.msra.gmra.mrb[4].mxu0 %vm54_vm0, %v7329_v12 }
 0x315   :  { %6387 = vmatprep.mubr.msk.f32.mxu0 %vm7241_vm1, %v7240_v20 }
 0x3d3   :  { %v7424_v1 = vpop.f32.mrb[10].mxu1 }
 0x3d4   :  { %v6341_v2 = vpop.f32.mrb[11].mxu1 }
 0x3d7   :  { %v7426_v3 = vpop.f32.mrb[0].mxu0 }
 0x3d8   :  { %v6336_v4 = vpop.f32.mrb[1].mxu0 }
 0x3db   :  { %v6363_v6 = vpop.f32.mrb[12].mxu1 }
 0x3dc   :  { %v767_v7 = vpop.f32.mrb[13].mxu1 }
 0x3dd   :  { %6376 = vmatpush3.xpose.msk.msra.mxu1 %vm294_vm2, %v767_v7  ;;  %v5831_v7 = vld [vmem:[%s8199_s3 + $0x58] sm:$0xff] }
 0x3de   :  { %6380 = vmatprep.subr.mxu1 %v7240_v20 }
 0x3df   :  { %v6352_v8 = vpop.f32.mrb[2].mxu0 }
 0x3e0   :  { %v687_v9 = vpop.f32.mrb[3].mxu0 }
 0x3e1   :  { %6378 = vmatmul.mubr.msk.f32.vlgmr.msra.gmra.mrb[14].mxu1 %vm294_vm2, %v687_v9 }
 0x3e2   :  { %6381 = vmatpush3.xpose.msk.msra.mxu1 %vm294_vm2, %v6363_v6  ;;  %6382 = vmatprep.mubr.msk.f32.mxu1 %vm7241_vm1, %v7240_v20  ;;  %v5830_v6 = vld [vmem:[%s8199_s3 + $0x50] sm:$0xff] }
 0x3e3   :  { %6390 = vmatprep.subr.mxu1 %v7240_v20 }
 0x3e5   :  { %6383 = vmatmul.mubr.msk.f32.vlgmr.msra.gmra.mrb[16].mxu1 %vm294_vm2, %v6352_v8  ;;  %v6905_v8 = vpack.c.bf16 %v5831_v7, %v5830_v6 }
 0x3e6   :  { %6392 = vmatprep.mubr.msk.f32.mxu1 %vm7241_vm1, %v7240_v20 }
 0x3e7   :  { %v6374_v38 = vpop.f32.mrb[4].mxu0 }
 0x3e8   :  { %v847_v39 = vpop.f32.mrb[5].mxu0  ;;  %6391 = vmatpush3.msra.mxu1 %v6374_v38 }
 0x3e9   :  { %6386 = vmatpush3.msra.mxu0 %v847_v39  ;;  %6894 = vmatprep.subr.bf16.mxu1 %v6893_v50 }
 0x3ea   :  { %6395 = vmatprep.subr.mxu0 %v5817_v46 }
 0x4b4   :  { %v928_v17 = vpop.f32.mrb[14].mxu1 }
 0x4b5   :  { %v929_v18 = vadd.f32 %v7377_v30, %v928_v17  ;;  %v6379_v19 = vpop.f32.mrb[15].mxu1 }
 0x4b7   :  { %v1008_v21 = vsel %vm294_vm2, %v929_v18, -inf }
 0x4b8   :  { %1009 = vmax.xlane.f32.xlu0 %v1008_v21  ;;  %v1004_v22 = vpop.f32.mrb[16].mxu1 }
 0x4b9   :  { %v1005_v23 = vadd.f32 %v7372_v29, %v1004_v22  ;;  %v6384_v24 = vpop.f32.mrb[17].mxu1 }
 0x4bb   :  { %v1011_v25 = vsel %vm294_vm2, %v1005_v23, -inf }
 0x4bc   :  { %1012 = vmax.xlane.f32.xlu1 %v1011_v25 }
 0x545   :  { %v1010_v26 = vpop.xlane.xlu0 %1009 }
 0x546   :  { %v1014_v27 = vsub.f32 %v929_v18, %v1010_v26 }
 0x548   :  { %v1016_v28 = vmul.f32 1.442695, %v1014_v27 }
 0x549   :  { %v1013_v31 = vpop.xlane.xlu1 %1012 }
 0x54a   :  { %7142 = vpow2.f32 %v1016_v28  ;;  %v1015_v32 = vsub.f32 %v1005_v23, %v1013_v31 }
 0x54c   :  { %v1018_v33 = vmul.f32 1.442695, %v1015_v32 }
 0x54e   :  { %7144 = vpow2.f32 %v1018_v33 }
 0x554   :  { %v7143_v34 = vpop.eup %7142 }
 0x555   :  { %v1020_v35 = vsel %vm294_vm2, %v7143_v34, 0.0 }
 0x556   :  { %1021 = vadd.xlane.f32.xlu0 %v1020_v35  ;;  %v5846_v35 = vld [vmem:[%s8201_s5 + $0x10] sm:$0xff] }
 0x558   :  { %v7145_v36 = vpop.eup %7144 }
 0x559   :  { %v1023_v37 = vsel %vm294_vm2, %v7145_v36, 0.0 }
 0x55a   :  { %1024 = vadd.xlane.f32.xlu1 %v1023_v37 }
 0x5e3   :  { %v1022_v40 = vpop.xlane.xlu0 %1021 }
 0x5e4   :  { %7146 = vrcp.f32 %v1022_v40 }
 0x5e7   :  { %v1025_v41 = vpop.xlane.xlu1 %1024 }
 0x5e8   :  { %7148 = vrcp.f32 %v1025_v41 }
 0x5ee   :  { %v7147_v42 = vpop.eup %7146 }
 0x5ef   :  { %v1028_v43 = vmul.f32 %v7147_v42, %v7143_v34  ;;  %v5855_v42 = vld [vmem:[%s8199_s3 + $0x60] sm:$0xff] }
 0x5f1   :  { %6388 = vmatmul.mubr.msk.f32.vlgmr.msra.gmra.mrb[6].mxu0 %vm294_vm2, %v1028_v43  ;;  %v5856_v43 = vld [vmem:[%s8199_s3 + $0x68] sm:$0xff] }
 0x5f2   :  { %v7149_v44 = vpop.eup %7148  ;;  %6396 = vmatpush3.msra.mxu0 %v5817_v46  ;;  %v5850_v46 = vld [vmem:[%s8198_s2 + $0x68] sm:$0xff] }
 0x5f3   :  { %v1029_v45 = vmul.f32 %v7149_v44, %v7145_v36  ;;  %6400 = vmatprep.subr.mxu0 %v615_v47  ;;  %v6925_v44 = vpack.c.bf16 %v5856_v43, %v5855_v42 }
 0x5f5   :  { %6393 = vmatmul.mubr.msk.f32.vlgmr.msra.gmra.mrb[18].mxu1 %vm294_vm2, %v1029_v45  ;;  %v5849_v45 = vld [vmem:[%s8198_s2 + $0x60] sm:$0xff] }
 0x5f6   :  { %6413 = vmatprep.mubr.msk.f32.mxu1 %vm54_vm0, %v7310_v5  ;;  %6896 = vmatpush3.bf16.msra.mxu1 %v6893_v50  ;;  %v6921_v50 = vpack.c.bf16 %v5852_v49, %v5851_v48 }
 0x5f7   :  { %6898 = vmatprep.subr.bf16.mxu1 %v6897_v53 }
 0x5fa   :  { %6900 = vmatpush3.bf16.msra.mxu1 %v6897_v53 }
 0x5fb   :  { %6910 = vmatprep.subr.bf16.mxu1 %v6909_v57 }
 0x5fd   :  { %6414 = vmatmul.mubr.msk.f32.vlgmr.msra.gmra.mrb[20].mxu1 %vm54_vm0, %v7329_v12 }
 0x5fe   :  { %6435 = vmatprep.mubr.msk.f32.mxu1 %vm54_vm0, %v7310_v5  ;;  %6912 = vmatpush3.bf16.msra.mxu1 %v6909_v57 }
 0x5ff   :  { %6914 = vmatprep.subr.bf16.mxu1 %v6913_v59 }
 0x602   :  { %6916 = vmatpush3.bf16.msra.mxu1 %v6913_v59 }
 0x603   :  { %6443 = vmatprep.subr.mxu1 %v7240_v20 }
 0x605   :  { %6436 = vmatmul.mubr.msk.f32.vlgmr.msra.gmra.mrb[22].mxu1 %vm54_vm0, %v7329_v12 }
 0x606   :  { %6445 = vmatprep.mubr.msk.f32.mxu1 %vm7241_vm1, %v7240_v20 }
 0x6c4   :  { %v1099_v60 = vpop.f32.mrb[6].mxu0 }
 0x6c5   :  { %v6389_v63 = vpop.f32.mrb[7].mxu0  ;;  %6397 = vmatprep.mubr.msk.f32.mxu0 %vm294_vm2, %v1099_v60 }
 0x6c6   :  { %v5862_v63 = vld [vmem:[%s8200_s4 + $0x68] sm:$0xff] }
 0x6c8   :  { %v1172_v2 = vpop.f32.mrb[18].mxu1 }
 0x6c9   :  { %v6394_v4 = vpop.f32.mrb[19].mxu1  ;;  %6398 = vmatmul.mubr.msk.f32.vlgmr.msra.gmra.mrb[8].mxu0 %vm294_vm2, %v1172_v2  ;;  %v6933_v2 = vpack.c.bf16 %v5862_v63, %v5861_v62  ;;  %v2679_v62 = vld [vmem:[%s8202_s6 + $0x10] sm:$0xff]  ;;  %v2680_v63 = vld [vmem:[%s8202_s6 + $0x18] sm:$0xff] }
 0x6ca   :  { %6401 = vmatpush3.msra.mxu0 %v615_v47  ;;  %6402 = vmatprep.mubr.msk.f32.mxu0 %vm294_vm2, %v7426_v3  ;;  %v6917_v47 = vpack.c.bf16 %v5850_v46, %v5849_v45  ;;  %v5864_v4 = vld [vmem:[%s8200_s4 + $0x78] sm:$0xff] }
 0x6cb   :  { %6902 = vmatprep.subr.bf16.mxu0 %v6901_v0 }
 0x6d0   :  { %v6415_v3 = vpop.f32.mrb[20].mxu1 }
 0x6d1   :  { %6403 = vmatmul.mubr.msk.f32.vlgmr.msra.gmra.mrb[8].mxu0 %vm294_vm2, %v7424_v1  ;;  %v1411_v9 = vpop.f32.mrb[21].mxu1 }
 0x6d2   :  { %6904 = vmatpush3.bf16.msra.mxu0 %v6901_v0  ;;  %6424 = vmatprep.mubr.msk.f32.mxu0 %vm54_vm0, %v7310_v5  ;;  %v5863_v0 = vld [vmem:[%s8200_s4 + $0x70] sm:$0xff] }
 0x6d3   :  { %6906 = vmatprep.subr.bf16.mxu0 %v6905_v8  ;;  %v6937_v6 = vpack.c.bf16 %v5864_v4, %v5863_v0  ;;  %v6945_v0 = vpack.c.bf16 %v2680_v63, %v2679_v62  ;;  %v2769_v4 = vld [vmem:[%s8203_s7 + $0x8] sm:$0xff] }
 0x6d6   :  { %6908 = vmatpush3.bf16.msra.mxu0 %v6905_v8 }
 0x6d7   :  { %6438 = vmatprep.subr.mxu0 %v7240_v20 }
 0x6d8   :  { %v6437_v10 = vpop.f32.mrb[22].mxu1 }
 0x6d9   :  { %6425 = vmatmul.mubr.msk.f32.vlgmr.msra.gmra.mrb[10].mxu0 %vm54_vm0, %v7329_v12  ;;  %v1571_v11 = vpop.f32.mrb[23].mxu1 }
 0x6da   :  { %6440 = vmatprep.mubr.msk.f32.mxu0 %vm7241_vm1, %v7240_v20 }
 0x7ac   :  { %v6426_v13 = vpop.f32.mrb[10].mxu0 }
 0x7ad   :  { %v1491_v1 = vpop.f32.mrb[11].mxu0  ;;  %6444 = vmatpush3.xpose.msk.msra.mxu1 %vm294_vm2, %v6426_v13 }
 0x7ae   :  { %6439 = vmatpush3.xpose.msk.msra.mxu0 %vm294_vm2, %v1491_v1  ;;  %6453 = vmatprep.subr.mxu1 %v7240_v20 }
 0x7af   :  { %6448 = vmatprep.subr.mxu0 %v7240_v20 }
 0x7b0   :  { %6446 = vmatmul.mubr.msk.f32.vlgmr.msra.gmra.mrb[24].mxu1 %vm294_vm2, %v6415_v3 }
 0x7b1   :  { %6441 = vmatmul.mubr.msk.f32.vlgmr.msra.gmra.mrb[12].mxu0 %vm294_vm2, %v1411_v9  ;;  %6454 = vmatpush3.msra.mxu1 %v6437_v10 }
 0x7b2   :  { %6449 = vmatpush3.msra.mxu0 %v1571_v11  ;;  %6455 = vmatprep.mubr.msk.f32.mxu1 %vm7241_vm1, %v7240_v20 }
 0x7b3   :  { %6450 = vmatprep.mubr.msk.f32.mxu0 %vm7241_vm1, %v7240_v20  ;;  %6458 = vmatprep.subr.mxu0 %v5846_v35 }
 0x7b4   :  { %6918 = vmatprep.subr.bf16.mxu1 %v6917_v47 }
 0x883   :  { %v1728_v14 = vpop.f32.mrb[24].mxu1 }
 0x884   :  { %v1729_v15 = vadd.f32 %v7372_v29, %v1728_v14  ;;  %v1652_v16 = vpop.f32.mrb[12].mxu0  ;;  %v6447_v17 = vpop.f32.mrb[25].mxu1 }
 0x885   :  { %v1653_v18 = vadd.f32 %v7377_v30, %v1652_v16  ;;  %v6442_v19 = vpop.f32.mrb[13].mxu0 }
 0x886   :  { %v1735_v21 = vsel %vm294_vm2, %v1729_v15, -inf }
 0x887   :  { %1736 = vmax.xlane.f32.xlu1 %v1735_v21  ;;  %v1732_v22 = vsel %vm294_vm2, %v1653_v18, -inf }
 0x888   :  { %1733 = vmax.xlane.f32.xlu0 %v1732_v22 }
 0x914   :  { %v1737_v23 = vpop.xlane.xlu1 %1736 }
 0x915   :  { %v1739_v24 = vsub.f32 %v1729_v15, %v1737_v23  ;;  %v1734_v25 = vpop.xlane.xlu0 %1733 }
 0x916   :  { %v1738_v26 = vsub.f32 %v1653_v18, %v1734_v25 }
 0x917   :  { %v1742_v27 = vmul.f32 1.442695, %v1739_v24 }
 0x918   :  { %v1740_v28 = vmul.f32 1.442695, %v1738_v26 }
 0x919   :  { %7150 = vpow2.f32 %v1742_v27 }
 0x91a   :  { %7152 = vpow2.f32 %v1740_v28 }
 0x923   :  { %v7151_v31 = vpop.eup %7150 }
 0x924   :  { %v7153_v32 = vpop.eup %7152  ;;  %v1747_v33 = vsel %vm294_vm2, %v7151_v31, 0.0 }
 0x925   :  { %1748 = vadd.xlane.f32.xlu1 %v1747_v33  ;;  %v1744_v34 = vsel %vm294_vm2, %v7153_v32, 0.0  ;;  %v5873_v33 = vld [vmem:[%s8201_s5 + $0x18] sm:$0xff] }
 0x926   :  { %1745 = vadd.xlane.f32.xlu0 %v1744_v34 }
 0x9b2   :  { %v1749_v36 = vpop.xlane.xlu1 %1748 }
 0x9b3   :  { %7154 = vrcp.f32 %v1749_v36  ;;  %v1746_v37 = vpop.xlane.xlu0 %1745 }
 0x9b4   :  { %7156 = vrcp.f32 %v1746_v37 }
 0x9bd   :  { %v7155_v38 = vpop.eup %7154 }
 0x9be   :  { %v7157_v39 = vpop.eup %7156  ;;  %v1753_v40 = vmul.f32 %v7155_v38, %v7151_v31  ;;  %v2630_v38 = vlaneseq }
 0x9bf   :  { %v1752_v41 = vmul.f32 %v7157_v39, %v7153_v32 }
 0x9c0   :  { %6456 = vmatmul.mubr.msk.f32.vlgmr.msra.gmra.mrb[26].mxu1 %vm294_vm2, %v1753_v40  ;;  %v7629_v39 = vshrl.u32 %v2630_v38, 7 }
 0x9c1   :  { %6451 = vmatmul.mubr.msk.f32.vlgmr.msra.gmra.mrb[14].mxu0 %vm294_vm2, %v1752_v41  ;;  %6471 = vmatprep.mubr.msk.f32.mxu1 %vm54_vm0, %v7310_v5  ;;  %v7635_v41 = vld [vmem:[%s8204_s8] sm:$0xff] }
 0x9c2   :  { %6459 = vmatpush3.msra.mxu0 %v5846_v35  ;;  %6920 = vmatpush3.bf16.msra.mxu1 %v6917_v47  ;;  %v2632_v40 = vsub.s32 0, %v7629_v39 }
 0x9c3   :  { %6926 = vmatprep.subr.bf16.mxu0 %v6925_v44  ;;  %6922 = vmatprep.subr.bf16.mxu1 %v6921_v50 }
 0x9c4   :  { %v2633_v42 = vrot.slane %v7635_v41, %v2632_v40 }
 0x9c6   :  { %6924 = vmatpush3.bf16.msra.mxu1 %v6921_v50 }
 0x9c7   :  { %6934 = vmatprep.subr.bf16.mxu1 %v6933_v2 }
 0x9c9   :  { %6472 = vmatmul.mubr.msk.f32.vlgmr.msra.gmra.mrb[28].mxu1 %vm54_vm0, %v7329_v12 }
 0x9ca   :  { %6493 = vmatprep.mubr.msk.f32.mxu1 %vm54_vm0, %v7310_v5  ;;  %6936 = vmatpush3.bf16.msra.mxu1 %v6933_v2  ;;  %v2768_v2 = vld [vmem:[%s8203_s7] sm:$0xff] }
 0x9cb   :  { %6938 = vmatprep.subr.bf16.mxu1 %v6937_v6 }
 0x9ce   :  { %6940 = vmatpush3.bf16.msra.mxu1 %v6937_v6  ;;  %v2770_v6 = vld [vmem:[%s8203_s7 + $0x10] sm:$0xff] }
 0x9cf   :  { %6506 = vmatprep.subr.mxu1 %v7240_v20 }
 0x9d1   :  { %6494 = vmatmul.mubr.msk.f32.vlgmr.msra.gmra.mrb[30].mxu1 %vm54_vm0, %v7329_v12 }
 0x9d2   :  { %6508 = vmatprep.mubr.msk.f32.mxu1 %vm7241_vm1, %v7240_v20 }
 0xa93   :  { %v1896_v53 = vpop.f32.mrb[26].mxu1 }
 0xa94   :  { %v1823_v54 = vpop.f32.mrb[14].mxu0  ;;  %v6457_v55 = vpop.f32.mrb[27].mxu1 }
 0xa95   :  { %v6452_v57 = vpop.f32.mrb[15].mxu0  ;;  %6460 = vmatprep.mubr.msk.f32.mxu0 %vm294_vm2, %v1823_v54 }
 0xa96   :  { %6461 = vmatmul.mubr.msk.f32.vlgmr.msra.gmra.mrb[8].mxu0 %vm294_vm2, %v1896_v53 }
 0xa97   :  { %6928 = vmatpush3.bf16.msra.mxu0 %v6925_v44  ;;  %6482 = vmatprep.mubr.msk.f32.mxu0 %vm54_vm0, %v7310_v5 }
 0xa98   :  { %6930 = vmatprep.subr.bf16.mxu0 %v6929_v56 }
 0xa9b   :  { %6932 = vmatpush3.bf16.msra.mxu0 %v6929_v56 }
 0xa9c   :  { %6496 = vmatprep.subr.mxu0 %v7240_v20  ;;  %v6473_v58 = vpop.f32.mrb[28].mxu1 }
 0xa9d   :  { %v2056_v59 = vpop.f32.mrb[29].mxu1 }
 0xa9e   :  { %6483 = vmatmul.mubr.msk.f32.vlgmr.msra.gmra.mrb[16].mxu0 %vm54_vm0, %v7329_v12 }
 0xa9f   :  { %6498 = vmatprep.mubr.msk.f32.mxu0 %vm7241_vm1, %v7240_v20 }
 0xb71   :  { %v6484_v60 = vpop.f32.mrb[16].mxu0 }
 0xb72   :  { %v2136_v61 = vpop.f32.mrb[17].mxu0 }
 0xb73   :  { %6497 = vmatpush3.xpose.msk.msra.mxu0 %vm294_vm2, %v2136_v61 }
 0xb74   :  { %6501 = vmatprep.subr.mxu0 %v7240_v20 }
 0xb76   :  { %6499 = vmatmul.mubr.msk.f32.vlgmr.msra.gmra.mrb[18].mxu0 %vm294_vm2, %v2056_v59  ;;  %v2677_v59 = vld [vmem:[%s8202_s6] sm:$0xff] }
 0xb77   :  { %6502 = vmatpush3.xpose.msk.msra.mxu0 %vm294_vm2, %v6484_v60  ;;  %6503 = vmatprep.mubr.msk.f32.mxu0 %vm7241_vm1, %v7240_v20  ;;  %v2678_v60 = vld [vmem:[%s8202_s6 + $0x8] sm:$0xff] }
 0xb78   :  { %6511 = vmatprep.subr.mxu0 %v7240_v20  ;;  %v6941_v61 = vpack.c.bf16 %v2678_v60, %v2677_v59 }
 0xb7a   :  { %6504 = vmatmul.mubr.msk.f32.vlgmr.msra.gmra.mrb[20].mxu0 %vm294_vm2, %v6473_v58 }
 0xb7b   :  { %6513 = vmatprep.mubr.msk.f32.mxu0 %vm7241_vm1, %v7240_v20 }
 0xc49   :  { %v2297_v7 = vpop.f32.mrb[18].mxu0 }
 0xc4a   :  { %v2298_v8 = vadd.f32 %v7377_v30, %v2297_v7  ;;  %v6500_v3 = vpop.f32.mrb[19].mxu0  ;;  %v6949_v7 = vpack.c.bf16 %v2769_v4, %v2768_v2 }
 0xc4c   :  { %v2377_v9 = vsel %vm294_vm2, %v2298_v8, -inf }
 0xc4d   :  { %2378 = vmax.xlane.f32.xlu0 %v2377_v9  ;;  %v2373_v10 = vpop.f32.mrb[20].mxu0  ;;  %v2772_v9 = vld [vmem:[%s8203_s7 + $0x20] sm:$0xff] }
 0xc4e   :  { %v2374_v11 = vadd.f32 %v7372_v29, %v2373_v10  ;;  %v6505_v13 = vpop.f32.mrb[21].mxu0  ;;  %v6495_v29 = vpop.f32.mrb[30].mxu1  ;;  %v2773_v10 = vld [vmem:[%s8203_s7 + $0x28] sm:$0xff] }
 0xc4f   :  { %v2216_v24 = vpop.f32.mrb[31].mxu1  ;;  %6512 = vmatpush3.msra.mxu0 %v6495_v29  ;;  %v2774_v13 = vld [vmem:[%s8203_s7 + $0x30] sm:$0xff] }
 0xc50   :  { %v2380_v1 = vsel %vm294_vm2, %v2374_v11, -inf  ;;  %6507 = vmatpush3.msra.mxu1 %v2216_v24  ;;  %6516 = vmatprep.subr.mxu0 %v5873_v33 }
 0xc51   :  { %2381 = vmax.xlane.f32.xlu1 %v2380_v1  ;;  %6942 = vmatprep.subr.bf16.mxu1 %v6941_v61  ;;  %v2775_v1 = vld [vmem:[%s8203_s7 + $0x38] sm:$0xff] }
 0xcda   :  { %v2379_v14 = vpop.xlane.xlu0 %2378 }
 0xcdb   :  { %v2383_v15 = vsub.f32 %v2298_v8, %v2379_v14  ;;  %v2771_v8 = vld [vmem:[%s8203_s7 + $0x18] sm:$0xff]  ;;  %v6961_v14 = vpack.c.bf16 %v2775_v1, %v2774_v13  ;;  %v5879_v1 = vld [vmem:[%s8198_s2 + $0x80] sm:$0xff] }
 0xcdc   :  { %v6953_v3 = vpack.c.bf16 %v2771_v8, %v2770_v6 }
 0xcdd   :  { %v2385_v16 = vmul.f32 1.442695, %v2383_v15  ;;  %v2776_v15 = vld [vmem:[%s8203_s7 + $0x40] sm:$0xff] }
 0xcde   :  { %v2382_v17 = vpop.xlane.xlu1 %2381 }
 0xcdf   :  { %7158 = vpow2.f32 %v2385_v16  ;;  %v2384_v18 = vsub.f32 %v2374_v11, %v2382_v17  ;;  %v6957_v11 = vpack.c.bf16 %v2773_v10, %v2772_v9  ;;  %v2777_v16 = vld [vmem:[%s8203_s7 + $0x48] sm:$0xff] }
 0xce0   :  { %v6965_v17 = vpack.c.bf16 %v2777_v16, %v2776_v15  ;;  %v5881_v16 = vld [vmem:[%s8198_s2 + $0x90] sm:$0xff] }
 0xce1   :  { %v2387_v19 = vmul.f32 1.442695, %v2384_v18  ;;  %v2778_v18 = vld [vmem:[%s8203_s7 + $0x50] sm:$0xff] }
 0xce3   :  { %7160 = vpow2.f32 %v2387_v19  ;;  %v2779_v19 = vld [vmem:[%s8203_s7 + $0x58] sm:$0xff] }
 0xce9   :  { %v7159_v30 = vpop.eup %7158 }
 0xcea   :  { %v2389_v21 = vsel %vm294_vm2, %v7159_v30, 0.0 }
 0xceb   :  { %2390 = vadd.xlane.f32.xlu0 %v2389_v21  ;;  %v2780_v21 = vld [vmem:[%s8203_s7 + $0x60] sm:$0xff] }
 0xced   :  { %v7161_v22 = vpop.eup %7160 }
 0xcee   :  { %v2392_v23 = vsel %vm294_vm2, %v7161_v22, 0.0 }
 0xcef   :  { %2393 = vadd.xlane.f32.xlu1 %v2392_v23 }
 0xd78   :  { %v2391_v25 = vpop.xlane.xlu0 %2390 }
 0xd79   :  { %7162 = vrcp.f32 %v2391_v25 }
 0xd7c   :  { %v2394_v26 = vpop.xlane.xlu1 %2393 }
 0xd7d   :  { %7164 = vrcp.f32 %v2394_v26 }
 0xd83   :  { %v7163_v27 = vpop.eup %7162 }
 0xd84   :  { %v2397_v28 = vmul.f32 %v7163_v27, %v7159_v30  ;;  %v6969_v30 = vpack.c.bf16 %v2779_v19, %v2778_v18  ;;  %v5885_v19 = vld [vmem:[%s8199_s3 + $0x80] sm:$0xff] }
 0xd86   :  { %6509 = vmatmul.mubr.msk.f32.vlgmr.msra.gmra.mrb[32].mxu1 %vm294_vm2, %v2397_v28 }
 0xd87   :  { %v7165_v31 = vpop.eup %7164  ;;  %6944 = vmatpush3.bf16.msra.mxu1 %v6941_v61 }
 0xd88   :  { %v2398_v32 = vmul.f32 %v7165_v31, %v7161_v22  ;;  %6946 = vmatprep.subr.bf16.mxu1 %v6945_v0  ;;  %v2781_v22 = vld [vmem:[%s8203_s7 + $0x68] sm:$0xff]  ;;  %v2667_v31 = vsub.s32 1, %v7629_v39 }
 0xd89   :  { %v6973_v23 = vpack.c.bf16 %v2781_v22, %v2780_v21 }
 0xd8a   :  { %6514 = vmatmul.mubr.msk.f32.vlgmr.msra.gmra.mrb[22].mxu0 %vm294_vm2, %v2398_v32  ;;  %v2673_v32 = vsub.s32 2, %v7629_v39 }
 0xd8b   :  { %6517 = vmatpush3.msra.mxu0 %v5873_v33  ;;  %6948 = vmatpush3.bf16.msra.mxu1 %v6945_v0  ;;  %v2668_v33 = vrot.slane %v7635_v41, %v2667_v31 }
 0xd8c   :  { %6950 = vmatprep.subr.bf16.mxu0 %v6949_v7  ;;  %v2674_v38 = vrot.slane %v7635_v41, %v2673_v32 }
 0xe59   :  { %v2468_v34 = vpop.f32.mrb[32].mxu1 }
 0xe5a   :  { %v6510_v35 = vpop.f32.mrb[33].mxu1  ;;  %6518 = vmatprep.mubr.msk.f32.mxu0 %vm294_vm2, %v2468_v34 }
 0xe5d   :  { %v2541_v36 = vpop.f32.mrb[22].mxu0 }
 0xe5e   :  { %v6515_v37 = vpop.f32.mrb[23].mxu0  ;;  %6519 = vmatmul.mubr.msk.f32.vlgmr.msra.gmra.mrb[8].mxu0 %vm294_vm2, %v2541_v36 }
 0xe5f   :  { %6952 = vmatpush3.bf16.msra.mxu0 %v6949_v7 }
 0xe60   :  { %6954 = vmatprep.subr.bf16.mxu0 %v6953_v3 }
 0xe63   :  { %6956 = vmatpush3.bf16.msra.mxu0 %v6953_v3 }
 0xe64   :  { %6958 = vmatprep.subr.bf16.mxu0 %v6957_v11 }
 0xe67   :  { %6960 = vmatpush3.bf16.msra.mxu0 %v6957_v11 }
 0xe68   :  { %6962 = vmatprep.subr.bf16.mxu0 %v6961_v14 }
 0xe6b   :  { %6964 = vmatpush3.bf16.msra.mxu0 %v6961_v14  ;;  %v5880_v14 = vld [vmem:[%s8198_s2 + $0x88] sm:$0xff] }
 0xe6c   :  { %6966 = vmatprep.subr.bf16.mxu0 %v6965_v17  ;;  %v6981_v15 = vpack.c.bf16 %v5880_v14, %v5879_v1 }
 0xe6e   :  { %6982 = vmatprep.subr.bf16.mxu1 %v6981_v15 }
 0xe6f   :  { %6968 = vmatpush3.bf16.msra.mxu0 %v6965_v17  ;;  %v5882_v17 = vld [vmem:[%s8198_s2 + $0x98] sm:$0xff] }
 0xe70   :  { %6970 = vmatprep.subr.bf16.mxu0 %v6969_v30  ;;  %v6985_v18 = vpack.c.bf16 %v5882_v17, %v5881_v16 }
 0xe73   :  { %6972 = vmatpush3.bf16.msra.mxu0 %v6969_v30  ;;  %v5886_v30 = vld [vmem:[%s8199_s3 + $0x88] sm:$0xff] }
 0xe74   :  { %6974 = vmatprep.subr.bf16.mxu0 %v6973_v23  ;;  %v6989_v21 = vpack.c.bf16 %v5886_v30, %v5885_v19  ;;  %v5905_v19 = vld [vmem:[%s8198_s2 + $0xa8] sm:$0xff] }
 0xe77   :  { %6976 = vmatpush3.bf16.msra.mxu0 %v6973_v23 }
 0xf31   :  { %v6520_v43 = vpop.f32.mrb[8].mxu0 }
 0xf32   :  { %v2635_v44 = vadd.f32 %v6520_v43, %v2633_v42  ;;  %v2619_v45 = vpop.f32.mrb[9].mxu0 }
 0xf33   :  { %v2634_v46 = vadd.f32 %v2633_v42, %v2619_v45 }
 0xf34   :  { %v2637_v47 = vadd.f32 %v2635_v44, %v7329_v12 }
 0xf35   :  { %v2636_v48 = vadd.f32 %v2634_v46, %v7310_v5  ;;  %v2782_v46 = vld [vmem:[%s8203_s7 + $0x70] sm:$0xff] }
 0xf36   :  { %v2641_v49 = vsel %vm54_vm0, %v2637_v47, 0.0 }
 0xf37   :  { %2642 = vadd.xlane.f32.xlu1 %v2641_v49  ;;  %v2638_v50 = vsel %vm54_vm0, %v2636_v48, 0.0  ;;  %v2683_v49 = vsub.s32 3, %v7629_v39 }
 0xf38   :  { %2639 = vadd.xlane.f32.xlu0 %v2638_v50 }
 0xf39   :  { %v2684_v50 = vrot.slane %v7635_v41, %v2683_v49 }
 0xfc4   :  { %v2643_v51 = vpop.xlane.xlu1 %2642 }
 0xfc5   :  { %v2646_v52 = vmul.f32 0.03125, %v2643_v51  ;;  %v2640_v53 = vpop.xlane.xlu0 %2639 }
 0xfc6   :  { %v2645_v54 = vmul.f32 0.03125, %v2640_v53 }
 0xfc7   :  { %v7644_v55 = vsub.f32 %v2637_v47, %v2646_v52  ;;  %v2783_v47 = vld [vmem:[%s8203_s7 + $0x78] sm:$0xff] }
 0xfc8   :  { %v7646_v56 = vsub.f32 %v2636_v48, %v2645_v54  ;;  %v6977_v48 = vpack.c.bf16 %v2783_v47, %v2782_v46 }
 0xfc9   :  { %v2650_v57 = vmul.f32 %v7644_v55, %v7644_v55 }
 0xfca   :  { %v2649_v5 = vmul.f32 %v7646_v56, %v7646_v56  ;;  %6978 = vmatprep.subr.bf16.mxu0 %v6977_v48 }
 0xfcb   :  { %v2654_v12 = vsel %vm54_vm0, %v2650_v57, 0.0  ;;  %6980 = vmatpush3.bf16.msra.mxu0 %v6977_v48  ;;  %v2786_v57 = vsub.s32 4, %v7629_v39 }
 0xfcc   :  { %2655 = vadd.xlane.f32.xlu1 %v2654_v12  ;;  %v2651_v58 = vsel %vm54_vm0, %v2649_v5, 0.0  ;;  %6610 = vmatprep.subr.mxu0 %v7240_v20 }
 0xfcd   :  { %2652 = vadd.xlane.f32.xlu0 %v2651_v58  ;;  %v2787_v5 = vrot.slane %v7635_v41, %v2786_v57 }
0x1059   :  { %v2656_v29 = vpop.xlane.xlu1 %2655 }
0x105a   :  { %v2658_v24 = vmul.f32 0.03125, %v2656_v29  ;;  %v2653_v25 = vpop.xlane.xlu0 %2652 }
0x105b   :  { %v2657_v26 = vmul.f32 0.03125, %v2653_v25 }
0x105c   :  { %v2660_v27 = vadd.f32 1e-05, %v2658_v24 }
0x105d   :  { %v2659_v28 = vadd.f32 1e-05, %v2657_v26 }
0x105e   :  { %7166 = vrsqrt.f32 %v2660_v27  ;;  %v2893_v27 = vsub.s32 5, %v7629_v39 }
0x105f   :  { %7168 = vrsqrt.f32 %v2659_v28  ;;  %v2899_v28 = vsub.s32 6, %v7629_v39 }
0x1068   :  { %v7167_v34 = vpop.eup %7166 }
0x1069   :  { %v7169_v35 = vpop.eup %7168  ;;  %v2664_v36 = vmul.f32 %v7167_v34, %v7644_v55 }
0x106a   :  { %v2663_v37 = vmul.f32 %v7169_v35, %v7646_v56 }
0x106b   :  { %v2670_v42 = vmul.f32 %v2668_v33, %v2664_v36 }
0x106c   :  { %v2669_v43 = vmul.f32 %v2668_v33, %v2663_v37  ;;  %v2894_v33 = vrot.slane %v7635_v41, %v2893_v27  ;;  %v2900_v37 = vrot.slane %v7635_v41, %v2899_v28  ;;  %v5891_v41 = vld [vmem:[%s8200_s4 + $0x80] sm:$0xff] }
0x106d   :  { %v2676_v45 = vadd.f32 %v2674_v38, %v2670_v42 }
0x106e   :  { %v2675_v44 = vadd.f32 %v2674_v38, %v2669_v43 }
0x1070   :  { %6529 = vmatprep.mubr.msk.f32.mxu1 %vm54_vm0, %v2675_v44 }
0x1071   :  { %6530 = vmatmul.mubr.msk.f32.vlgmr.msra.gmra.mrb[34].mxu1 %vm54_vm0, %v2676_v45 }
0x1072   :  { %6984 = vmatpush3.bf16.msra.mxu1 %v6981_v15 }
0x1073   :  { %6986 = vmatprep.subr.bf16.mxu1 %v6985_v18 }
0x1076   :  { %6988 = vmatpush3.bf16.msra.mxu1 %v6985_v18  ;;  %v5904_v18 = vld [vmem:[%s8198_s2 + $0xa0] sm:$0xff] }
0x1077   :  { %6990 = vmatprep.subr.bf16.mxu1 %v6989_v21  ;;  %v7005_v30 = vpack.c.bf16 %v5905_v19, %v5904_v18  ;;  %v5933_v19 = vld [vmem:[%s8198_s2 + $0xc0] sm:$0xff] }
0x1144   :  { %v6531_v51 = vpop.f32.mrb[34].mxu1 }
0x1145   :  { %v2763_v52 = vadd.f32 %v6531_v51, %v2684_v50  ;;  %v2757_v53 = vpop.f32.mrb[35].mxu1 }
0x1146   :  { %v2758_v54 = vadd.f32 %v2757_v53, %v2684_v50  ;;  %v5892_v50 = vld [vmem:[%s8200_s4 + $0x88] sm:$0xff]  ;;  %v5894_v53 = vld [vmem:[%s8200_s4 + $0x98] sm:$0xff] }
0x1147   :  { %v2767_v56 = vmax.f32 %v2763_v52, 0.0  ;;  %v6997_v51 = vpack.c.bf16 %v5892_v50, %v5891_v41  ;;  %v5893_v52 = vld [vmem:[%s8200_s4 + $0x90] sm:$0xff]  ;;  %v5919_v50 = vld [vmem:[%s8200_s4 + $0xb8] sm:$0xff] }
0x1148   :  { %v2766_v55 = vmax.f32 %v2758_v54, 0.0  ;;  %v7001_v54 = vpack.c.bf16 %v5894_v53, %v5893_v52  ;;  %v5918_v41 = vld [vmem:[%s8200_s4 + $0xb0] sm:$0xff] }
0x114a   :  { %6564 = vmatprep.mubr.f32.mxu0 %v2766_v55 }
0x114b   :  { %6565 = vmatmul.mubr.f32.vlgmr.msra.gmra.mrb[24].mxu0 %v2767_v56 }
0x114c   :  { %6612 = vmatprep.mubr.msk.f32.mxu0 %vm7241_vm1, %v7240_v20 }
0x121e   :  { %v6566_v12 = vpop.f32.mrb[24].mxu0 }
0x121f   :  { %v2860_v58 = vadd.f32 %v6566_v12, %v2787_v5  ;;  %v2854_v59 = vpop.f32.mrb[25].mxu0 }
0x1220   :  { %v2855_v60 = vadd.f32 %v2854_v59, %v2787_v5 }
0x1221   :  { %v2864_v61 = vadd.f32 %v2860_v58, %v2676_v45  ;;  %v5888_v45 = vld [vmem:[%s8199_s3 + $0x98] sm:$0xff] }
0x1222   :  { %v2863_v62 = vadd.f32 %v2855_v60, %v2675_v44  ;;  %v5887_v44 = vld [vmem:[%s8199_s3 + $0x90] sm:$0xff] }
0x1223   :  { %v2868_v63 = vsel %vm54_vm0, %v2864_v61, 0.0  ;;  %v6993_v48 = vpack.c.bf16 %v5888_v45, %v5887_v44 }
0x1224   :  { %2869 = vadd.xlane.f32.xlu1 %v2868_v63  ;;  %v2865_v0 = vsel %vm54_vm0, %v2863_v62, 0.0 }
0x1225   :  { %2866 = vadd.xlane.f32.xlu0 %v2865_v0 }
0x12b1   :  { %v2870_v2 = vpop.xlane.xlu1 %2869 }
0x12b2   :  { %v2872_v4 = vmul.f32 0.03125, %v2870_v2  ;;  %v2867_v6 = vpop.xlane.xlu0 %2866 }
0x12b3   :  { %v2871_v7 = vmul.f32 0.03125, %v2867_v6 }
0x12b4   :  { %v2874_v8 = vsub.f32 %v2864_v61, %v2872_v4  ;;  %v7817_v61 = vld [vmem:[%s8197_s1] ss:$0 sm:$0xff]  ;;  %v7824_v4 = vld [vmem:[%s8197_s1 + $0x1] ss:$0 sm:$0xff] }
0x12b5   :  { %v2873_v3 = vsub.f32 %v2863_v62, %v2871_v7 }
0x12b6   :  { %v2876_v9 = vmul.f32 %v2874_v8, %v2874_v8 }
0x12b7   :  { %v2875_v10 = vmul.f32 %v2873_v3, %v2873_v3 }
0x12b8   :  { %v2880_v11 = vsel %vm54_vm0, %v2876_v9, 0.0 }
0x12b9   :  { %2881 = vadd.xlane.f32.xlu1 %v2880_v11  ;;  %v2877_v13 = vsel %vm54_vm0, %v2875_v10, 0.0 }
0x12ba   :  { %2878 = vadd.xlane.f32.xlu0 %v2877_v13 }
0x1346   :  { %v2882_v22 = vpop.xlane.xlu1 %2881 }
0x1347   :  { %v2884_v23 = vmul.f32 0.03125, %v2882_v22  ;;  %v2879_v29 = vpop.xlane.xlu0 %2878  ;;  %v5911_v22 = vld [vmem:[%s8199_s3 + $0xa8] sm:$0xff] }
0x1348   :  { %v2883_v24 = vmul.f32 0.03125, %v2879_v29 }
0x1349   :  { %v2886_v25 = vadd.f32 1e-05, %v2884_v23 }
0x134a   :  { %v2885_v26 = vadd.f32 1e-05, %v2883_v24 }
0x134b   :  { %7170 = vrsqrt.f32 %v2886_v25  ;;  %v5906_v25 = vld [vmem:[%s8198_s2 + $0xb0] sm:$0xff] }
0x134c   :  { %7172 = vrsqrt.f32 %v2885_v26  ;;  %v5907_v26 = vld [vmem:[%s8198_s2 + $0xb8] sm:$0xff] }
0x1355   :  { %v7171_v34 = vpop.eup %7170 }
0x1356   :  { %v7173_v35 = vpop.eup %7172  ;;  %v2890_v36 = vmul.f32 %v7171_v34, %v2874_v8 }
0x1357   :  { %v2889_v38 = vmul.f32 %v7173_v35, %v2873_v3  ;;  %v7009_v35 = vpack.c.bf16 %v5907_v26, %v5906_v25  ;;  %v5935_v25 = vld [vmem:[%s8198_s2 + $0xd0] sm:$0xff]  ;;  %v5936_v26 = vld [vmem:[%s8198_s2 + $0xd8] sm:$0xff] }
0x1358   :  { %v2896_v42 = vmul.f32 %v2894_v33, %v2890_v36  ;;  %v5912_v36 = vld [vmem:[%s8199_s3 + $0xb0] sm:$0xff] }
0x1359   :  { %v2895_v43 = vmul.f32 %v2894_v33, %v2889_v38  ;;  %v5916_v38 = vld [vmem:[%s8200_s4 + $0xa0] sm:$0xff] }
0x135a   :  { %v7775_v47 = vadd.f32 %v2900_v37, %v2896_v42  ;;  %v5917_v42 = vld [vmem:[%s8200_s4 + $0xa8] sm:$0xff] }
0x135b   :  { %v7773_v46 = vadd.f32 %v2900_v37, %v2895_v43  ;;  %v5913_v37 = vld [vmem:[%s8199_s3 + $0xb8] sm:$0xff] }
0x135c   :  { %v7017_v45 = vpack.c.bf16 %v5913_v37, %v5912_v36  ;;  %v5945_v36 = vld [vmem:[%s8200_s4 + $0xc0] sm:$0xff]  ;;  %v5946_v37 = vld [vmem:[%s8200_s4 + $0xc8] sm:$0xff] }
0x135d   :  { %6575 = vmatprep.mubr.msk.f32.mxu1 %vm54_vm0, %v7773_v46 }
0x135e   :  { %6576 = vmatmul.mubr.msk.f32.vlgmr.msra.gmra.mrb[36].mxu1 %vm54_vm0, %v7775_v47 }
0x135f   :  { %6992 = vmatpush3.bf16.msra.mxu1 %v6989_v21  ;;  %6586 = vmatprep.mubr.msk.f32.mxu1 %vm54_vm0, %v7773_v46  ;;  %v5910_v21 = vld [vmem:[%s8199_s3 + $0xa0] sm:$0xff] }
0x1360   :  { %6994 = vmatprep.subr.bf16.mxu1 %v6993_v48  ;;  %v7013_v23 = vpack.c.bf16 %v5911_v22, %v5910_v21 }
0x1363   :  { %6996 = vmatpush3.bf16.msra.mxu1 %v6993_v48  ;;  %v7021_v48 = vpack.c.bf16 %v5917_v42, %v5916_v38  ;;  %v7045_v38 = vpack.c.bf16 %v5946_v37, %v5945_v36  ;;  %v5947_v42 = vld [vmem:[%s8200_s4 + $0xd0] sm:$0xff] }
0x1364   :  { %6998 = vmatprep.subr.bf16.mxu1 %v6997_v51 }
0x1366   :  { %6587 = vmatmul.mubr.msk.f32.vlgmr.msra.gmra.mrb[38].mxu1 %vm54_vm0, %v7775_v47 }
0x1367   :  { %7000 = vmatpush3.bf16.msra.mxu1 %v6997_v51  ;;  %6597 = vmatprep.mubr.msk.f32.mxu1 %vm54_vm0, %v7773_v46  ;;  %v7025_v51 = vpack.c.bf16 %v5919_v50, %v5918_v41  ;;  %v5939_v50 = vld [vmem:[%s8199_s3 + $0xc0] sm:$0xff] }
0x1368   :  { %7002 = vmatprep.subr.bf16.mxu1 %v7001_v54 }
0x136b   :  { %7004 = vmatpush3.bf16.msra.mxu1 %v7001_v54 }
0x136c   :  { %6600 = vmatprep.subr.mxu1 %v7240_v20 }
0x136e   :  { %6598 = vmatmul.mubr.msk.f32.vlgmr.msra.gmra.mrb[40].mxu1 %vm54_vm0, %v7775_v47 }
0x136f   :  { %6602 = vmatprep.mubr.msk.f32.mxu1 %vm7241_vm1, %v7240_v20 }
0x1431   :  { %v6577_v55 = vpop.f32.mrb[36].mxu1 }
0x1432   :  { %v2982_v56 = vpop.f32.mrb[37].mxu1 }
0x1439   :  { %v6588_v5 = vpop.f32.mrb[38].mxu1 }
0x143a   :  { %v3062_v12 = vpop.f32.mrb[39].mxu1 }
0x143b   :  { %6601 = vmatpush3.xpose.msk.msra.mxu1 %vm294_vm2, %v3062_v12 }
0x143c   :  { %6605 = vmatprep.subr.mxu1 %v7240_v20 }
0x143e   :  { %6603 = vmatmul.mubr.msk.f32.vlgmr.msra.gmra.mrb[42].mxu1 %vm294_vm2, %v2982_v56 }
0x143f   :  { %6606 = vmatpush3.xpose.msk.msra.mxu1 %vm294_vm2, %v6588_v5  ;;  %6607 = vmatprep.mubr.msk.f32.mxu1 %vm7241_vm1, %v7240_v20 }
0x1440   :  { %6615 = vmatprep.subr.mxu1 %v7240_v20 }
0x1441   :  { %v6599_v58 = vpop.f32.mrb[40].mxu1 }
0x1442   :  { %v3142_v59 = vpop.f32.mrb[41].mxu1  ;;  %6608 = vmatmul.mubr.msk.f32.vlgmr.msra.gmra.mrb[44].mxu1 %vm294_vm2, %v6577_v55 }
0x1443   :  { %6611 = vmatpush3.msra.mxu0 %v3142_v59  ;;  %6616 = vmatpush3.msra.mxu1 %v6599_v58 }
0x1444   :  { %6617 = vmatprep.mubr.msk.f32.mxu1 %vm7241_vm1, %v7240_v20  ;;  %7006 = vmatprep.subr.bf16.mxu0 %v7005_v30 }
0x1445   :  { %7014 = vmatprep.subr.bf16.mxu1 %v7013_v23 }
0x1511   :  { %v3223_v60 = vpop.f32.mrb[42].mxu1 }
0x1512   :  { %v3224_v62 = vadd.f32 %v7817_v61, %v3223_v60  ;;  %v6604_v63 = vpop.f32.mrb[43].mxu1 }
0x1514   :  { %v3303_v0 = vsel %vm294_vm2, %v3224_v62, -inf }
0x1515   :  { %3304 = vmax.xlane.f32.xlu1 %v3303_v0  ;;  %v3299_v2 = vpop.f32.mrb[44].mxu1 }
0x1516   :  { %v3300_v6 = vadd.f32 %v7824_v4, %v3299_v2  ;;  %v6609_v7 = vpop.f32.mrb[45].mxu1 }
0x1518   :  { %v3306_v8 = vsel %vm294_vm2, %v3300_v6, -inf }
0x1519   :  { %3307 = vmax.xlane.f32.xlu0 %v3306_v8 }
0x15a2   :  { %v3305_v3 = vpop.xlane.xlu1 %3304 }
0x15a3   :  { %v3309_v9 = vsub.f32 %v3224_v62, %v3305_v3 }
0x15a5   :  { %v3311_v10 = vmul.f32 1.442695, %v3309_v9 }
0x15a6   :  { %v3308_v11 = vpop.xlane.xlu0 %3307 }
0x15a7   :  { %7174 = vpow2.f32 %v3311_v10  ;;  %v3310_v13 = vsub.f32 %v3300_v6, %v3308_v11 }
0x15a9   :  { %v3313_v1 = vmul.f32 1.442695, %v3310_v13 }
0x15ab   :  { %7176 = vpow2.f32 %v3313_v1 }
0x15b1   :  { %v7175_v14 = vpop.eup %7174 }
0x15b2   :  { %v3315_v15 = vsel %vm294_vm2, %v7175_v14, 0.0 }
0x15b3   :  { %3316 = vadd.xlane.f32.xlu1 %v3315_v15 }
0x15b5   :  { %v7177_v16 = vpop.eup %7176 }
0x15b6   :  { %v3318_v17 = vsel %vm294_vm2, %v7177_v16, 0.0 }
0x15b7   :  { %3319 = vadd.xlane.f32.xlu0 %v3318_v17 }
0x1640   :  { %v3317_v29 = vpop.xlane.xlu1 %3316 }
0x1641   :  { %7178 = vrcp.f32 %v3317_v29 }
0x1644   :  { %v3320_v24 = vpop.xlane.xlu0 %3319 }
0x1645   :  { %7180 = vrcp.f32 %v3320_v24 }
0x164b   :  { %v7179_v33 = vpop.eup %7178 }
0x164c   :  { %v3323_v34 = vmul.f32 %v7179_v33, %v7175_v14 }
0x164e   :  { %6613 = vmatmul.mubr.msk.f32.vlgmr.msra.gmra.mrb[26].mxu0 %vm294_vm2, %v3323_v34 }
0x164f   :  { %v7181_v43 = vpop.eup %7180  ;;  %7008 = vmatpush3.bf16.msra.mxu0 %v7005_v30  ;;  %6628 = vmatprep.mubr.msk.f32.mxu0 %vm54_vm0, %v7773_v46  ;;  %v5934_v30 = vld [vmem:[%s8198_s2 + $0xc8] sm:$0xff] }
0x1650   :  { %v3324_v44 = vmul.f32 %v7181_v43, %v7177_v16  ;;  %7010 = vmatprep.subr.bf16.mxu0 %v7009_v35  ;;  %v7029_v21 = vpack.c.bf16 %v5934_v30, %v5933_v19  ;;  %v5948_v43 = vld [vmem:[%s8200_s4 + $0xd8] sm:$0xff] }
0x1652   :  { %6618 = vmatmul.mubr.msk.f32.vlgmr.msra.gmra.mrb[46].mxu1 %vm294_vm2, %v3324_v44  ;;  %v7049_v44 = vpack.c.bf16 %v5948_v43, %v5947_v42  ;;  %v5972_v43 = vld [vmem:[%s8200_s4 + $0xe0] sm:$0xff] }
0x1653   :  { %7012 = vmatpush3.bf16.msra.mxu0 %v7009_v35  ;;  %7016 = vmatpush3.bf16.msra.mxu1 %v7013_v23  ;;  %v7033_v35 = vpack.c.bf16 %v5936_v26, %v5935_v25 }
0x1654   :  { %6639 = vmatprep.mubr.msk.f32.mxu1 %vm54_vm0, %v7773_v46  ;;  %7018 = vmatprep.subr.bf16.mxu1 %v7017_v45 }
0x1655   :  { %7022 = vmatprep.subr.bf16.mxu0 %v7021_v48 }
0x1656   :  { %6629 = vmatmul.mubr.msk.f32.vlgmr.msra.gmra.mrb[28].mxu0 %vm54_vm0, %v7775_v47 }
0x1657   :  { %7020 = vmatpush3.bf16.msra.mxu1 %v7017_v45  ;;  %7024 = vmatpush3.bf16.msra.mxu0 %v7021_v48  ;;  %v5928_v45 = vld [vmem:[%s8201_s5 + $0x28] sm:$0xff]  ;;  %v5903_v48 = vld [vmem:[%s8201_s5 + $0x20] sm:$0xff] }
0x1658   :  { %6650 = vmatprep.mubr.msk.f32.mxu0 %vm54_vm0, %v7773_v46  ;;  %7026 = vmatprep.subr.bf16.mxu0 %v7025_v51 }
0x1659   :  { %6653 = vmatprep.subr.mxu1 %v7240_v20 }
0x165a   :  { %6640 = vmatmul.mubr.msk.f32.vlgmr.msra.gmra.mrb[48].mxu1 %vm54_vm0, %v7775_v47 }
0x165b   :  { %7028 = vmatpush3.bf16.msra.mxu0 %v7025_v51  ;;  %6655 = vmatprep.mubr.msk.f32.mxu1 %vm7241_vm1, %v7240_v20  ;;  %v5940_v51 = vld [vmem:[%s8199_s3 + $0xc8] sm:$0xff] }
0x165c   :  { %6663 = vmatprep.subr.mxu0 %v7240_v20 }
0x165e   :  { %6651 = vmatmul.mubr.msk.f32.vlgmr.msra.gmra.mrb[30].mxu0 %vm54_vm0, %v7775_v47 }
0x165f   :  { %6665 = vmatprep.mubr.msk.f32.mxu0 %vm7241_vm1, %v7240_v20 }
0x1721   :  { %v7886_v52 = vpop.f32.mrb[26].mxu0 }
0x1722   :  { %v6614_v53 = vpop.f32.mrb[27].mxu0 }
0x1725   :  { %v7888_v54 = vpop.f32.mrb[46].mxu1 }
0x1726   :  { %v6619_v55 = vpop.f32.mrb[47].mxu1 }
0x1727   :  { %v7037_v55 = vpack.c.bf16 %v5940_v51, %v5939_v50  ;;  %v5966_v51 = vld [vmem:[%s8199_s3 + $0xe0] sm:$0xff] }
0x1729   :  { %v6630_v56 = vpop.f32.mrb[28].mxu0 }
0x172a   :  { %v3544_v5 = vpop.f32.mrb[29].mxu0 }
0x172d   :  { %v6641_v12 = vpop.f32.mrb[48].mxu1 }
0x172e   :  { %v3624_v58 = vpop.f32.mrb[49].mxu1 }
0x172f   :  { %6654 = vmatpush3.xpose.msk.msra.mxu1 %vm294_vm2, %v3624_v58  ;;  %v5942_v58 = vld [vmem:[%s8199_s3 + $0xd8] sm:$0xff] }
0x1730   :  { %6658 = vmatprep.subr.mxu1 %v7240_v20 }
0x1731   :  { %v6652_v59 = vpop.f32.mrb[30].mxu0 }
0x1732   :  { %v3704_v60 = vpop.f32.mrb[31].mxu0  ;;  %6656 = vmatmul.mubr.msk.f32.vlgmr.msra.gmra.mrb[50].mxu1 %vm294_vm2, %v3544_v5 }
0x1733   :  { %6659 = vmatpush3.xpose.msk.msra.mxu1 %vm294_vm2, %v6641_v12  ;;  %6664 = vmatpush3.msra.mxu0 %v3704_v60  ;;  %v5941_v12 = vld [vmem:[%s8199_s3 + $0xd0] sm:$0xff] }
0x1734   :  { %6660 = vmatprep.mubr.msk.f32.mxu1 %vm7241_vm1, %v7240_v20  ;;  %6668 = vmatprep.subr.mxu1 %v7240_v20 }
0x1735   :  { %6673 = vmatprep.subr.mxu0 %v5928_v45 }
0x1736   :  { %6661 = vmatmul.mubr.msk.f32.vlgmr.msra.gmra.mrb[52].mxu1 %vm294_vm2, %v6630_v56 }
0x1737   :  { %6669 = vmatpush3.msra.mxu1 %v6652_v59  ;;  %6670 = vmatprep.mubr.msk.f32.mxu1 %vm7241_vm1, %v7240_v20  ;;  %v7041_v59 = vpack.c.bf16 %v5942_v58, %v5941_v12 }
0x1738   :  { %7030 = vmatprep.subr.bf16.mxu1 %v7029_v21 }
0x1805   :  { %v3785_v62 = vpop.f32.mrb[50].mxu1 }
0x1806   :  { %v3786_v63 = vadd.f32 %v7817_v61, %v3785_v62  ;;  %v6657_v0 = vpop.f32.mrb[51].mxu1 }
0x1808   :  { %v3865_v2 = vsel %vm294_vm2, %v3786_v63, -inf }
0x1809   :  { %3866 = vmax.xlane.f32.xlu0 %v3865_v2  ;;  %v3861_v6 = vpop.f32.mrb[52].mxu1 }
0x180a   :  { %v3862_v7 = vadd.f32 %v7824_v4, %v3861_v6  ;;  %v6662_v8 = vpop.f32.mrb[53].mxu1 }
0x180c   :  { %v3868_v3 = vsel %vm294_vm2, %v3862_v7, -inf }
0x180d   :  { %3869 = vmax.xlane.f32.xlu1 %v3868_v3 }
0x1896   :  { %v3867_v9 = vpop.xlane.xlu0 %3866 }
0x1897   :  { %v3871_v10 = vsub.f32 %v3786_v63, %v3867_v9 }
0x1899   :  { %v3873_v11 = vmul.f32 1.442695, %v3871_v10 }
0x189a   :  { %v3870_v13 = vpop.xlane.xlu1 %3869 }
0x189b   :  { %7182 = vpow2.f32 %v3873_v11  ;;  %v3872_v1 = vsub.f32 %v3862_v7, %v3870_v13 }
0x189d   :  { %v3875_v14 = vmul.f32 1.442695, %v3872_v1 }
0x189f   :  { %7184 = vpow2.f32 %v3875_v14 }
0x18a5   :  { %v7183_v15 = vpop.eup %7182 }
0x18a6   :  { %v3877_v16 = vsel %vm294_vm2, %v7183_v15, 0.0 }
0x18a7   :  { %3878 = vadd.xlane.f32.xlu0 %v3877_v16 }
0x18a9   :  { %v7185_v17 = vpop.eup %7184 }
0x18aa   :  { %v3880_v18 = vsel %vm294_vm2, %v7185_v17, 0.0 }
0x18ab   :  { %3881 = vadd.xlane.f32.xlu1 %v3880_v18 }
0x1934   :  { %v3879_v22 = vpop.xlane.xlu0 %3878 }
0x1935   :  { %7186 = vrcp.f32 %v3879_v22  ;;  %v5960_v22 = vld [vmem:[%s8198_s2 + $0xe0] sm:$0xff] }
0x1938   :  { %v3882_v23 = vpop.xlane.xlu1 %3881 }
0x1939   :  { %7188 = vrcp.f32 %v3882_v23  ;;  %v5961_v23 = vld [vmem:[%s8198_s2 + $0xe8] sm:$0xff] }
0x193f   :  { %v7187_v29 = vpop.eup %7186 }
0x1940   :  { %v3885_v24 = vmul.f32 %v7187_v29, %v7183_v15  ;;  %v7053_v29 = vpack.c.bf16 %v5961_v23, %v5960_v22 }
0x1942   :  { %6666 = vmatmul.mubr.msk.f32.vlgmr.msra.gmra.mrb[32].mxu0 %vm294_vm2, %v3885_v24  ;;  %v5957_v24 = vld [vmem:[%s8201_s5 + $0x30] sm:$0xff] }
0x1943   :  { %v7189_v33 = vpop.eup %7188  ;;  %6674 = vmatpush3.msra.mxu0 %v5928_v45 }
0x1944   :  { %v3886_v34 = vmul.f32 %v7189_v33, %v7185_v17  ;;  %6678 = vmatprep.subr.mxu0 %v5903_v48  ;;  %v5962_v33 = vld [vmem:[%s8198_s2 + $0xf0] sm:$0xff] }
0x1946   :  { %6671 = vmatmul.mubr.msk.f32.vlgmr.msra.gmra.mrb[54].mxu1 %vm294_vm2, %v3886_v34  ;;  %v5963_v34 = vld [vmem:[%s8198_s2 + $0xf8] sm:$0xff] }
0x1947   :  { %7032 = vmatpush3.bf16.msra.mxu1 %v7029_v21  ;;  %6691 = vmatprep.mubr.msk.f32.mxu1 %vm54_vm0, %v7773_v46 }
0x1948   :  { %7034 = vmatprep.subr.bf16.mxu1 %v7033_v35 }
0x194b   :  { %7036 = vmatpush3.bf16.msra.mxu1 %v7033_v35 }
0x194c   :  { %7046 = vmatprep.subr.bf16.mxu1 %v7045_v38 }
0x194e   :  { %6692 = vmatmul.mubr.msk.f32.vlgmr.msra.gmra.mrb[56].mxu1 %vm54_vm0, %v7775_v47 }
0x194f   :  { %7048 = vmatpush3.bf16.msra.mxu1 %v7045_v38  ;;  %6713 = vmatprep.mubr.msk.f32.mxu1 %vm54_vm0, %v7773_v46  ;;  %v7057_v38 = vpack.c.bf16 %v5963_v34, %v5962_v33 }
0x1950   :  { %7050 = vmatprep.subr.bf16.mxu1 %v7049_v44 }
0x1953   :  { %7052 = vmatpush3.bf16.msra.mxu1 %v7049_v44  ;;  %v5973_v44 = vld [vmem:[%s8200_s4 + $0xe8] sm:$0xff] }
0x1954   :  { %6721 = vmatprep.subr.mxu1 %v7240_v20  ;;  %v7069_v45 = vpack.c.bf16 %v5973_v44, %v5972_v43 }
0x1956   :  { %6714 = vmatmul.mubr.msk.f32.vlgmr.msra.gmra.mrb[58].mxu1 %vm54_vm0, %v7775_v47 }
0x1957   :  { %6723 = vmatprep.mubr.msk.f32.mxu1 %vm7241_vm1, %v7240_v20 }
0x1a15   :  { %v3956_v41 = vpop.f32.mrb[32].mxu0 }
0x1a16   :  { %v6667_v53 = vpop.f32.mrb[33].mxu0  ;;  %6675 = vmatprep.mubr.msk.f32.mxu0 %vm294_vm2, %v3956_v41  ;;  %v5975_v41 = vld [vmem:[%s8200_s4 + $0xf8] sm:$0xff] }
0x1a17   :  { %v5967_v53 = vld [vmem:[%s8199_s3 + $0xe8] sm:$0xff] }
0x1a19   :  { %v4029_v56 = vpop.f32.mrb[54].mxu1 }
0x1a1a   :  { %v6672_v5 = vpop.f32.mrb[55].mxu1  ;;  %6676 = vmatmul.mubr.msk.f32.vlgmr.msra.gmra.mrb[34].mxu0 %vm294_vm2, %v4029_v56  ;;  %v5968_v56 = vld [vmem:[%s8199_s3 + $0xf0] sm:$0xff] }
0x1a1b   :  { %6679 = vmatpush3.msra.mxu0 %v5903_v48  ;;  %6680 = vmatprep.mubr.msk.f32.mxu0 %vm294_vm2, %v7886_v52  ;;  %v5974_v48 = vld [vmem:[%s8200_s4 + $0xf0] sm:$0xff]  ;;  %v5969_v5 = vld [vmem:[%s8199_s3 + $0xf8] sm:$0xff] }
0x1a1c   :  { %7038 = vmatprep.subr.bf16.mxu0 %v7037_v55  ;;  %v7073_v50 = vpack.c.bf16 %v5975_v41, %v5974_v48 }
0x1a21   :  { %v6693_v60 = vpop.f32.mrb[56].mxu1 }
0x1a22   :  { %v4268_v62 = vpop.f32.mrb[57].mxu1  ;;  %6681 = vmatmul.mubr.msk.f32.vlgmr.msra.gmra.mrb[34].mxu0 %vm294_vm2, %v7888_v54 }
0x1a23   :  { %7040 = vmatpush3.bf16.msra.mxu0 %v7037_v55  ;;  %6702 = vmatprep.mubr.msk.f32.mxu0 %vm54_vm0, %v7773_v46  ;;  %v7061_v55 = vpack.c.bf16 %v5967_v53, %v5966_v51 }
0x1a24   :  { %7042 = vmatprep.subr.bf16.mxu0 %v7041_v59 }
0x1a27   :  { %7044 = vmatpush3.bf16.msra.mxu0 %v7041_v59 }
0x1a28   :  { %6716 = vmatprep.subr.mxu0 %v7240_v20 }
0x1a29   :  { %v6715_v52 = vpop.f32.mrb[58].mxu1 }
0x1a2a   :  { %6703 = vmatmul.mubr.msk.f32.vlgmr.msra.gmra.mrb[36].mxu0 %vm54_vm0, %v7775_v47  ;;  %v4428_v63 = vpop.f32.mrb[59].mxu1 }
0x1a2b   :  { %6718 = vmatprep.mubr.msk.f32.mxu0 %vm7241_vm1, %v7240_v20 }
0x1afd   :  { %v6704_v0 = vpop.f32.mrb[36].mxu0 }
0x1afe   :  { %v4348_v2 = vpop.f32.mrb[37].mxu0  ;;  %6722 = vmatpush3.xpose.msk.msra.mxu1 %vm294_vm2, %v6704_v0 }
0x1aff   :  { %6717 = vmatpush3.xpose.msk.msra.mxu0 %vm294_vm2, %v4348_v2  ;;  %6731 = vmatprep.subr.mxu1 %v7240_v20 }
0x1b00   :  { %6726 = vmatprep.subr.mxu0 %v7240_v20 }
0x1b01   :  { %6724 = vmatmul.mubr.msk.f32.vlgmr.msra.gmra.mrb[60].mxu1 %vm294_vm2, %v6693_v60  ;;  %v7065_v60 = vpack.c.bf16 %v5969_v5, %v5968_v56 }
0x1b02   :  { %6719 = vmatmul.mubr.msk.f32.vlgmr.msra.gmra.mrb[38].mxu0 %vm294_vm2, %v4268_v62  ;;  %6732 = vmatpush3.msra.mxu1 %v6715_v52 }
0x1b03   :  { %6727 = vmatpush3.msra.mxu0 %v4428_v63  ;;  %6733 = vmatprep.mubr.msk.f32.mxu1 %vm7241_vm1, %v7240_v20 }
0x1b04   :  { %6728 = vmatprep.mubr.msk.f32.mxu0 %vm7241_vm1, %v7240_v20  ;;  %7054 = vmatprep.subr.bf16.mxu1 %v7053_v29 }
0x1b05   :  { %6736 = vmatprep.subr.mxu0 %v5957_v24 }
0x1bd4   :  { %v4585_v54 = vpop.f32.mrb[60].mxu1 }
0x1bd5   :  { %v4586_v6 = vadd.f32 %v7824_v4, %v4585_v54  ;;  %v4509_v7 = vpop.f32.mrb[38].mxu0  ;;  %v6725_v8 = vpop.f32.mrb[61].mxu1 }
0x1bd6   :  { %v4510_v3 = vadd.f32 %v7817_v61, %v4509_v7  ;;  %v6720_v9 = vpop.f32.mrb[39].mxu0 }
0x1bd7   :  { %v4592_v10 = vsel %vm294_vm2, %v4586_v6, -inf }
0x1bd8   :  { %4593 = vmax.xlane.f32.xlu1 %v4592_v10  ;;  %v4589_v11 = vsel %vm294_vm2, %v4510_v3, -inf }
0x1bd9   :  { %4590 = vmax.xlane.f32.xlu0 %v4589_v11 }
0x1c65   :  { %v4594_v13 = vpop.xlane.xlu1 %4593 }
0x1c66   :  { %v4596_v1 = vsub.f32 %v4586_v6, %v4594_v13  ;;  %v4591_v14 = vpop.xlane.xlu0 %4590 }
0x1c67   :  { %v4595_v15 = vsub.f32 %v4510_v3, %v4591_v14 }
0x1c68   :  { %v4599_v16 = vmul.f32 1.442695, %v4596_v1 }
0x1c69   :  { %v4597_v17 = vmul.f32 1.442695, %v4595_v15 }
0x1c6a   :  { %7190 = vpow2.f32 %v4599_v16 }
0x1c6b   :  { %7192 = vpow2.f32 %v4597_v17 }
0x1c74   :  { %v7191_v18 = vpop.eup %7190 }
0x1c75   :  { %v7193_v19 = vpop.eup %7192  ;;  %v4604_v30 = vsel %vm294_vm2, %v7191_v18, 0.0 }
0x1c76   :  { %4605 = vadd.xlane.f32.xlu1 %v4604_v30  ;;  %v4601_v21 = vsel %vm294_vm2, %v7193_v19, 0.0 }
0x1c77   :  { %4602 = vadd.xlane.f32.xlu0 %v4601_v21 }
0x1d03   :  { %v4606_v25 = vpop.xlane.xlu1 %4605 }
0x1d04   :  { %7194 = vrcp.f32 %v4606_v25  ;;  %v4603_v26 = vpop.xlane.xlu0 %4602 }
0x1d05   :  { %7196 = vrcp.f32 %v4603_v26  ;;  %v5984_v26 = vld [vmem:[%s8201_s5 + $0x38] sm:$0xff] }
0x1d0e   :  { %v7195_v35 = vpop.eup %7194 }
0x1d0f   :  { %v7197_v36 = vpop.eup %7196  ;;  %v4610_v37 = vmul.f32 %v7195_v35, %v7191_v18 }
0x1d10   :  { %v4609_v42 = vmul.f32 %v7197_v36, %v7193_v19 }
0x1d11   :  { %6734 = vmatmul.mubr.msk.f32.vlgmr.msra.gmra.mrb[62].mxu1 %vm294_vm2, %v4610_v37  ;;  %v8077_v37 = vld [vmem:[%s8204_s8 + $0x8] sm:$0xff] }
0x1d12   :  { %7056 = vmatpush3.bf16.msra.mxu1 %v7053_v29  ;;  %6729 = vmatmul.mubr.msk.f32.vlgmr.msra.gmra.mrb[40].mxu0 %vm294_vm2, %v4609_v42 }
0x1d13   :  { %6749 = vmatprep.mubr.msk.f32.mxu1 %vm54_vm0, %v7773_v46  ;;  %7058 = vmatprep.subr.bf16.mxu1 %v7057_v38 }
0x1d14   :  { %6737 = vmatpush3.msra.mxu0 %v5957_v24 }
0x1d15   :  { %7062 = vmatprep.subr.bf16.mxu0 %v7061_v55 }
0x1d16   :  { %7060 = vmatpush3.bf16.msra.mxu1 %v7057_v38  ;;  %v5490_v38 = vrot.slane %v8077_v37, %v2632_v40 }
0x1d17   :  { %7070 = vmatprep.subr.bf16.mxu1 %v7069_v45 }
0x1d19   :  { %6750 = vmatmul.mubr.msk.f32.vlgmr.msra.gmra.mrb[64].mxu1 %vm54_vm0, %v7775_v47 }
0x1d1a   :  { %7072 = vmatpush3.bf16.msra.mxu1 %v7069_v45  ;;  %6771 = vmatprep.mubr.msk.f32.mxu1 %vm54_vm0, %v7773_v46 }
0x1d1b   :  { %7074 = vmatprep.subr.bf16.mxu1 %v7073_v50 }
0x1d1e   :  { %7076 = vmatpush3.bf16.msra.mxu1 %v7073_v50 }
0x1d1f   :  { %6784 = vmatprep.subr.mxu1 %v7240_v20 }
0x1d21   :  { %6772 = vmatmul.mubr.msk.f32.vlgmr.msra.gmra.mrb[66].mxu1 %vm54_vm0, %v7775_v47 }
0x1d22   :  { %6786 = vmatprep.mubr.msk.f32.mxu1 %vm7241_vm1, %v7240_v20 }
0x1de4   :  { %v4753_v12 = vpop.f32.mrb[62].mxu1 }
0x1de5   :  { %v4680_v58 = vpop.f32.mrb[40].mxu0  ;;  %v6735_v59 = vpop.f32.mrb[63].mxu1 }
0x1de6   :  { %v6730_v62 = vpop.f32.mrb[41].mxu0  ;;  %6738 = vmatprep.mubr.msk.f32.mxu0 %vm294_vm2, %v4680_v58 }
0x1de7   :  { %6739 = vmatmul.mubr.msk.f32.vlgmr.msra.gmra.mrb[34].mxu0 %vm294_vm2, %v4753_v12  ;;  %v5988_v62 = vld [vmem:[%s8202_s6 + $0x28] sm:$0xff] }
0x1de8   :  { %7064 = vmatpush3.bf16.msra.mxu0 %v7061_v55  ;;  %6760 = vmatprep.mubr.msk.f32.mxu0 %vm54_vm0, %v7773_v46 }
0x1de9   :  { %7066 = vmatprep.subr.bf16.mxu0 %v7065_v60 }
0x1dec   :  { %v6751_v52 = vpop.f32.mrb[64].mxu1  ;;  %7068 = vmatpush3.bf16.msra.mxu0 %v7065_v60  ;;  %v5987_v60 = vld [vmem:[%s8202_s6 + $0x20] sm:$0xff] }
0x1ded   :  { %v4913_v63 = vpop.f32.mrb[65].mxu1  ;;  %6774 = vmatprep.subr.mxu0 %v7240_v20 }
0x1def   :  { %6761 = vmatmul.mubr.msk.f32.vlgmr.msra.gmra.mrb[42].mxu0 %vm54_vm0, %v7775_v47 }
0x1df0   :  { %6776 = vmatprep.mubr.msk.f32.mxu0 %vm7241_vm1, %v7240_v20 }
0x1df4   :  { %v6773_v0 = vpop.f32.mrb[66].mxu1 }
0x1df5   :  { %v5073_v2 = vpop.f32.mrb[67].mxu1 }
0x1df6   :  { %6785 = vmatpush3.msra.mxu1 %v5073_v2 }
0x1ec2   :  { %v6762_v54 = vpop.f32.mrb[42].mxu0 }
0x1ec3   :  { %v4993_v6 = vpop.f32.mrb[43].mxu0 }
0x1ec4   :  { %6775 = vmatpush3.xpose.msk.msra.mxu0 %vm294_vm2, %v4993_v6  ;;  %v5994_v6 = vld [vmem:[%s8203_s7 + $0x88] sm:$0xff] }
0x1ec5   :  { %6779 = vmatprep.subr.mxu0 %v7240_v20 }
0x1ec7   :  { %6777 = vmatmul.mubr.msk.f32.vlgmr.msra.gmra.mrb[44].mxu0 %vm294_vm2, %v4913_v63  ;;  %v5989_v63 = vld [vmem:[%s8202_s6 + $0x30] sm:$0xff] }
0x1ec8   :  { %6780 = vmatpush3.xpose.msk.msra.mxu0 %vm294_vm2, %v6762_v54  ;;  %6781 = vmatprep.mubr.msk.f32.mxu0 %vm7241_vm1, %v7240_v20  ;;  %v5993_v54 = vld [vmem:[%s8203_s7 + $0x80] sm:$0xff] }
0x1ec9   :  { %6789 = vmatprep.subr.mxu0 %v7240_v20 }
0x1ecb   :  { %6782 = vmatmul.mubr.msk.f32.vlgmr.msra.gmra.mrb[46].mxu0 %vm294_vm2, %v6751_v52  ;;  %v7077_v52 = vpack.c.bf16 %v5988_v62, %v5987_v60 }
0x1ecc   :  { %6790 = vmatpush3.msra.mxu0 %v6773_v0  ;;  %6791 = vmatprep.mubr.msk.f32.mxu0 %vm7241_vm1, %v7240_v20  ;;  %v5990_v0 = vld [vmem:[%s8202_s6 + $0x38] sm:$0xff] }
0x1ecd   :  { %6794 = vmatprep.subr.mxu0 %v5984_v26  ;;  %7078 = vmatprep.subr.bf16.mxu1 %v7077_v52  ;;  %v7081_v2 = vpack.c.bf16 %v5990_v0, %v5989_v63 }
0x1f9a   :  { %v5154_v7 = vpop.f32.mrb[44].mxu0 }
0x1f9b   :  { %v5155_v8 = vadd.f32 %v7817_v61, %v5154_v7  ;;  %v6778_v3 = vpop.f32.mrb[45].mxu0  ;;  %v5995_v7 = vld [vmem:[%s8203_s7 + $0x90] sm:$0xff] }
0x1f9c   :  { %v5996_v3 = vld [vmem:[%s8203_s7 + $0x98] sm:$0xff] }
0x1f9d   :  { %v5234_v9 = vsel %vm294_vm2, %v5155_v8, -inf }
0x1f9e   :  { %5235 = vmax.xlane.f32.xlu0 %v5234_v9  ;;  %v5230_v10 = vpop.f32.mrb[46].mxu0  ;;  %v7089_v9 = vpack.c.bf16 %v5996_v3, %v5995_v7 }
0x1f9f   :  { %v5231_v11 = vadd.f32 %v7824_v4, %v5230_v10  ;;  %v6783_v13 = vpop.f32.mrb[47].mxu0  ;;  %v5997_v10 = vld [vmem:[%s8203_s7 + $0xa0] sm:$0xff] }
0x1fa1   :  { %v5237_v1 = vsel %vm294_vm2, %v5231_v11, -inf }
0x1fa2   :  { %5238 = vmax.xlane.f32.xlu1 %v5237_v1  ;;  %v5999_v1 = vld [vmem:[%s8203_s7 + $0xb0] sm:$0xff] }
0x202b   :  { %v5236_v14 = vpop.xlane.xlu0 %5235 }
0x202c   :  { %v5240_v15 = vsub.f32 %v5155_v8, %v5236_v14  ;;  %v7085_v8 = vpack.c.bf16 %v5994_v6, %v5993_v54  ;;  %v6000_v14 = vld [vmem:[%s8203_s7 + $0xb8] sm:$0xff] }
0x202e   :  { %v5242_v16 = vmul.f32 1.442695, %v5240_v15  ;;  %v7097_v15 = vpack.c.bf16 %v6000_v14, %v5999_v1 }
0x202f   :  { %v5239_v17 = vpop.xlane.xlu1 %5238 }
0x2030   :  { %7198 = vpow2.f32 %v5242_v16  ;;  %v5241_v20 = vsub.f32 %v5231_v11, %v5239_v17  ;;  %v5998_v11 = vld [vmem:[%s8203_s7 + $0xa8] sm:$0xff]  ;;  %v6001_v16 = vld [vmem:[%s8203_s7 + $0xc0] sm:$0xff] }
0x2031   :  { %v7093_v13 = vpack.c.bf16 %v5998_v11, %v5997_v10  ;;  %v6002_v17 = vld [vmem:[%s8203_s7 + $0xc8] sm:$0xff] }
0x2032   :  { %v5244_v18 = vmul.f32 1.442695, %v5241_v20  ;;  %v7101_v20 = vpack.c.bf16 %v6002_v17, %v6001_v16  ;;  %v5752_v16 = vrot.slane %v8077_v37, %v2893_v27 }
0x2034   :  { %7200 = vpow2.f32 %v5244_v18  ;;  %v6003_v18 = vld [vmem:[%s8203_s7 + $0xd0] sm:$0xff] }
0x203a   :  { %v7199_v61 = vpop.eup %7198 }
0x203b   :  { %v5246_v19 = vsel %vm294_vm2, %v7199_v61, 0.0 }
0x203c   :  { %5247 = vadd.xlane.f32.xlu0 %v5246_v19 }
0x203e   :  { %v7201_v30 = vpop.eup %7200 }
0x203f   :  { %v5249_v21 = vsel %vm294_vm2, %v7201_v30, 0.0 }
0x2040   :  { %5250 = vadd.xlane.f32.xlu1 %v5249_v21  ;;  %v6006_v21 = vld [vmem:[%s8203_s7 + $0xe8] sm:$0xff] }
0x20c9   :  { %v5248_v4 = vpop.xlane.xlu0 %5247 }
0x20ca   :  { %7202 = vrcp.f32 %v5248_v4 }
0x20cd   :  { %v5251_v22 = vpop.xlane.xlu1 %5250 }
0x20ce   :  { %7204 = vrcp.f32 %v5251_v22 }
0x20d4   :  { %v7203_v23 = vpop.eup %7202 }
0x20d5   :  { %v5254_v29 = vmul.f32 %v7203_v23, %v7199_v61  ;;  %v6004_v61 = vld [vmem:[%s8203_s7 + $0xd8] sm:$0xff] }
0x20d6   :  { %v7105_v19 = vpack.c.bf16 %v6004_v61, %v6003_v18  ;;  %v5758_v61 = vrot.slane %v8077_v37, %v2899_v28 }
0x20d7   :  { %6787 = vmatmul.mubr.msk.f32.vlgmr.msra.gmra.mrb[68].mxu1 %vm294_vm2, %v5254_v29 }
0x20d8   :  { %v7205_v24 = vpop.eup %7204  ;;  %7080 = vmatpush3.bf16.msra.mxu1 %v7077_v52 }
0x20d9   :  { %v5255_v25 = vmul.f32 %v7205_v24, %v7201_v30  ;;  %7082 = vmatprep.subr.bf16.mxu1 %v7081_v2  ;;  %v6005_v30 = vld [vmem:[%s8203_s7 + $0xe0] sm:$0xff] }
0x20da   :  { %v7109_v4 = vpack.c.bf16 %v6006_v21, %v6005_v30 }
0x20db   :  { %6792 = vmatmul.mubr.msk.f32.vlgmr.msra.gmra.mrb[48].mxu0 %vm294_vm2, %v5255_v25 }
0x20dc   :  { %6795 = vmatpush3.msra.mxu0 %v5984_v26  ;;  %7084 = vmatpush3.bf16.msra.mxu1 %v7081_v2 }
0x20dd   :  { %7086 = vmatprep.subr.bf16.mxu0 %v7085_v8 }
0x21aa   :  { %v5325_v33 = vpop.f32.mrb[68].mxu1 }
0x21ab   :  { %v6788_v34 = vpop.f32.mrb[69].mxu1  ;;  %6796 = vmatprep.mubr.msk.f32.mxu0 %vm294_vm2, %v5325_v33  ;;  %v5524_v33 = vrot.slane %v8077_v37, %v2667_v31  ;;  %v6007_v31 = vld [vmem:[%s8203_s7 + $0xf0] sm:$0xff] }
0x21ae   :  { %v5398_v35 = vpop.f32.mrb[48].mxu0 }
0x21af   :  { %v6793_v36 = vpop.f32.mrb[49].mxu0  ;;  %6797 = vmatmul.mubr.msk.f32.vlgmr.msra.gmra.mrb[34].mxu0 %vm294_vm2, %v5398_v35 }
0x21b0   :  { %7088 = vmatpush3.bf16.msra.mxu0 %v7085_v8 }
0x21b1   :  { %7090 = vmatprep.subr.bf16.mxu0 %v7089_v9 }
0x21b4   :  { %7092 = vmatpush3.bf16.msra.mxu0 %v7089_v9 }
0x21b5   :  { %7094 = vmatprep.subr.bf16.mxu0 %v7093_v13 }
0x21b8   :  { %7096 = vmatpush3.bf16.msra.mxu0 %v7093_v13 }
0x21b9   :  { %7098 = vmatprep.subr.bf16.mxu0 %v7097_v15 }
0x21bc   :  { %7100 = vmatpush3.bf16.msra.mxu0 %v7097_v15 }
0x21bd   :  { %7102 = vmatprep.subr.bf16.mxu0 %v7101_v20 }
0x21c0   :  { %7104 = vmatpush3.bf16.msra.mxu0 %v7101_v20 }
0x21c1   :  { %7106 = vmatprep.subr.bf16.mxu0 %v7105_v19 }
0x21c4   :  { %7108 = vmatpush3.bf16.msra.mxu0 %v7105_v19 }
0x21c5   :  { %7110 = vmatprep.subr.bf16.mxu0 %v7109_v4 }
0x21c8   :  { %7112 = vmatpush3.bf16.msra.mxu0 %v7109_v4 }
0x2282   :  { %v6798_v42 = vpop.f32.mrb[34].mxu0 }
0x2283   :  { %v5492_v43 = vadd.f32 %v6798_v42, %v5490_v38  ;;  %v5476_v44 = vpop.f32.mrb[35].mxu0  ;;  %v5530_v42 = vrot.slane %v8077_v37, %v2673_v32  ;;  %v5541_v32 = vrot.slane %v8077_v37, %v2683_v49 }
0x2284   :  { %v5491_v45 = vadd.f32 %v5490_v38, %v5476_v44 }
0x2285   :  { %v5494_v48 = vadd.f32 %v5492_v43, %v7775_v47 }
0x2286   :  { %v5493_v41 = vadd.f32 %v5491_v45, %v7773_v46 }
0x2287   :  { %v5498_v50 = vsel %vm54_vm0, %v5494_v48, 0.0 }
0x2288   :  { %5499 = vadd.xlane.f32.xlu1 %v5498_v50  ;;  %v5495_v51 = vsel %vm54_vm0, %v5493_v41, 0.0 }
0x2289   :  { %5496 = vadd.xlane.f32.xlu0 %v5495_v51 }
0x2315   :  { %v5500_v53 = vpop.xlane.xlu1 %5499 }
0x2316   :  { %v5502_v55 = vmul.f32 0.03125, %v5500_v53  ;;  %v5497_v56 = vpop.xlane.xlu0 %5496 }
0x2317   :  { %v5501_v5 = vmul.f32 0.03125, %v5497_v56 }
0x2318   :  { %v8086_v12 = vsub.f32 %v5494_v48, %v5502_v55 }
0x2319   :  { %v8088_v40 = vsub.f32 %v5493_v41, %v5501_v5  ;;  %v6008_v41 = vld [vmem:[%s8203_s7 + $0xf8] sm:$0xff]  ;;  %s7242_s7 = smov [#allocation2]  }
0x231a   :  { %v5506_v58 = vmul.f32 %v8086_v12, %v8086_v12  ;;  %v7113_v50 = vpack.c.bf16 %v6008_v41, %v6007_v31  ;;  %s5768_s0 = sshll.u32 %s7242_s7, 4  ;;  %s5769_s0 = int_to_ptr.vmem [resolvable:$true] %s5768_s0 }
0x231b   :  { %v5505_v46 = vmul.f32 %v8088_v40, %v8088_v40  ;;  %s7216_s2 = scalar_lea.vmem %s5769_s0, 256  ;;  %p7221_p1 = scmp.lt.s32.totalorder %s5769_s0, %s5769_s0 }
0x231c   :  { %v5510_v47 = vsel %vm54_vm0, %v5506_v58, 0.0  ;;  %7114 = vmatprep.subr.bf16.mxu0 %v7113_v50  ;;  %p7217_p0 = scmp.ne.s32.totalorder %s5769_s0, %s7216_s2  ;;  %p7222_p2 = scmp.lt.s32.totalorder %s7216_s2, %s7216_s2 }
0x231d   :  { %5511 = vadd.xlane.f32.xlu1 %v5510_v47  ;;  %v5507_v59 = vsel %vm54_vm0, %v5505_v46, 0.0  ;;  %7116 = vmatpush3.bf16.msra.mxu0 %v7113_v50 }
0x231e   :  { %5508 = vadd.xlane.f32.xlu0 %v5507_v59  ;;  %p7223_p3 = por %p7222_p2, %p7221_p1 }
0x2320   :  { %p7224_p4 = pnand %p7223_p3, %p7217_p0 }
0x23aa   :  { %v5512_v22 = vpop.xlane.xlu1 %5511 }
0x23ab   :  { %v5514_v23 = vmul.f32 0.03125, %v5512_v22  ;;  %v5509_v29 = vpop.xlane.xlu0 %5508 }
0x23ac   :  { %v5513_v24 = vmul.f32 0.03125, %v5509_v29 }
0x23ad   :  { %v5516_v25 = vadd.f32 1e-05, %v5514_v23 }
0x23ae   :  { %v5515_v26 = vadd.f32 1e-05, %v5513_v24 }
0x23af   :  { %7206 = vrsqrt.f32 %v5516_v25 }
0x23b0   :  { %7208 = vrsqrt.f32 %v5515_v26 }
0x23b9   :  { %v7207_v34 = vpop.eup %7206 }
0x23ba   :  { %v7209_v35 = vpop.eup %7208  ;;  %v5520_v36 = vmul.f32 %v7207_v34, %v8086_v12 }
0x23bb   :  { %v5519_v38 = vmul.f32 %v7209_v35, %v8088_v40  ;;  %v5645_v40 = vrot.slane %v8077_v37, %v2786_v57 }
0x23bc   :  { %v5526_v43 = vmul.f32 %v5524_v33, %v5520_v36 }
0x23bd   :  { %v5525_v44 = vmul.f32 %v5524_v33, %v5519_v38 }
0x23be   :  { %v5532_v48 = vadd.f32 %v5530_v42, %v5526_v43 }
0x23bf   :  { %v5531_v45 = vadd.f32 %v5530_v42, %v5525_v44 }
0x23c1   :  { %6807 = vmatprep.mubr.msk.f32.mxu1 %vm54_vm0, %v5531_v45 }
0x23c2   :  { %6808 = vmatmul.mubr.msk.f32.vlgmr.msra.gmra.mrb[70].mxu1 %vm54_vm0, %v5532_v48 }
0x2495   :  { %v6809_v51 = vpop.f32.mrb[70].mxu1 }
0x2496   :  { %v5620_v53 = vadd.f32 %v6809_v51, %v5541_v32  ;;  %v5614_v55 = vpop.f32.mrb[71].mxu1 }
0x2497   :  { %v5615_v56 = vadd.f32 %v5614_v55, %v5541_v32 }
0x2498   :  { %v5624_v12 = vmax.f32 %v5620_v53, 0.0 }
0x2499   :  { %v5623_v5 = vmax.f32 %v5615_v56, 0.0 }
0x249b   :  { %6842 = vmatprep.mubr.f32.mxu0 %v5623_v5 }
0x249c   :  { %6843 = vmatmul.mubr.f32.vlgmr.msra.gmra.mrb[50].mxu0 %v5624_v12 }
0x256f   :  { %v6844_v58 = vpop.f32.mrb[50].mxu0 }
0x2570   :  { %v5718_v46 = vadd.f32 %v6844_v58, %v5645_v40  ;;  %v5712_v47 = vpop.f32.mrb[51].mxu0 }
0x2571   :  { %v5713_v59 = vadd.f32 %v5712_v47, %v5645_v40 }
0x2572   :  { %v5722_v60 = vadd.f32 %v5718_v46, %v5532_v48 }
0x2573   :  { %v5721_v62 = vadd.f32 %v5713_v59, %v5531_v45 }
0x2574   :  { %v5726_v49 = vsel %vm54_vm0, %v5722_v60, 0.0 }
0x2575   :  { %5727 = vadd.xlane.f32.xlu1 %v5726_v49  ;;  %v5723_v52 = vsel %vm54_vm0, %v5721_v62, 0.0 }
0x2576   :  { %5724 = vadd.xlane.f32.xlu0 %v5723_v52 }
0x2602   :  { %v5728_v63 = vpop.xlane.xlu1 %5727 }
0x2603   :  { %v5730_v0 = vmul.f32 0.03125, %v5728_v63  ;;  %v5725_v2 = vpop.xlane.xlu0 %5724 }
0x2604   :  { %v5729_v54 = vmul.f32 0.03125, %v5725_v2 }
0x2605   :  { %v5732_v6 = vsub.f32 %v5722_v60, %v5730_v0 }
0x2606   :  { %v5731_v7 = vsub.f32 %v5721_v62, %v5729_v54 }
0x2607   :  { %v5734_v8 = vmul.f32 %v5732_v6, %v5732_v6 }
0x2608   :  { %v5733_v57 = vmul.f32 %v5731_v7, %v5731_v7 }
0x2609   :  { %v5738_v3 = vsel %vm54_vm0, %v5734_v8, 0.0 }
0x260a   :  { %5739 = vadd.xlane.f32.xlu1 %v5738_v3  ;;  %v5735_v9 = vsel %vm54_vm0, %v5733_v57, 0.0 }
0x260b   :  { %5736 = vadd.xlane.f32.xlu0 %v5735_v9 }
0x2697   :  { %v5740_v10 = vpop.xlane.xlu1 %5739 }
0x2698   :  { %v5742_v11 = vmul.f32 0.03125, %v5740_v10  ;;  %v5737_v13 = vpop.xlane.xlu0 %5736 }
0x2699   :  { %v5741_v1 = vmul.f32 0.03125, %v5737_v13 }
0x269a   :  { %v5744_v14 = vadd.f32 1e-05, %v5742_v11 }
0x269b   :  { %v5743_v15 = vadd.f32 1e-05, %v5741_v1 }
0x269c   :  { %7210 = vrsqrt.f32 %v5744_v14 }
0x269d   :  { %7212 = vrsqrt.f32 %v5743_v15 }
0x26a6   :  { %v7211_v17 = vpop.eup %7210 }
0x26a7   :  { %v7213_v20 = vpop.eup %7212  ;;  %v5748_v18 = vmul.f32 %v7211_v17, %v5732_v6 }
0x26a8   :  { %v5747_v19 = vmul.f32 %v7213_v20, %v5731_v7 }
0x26a9   :  { %v5754_v30 = vmul.f32 %v5752_v16, %v5748_v18 }
0x26aa   :  { %v5753_v21 = vmul.f32 %v5752_v16, %v5747_v19 }
0x26ab   :  { %v5760_v4 = vadd.f32 %v5758_v61, %v5754_v30 }
0x26ac   :  { %v5759_v22 = vadd.f32 %v5758_v61, %v5753_v21 }
0x26ad   :  { %5762 = vst.msk [vmem:[#allocation2 + $0x8] sm:$0xff] %vm54_vm0, %v5760_v4 }
0x26ae   :  { %5761 = vst.msk [vmem:[#allocation2] sm:$0xff] %vm54_vm0, %v5759_v22 }
0x26af   :  { %7227 = shalt.err (!%p7224_p4)
}
0x26b0   :  { %s7228_s14 = scalar_lea.hbm %s8205_s9, 256 }
0x26b1   :  { %p7229_p5 = scmp.ne.s32.totalorder %s8205_s9, %s7228_s14  ;;  %p7232_p6 = scmp.lt.u32.totalorder %s7228_s14, %s8205_s9 }
0x26b3   :  { %p7234_p7 = pnand %p7232_p6, %p7229_p5 }
0x26b5   :  { %7237 = shalt.err (!%p7234_p7)
}
0x26b6   :  { %s7243_s16 = smov 128   ;;  %s7244_s17 = smov 8  }
0x26b7   :  { %5774 = dma.vmem_to_hbm [thread:$0]  %s5769_s0, 256, %s8205_s9, [#allocation3], %s7243_s16, %s7243_s16, %s7244_s17  }
0x26b8   :  { %7238 = dma.done.wait [#allocation3], 256  }
0x26b9   :  { %7239 = vsyncadd [#allocation3], 4294967040 }
0x26ba   :  { %5778 = vsyncpa [#allocation3], 1 }

</bundles_post_ra>
